<compile_context>
chip_gen: v7x
topology: tpu7x:2x2x1
jax: 0.10.0
libtpu: 0.0.40
codegen_flags: <defaults>
</compile_context>

<pallas_src>
import jax
import jax.numpy as jnp
from jax.experimental import pallas as pl
from jax.experimental.pallas import tpu as pltpu

# ---------------- configuration (small, consistent with the module) ---------
OUTPUT_DIM = 4
EMBED = 32                 # embedding_size
NUM_LAYERS = 2
NUM_HEADS = 4
FF_DIM = 64                # feedforward_dim
FF_CLASS_DIM = 32          # feedforward_class_dim
VOCAB = 50
SEQ_LEN = 8
BATCH = 2
HALF = EMBED // 2
HEAD_DIM = EMBED // NUM_HEADS
TT = SEQ_LEN + 1           # seq length incl. classification token
EPS = 1e-5                 # PyTorch LayerNorm default


# ---------------- fused Pallas kernel ----------------------------------------
def fused_encoder_kernel(x_ref,
                         wqkv_ref, bqkv_ref, wo_ref, bo_ref,
                         g1_ref, be1_ref, w1_ref, b1_ref, w2_ref, b2_ref,
                         g2_ref, be2_ref,
                         hw1_ref, hb1_ref, hw2_ref, hb2_ref,
                         o_ref,
                         attn_sc, pool_sc):
    """Full forward: NUM_LAYERS post-norm encoder layers + mean-pool + MLP head.

    x_ref: (B*T, E) flattened activations (whole batch, VMEM resident).
    Layer weights are stacked with a leading layer axis (L, ...); biases and
    LayerNorm params are (L, 1, N). Head weights are (E, FFC), (FFC, OUT).
    """
    E = EMBED
    T = TT
    scale = 1.0 / (HEAD_DIM ** 0.5)

    x = x_ref[...].astype(jnp.float32)                              # (B*T, E)

    for l in range(NUM_LAYERS):                                     # static unroll
        # ---- fused QKV projection over the whole flattened batch ----------
        qkv = jnp.dot(x, wqkv_ref[l],
                      preferred_element_type=jnp.float32) + bqkv_ref[l]   # (B*T, 3E)
        q = qkv[:, 0 * E:1 * E] * scale
        k = qkv[:, 1 * E:2 * E]
        v = qkv[:, 2 * E:3 * E]
        wo = wo_ref[l]                                              # (E, E)

        # ---- self attention per (batch, head); Wo fused per head ----------
        for b in range(BATCH):
            r0 = b * T
            acc = jnp.zeros((T, E), jnp.float32)
            for h in range(NUM_HEADS):
                c0 = h * HEAD_DIM
                qh = q[r0:r0 + T, c0:c0 + HEAD_DIM]                 # (T, Dh)
                kh = k[r0:r0 + T, c0:c0 + HEAD_DIM]
                vh = v[r0:r0 + T, c0:c0 + HEAD_DIM]
                # scores = qh @ kh^T (contract last dims, no transpose)
                s = jax.lax.dot_general(qh, kh, (((1,), (1,)), ((), ())),
                                        preferred_element_type=jnp.float32)  # (T, T)
                s = s - jnp.max(s, axis=-1, keepdims=True)
                p = jnp.exp(s)
                p = p * pl.reciprocal(jnp.sum(p, axis=-1, keepdims=True),
                                      approx=True)
                ctx = jnp.dot(p, vh, preferred_element_type=jnp.float32)      # (T, Dh)
                # concat-free output projection: sum_h ctx_h @ Wo[h*Dh:(h+1)*Dh]
                acc = acc + jnp.dot(ctx, wo[c0:c0 + HEAD_DIM, :],
                                    preferred_element_type=jnp.float32)       # (T, E)
            attn_sc[pl.ds(r0, T), :] = acc
        x = x + attn_sc[...] + bo_ref[l]

        # ---- LayerNorm 1 ----------------------------------------------------
        mu = jnp.mean(x, axis=-1, keepdims=True)
        var = jnp.mean((x - mu) ** 2, axis=-1, keepdims=True)
        x = (x - mu) * jax.lax.rsqrt(var + EPS) * g1_ref[l] + be1_ref[l]

        # ---- feedforward ----------------------------------------------------
        h1 = jnp.dot(x, w1_ref[l], preferred_element_type=jnp.float32) + b1_ref[l]
        h1 = jnp.maximum(h1, 0.0)                                   # ReLU
        ff = jnp.dot(h1, w2_ref[l], preferred_element_type=jnp.float32) + b2_ref[l]
        x = x + ff

        # ---- LayerNorm 2 ----------------------------------------------------
        mu = jnp.mean(x, axis=-1, keepdims=True)
        var = jnp.mean((x - mu) ** 2, axis=-1, keepdims=True)
        x = (x - mu) * jax.lax.rsqrt(var + EPS) * g2_ref[l] + be2_ref[l]

    # ---- classifier head: mean over seq (incl. cls), Linear->ReLU->Linear ---
    for b in range(BATCH):
        pool_sc[pl.ds(b, 1), :] = jnp.mean(x[b * T:(b + 1) * T, :],
                                           axis=0, keepdims=True)
    pooled = pool_sc[...]                                           # (B, E)
    hcls = jnp.dot(pooled, hw1_ref[...],
                   preferred_element_type=jnp.float32) + hb1_ref[...]
    hcls = jnp.maximum(hcls, 0.0)
    out = jnp.dot(hcls, hw2_ref[...],
                  preferred_element_type=jnp.float32) + hb2_ref[...]
    o_ref[...] = out.astype(o_ref.dtype)


# ---------------- glue (plain JAX) + wrapper ---------------------------------
def embed_inputs(params, x1, x2):
    """Embedding gather + positional + diff/concat + cls token (plain JAX)."""
    B, S = x1.shape
    e1 = jnp.take(params["emb"], x1, axis=0) + params["pos"][:, :S, :]   # (B, S, E/2)
    e2 = jnp.take(params["emb"], x2, axis=0) + params["pos"][:, :S, :]
    diff = e1 - e2
    x = jnp.concatenate([e1, diff], axis=2)                              # (B, S, E)
    cls = jnp.broadcast_to(params["cls"], (B, 1, EMBED))
    return jnp.concatenate([cls, x], axis=1).astype(jnp.float32)         # (B, S+1, E)


def forward(params, x1, x2):
    x = embed_inputs(params, x1, x2)                 # (B, T, E)
    B, T, E = x.shape
    xf = x.reshape(B * T, E)                         # free, wrapper-side reshape
    return pl.pallas_call(
        fused_encoder_kernel,
        out_shape=jax.ShapeDtypeStruct((B, OUTPUT_DIM), jnp.float32),
        scratch_shapes=[
            pltpu.VMEM((B * T, EMBED), jnp.float32),   # per-layer attention output
            pltpu.VMEM((B, EMBED), jnp.float32),       # pooled tokens
        ],
    )(xf,
      params["wqkv"], params["bqkv"], params["wo"], params["bo"],
      params["g1"], params["be1"], params["w1"], params["b1"],
      params["w2"], params["b2"], params["g2"], params["be2"],
      params["hw1"], params["hb1"], params["hw2"], params["hb2"])


# ---------------- pure-JAX reference (for correctness guard) -----------------
def _layernorm(x, g, b):
    mu = x.mean(-1, keepdims=True)
    var = ((x - mu) ** 2).mean(-1, keepdims=True)
    return (x - mu) * jax.lax.rsqrt(var + EPS) * g + b


def forward_reference(params, x1, x2):
    x = embed_inputs(params, x1, x2)                 # (B, T, E)
    B, T, E = x.shape
    for l in range(NUM_LAYERS):
        qkv = x @ params["wqkv"][l] + params["bqkv"][l]
        q, k, v = qkv[..., :E], qkv[..., E:2 * E], qkv[..., 2 * E:]

        def split(t):
            return t.reshape(B, T, NUM_HEADS, HEAD_DIM).transpose(0, 2, 1, 3)

        qh, kh, vh = split(q), split(k), split(v)
        s = jnp.einsum("bhtd,bhsd->bhts", qh, kh) / (HEAD_DIM ** 0.5)
        p = jax.nn.softmax(s, axis=-1)
        ctx = jnp.einsum("bhts,bhsd->bhtd", p, vh)
        ctx = ctx.transpose(0, 2, 1, 3).reshape(B, T, E)
        attn = ctx @ params["wo"][l] + params["bo"][l]
        x = _layernorm(x + attn, params["g1"][l], params["be1"][l])
        h1 = jax.nn.relu(x @ params["w1"][l] + params["b1"][l])
        x = _layernorm(x + h1 @ params["w2"][l] + params["b2"][l],
                       params["g2"][l], params["be2"][l])
    pooled = x.mean(axis=1)
    h = jax.nn.relu(pooled @ params["hw1"] + params["hb1"])
    return h @ params["hw2"] + params["hb2"]


# ---------------- parameter init (deterministic, in-script) ------------------
def init_params(key):
    keys = iter(jax.random.split(key, 16))

    def nrm(shape, scale=0.02):
        return (scale * jax.random.normal(next(keys), shape)).astype(jnp.float32)

    L = NUM_LAYERS
    return {
        "cls": jnp.ones((1, 1, EMBED), jnp.float32),          # classification_token
        "emb": nrm((VOCAB, HALF), 0.1),                       # token_embedding
        "pos": jax.random.normal(next(keys), (1, SEQ_LEN, HALF)).astype(jnp.float32),
        # encoder layer params stacked along a leading layer axis
        "wqkv": nrm((L, EMBED, 3 * EMBED)),
        "bqkv": jnp.zeros((L, 1, 3 * EMBED), jnp.float32),
        "wo": nrm((L, EMBED, EMBED)),
        "bo": jnp.zeros((L, 1, EMBED), jnp.float32),
        "g1": jnp.ones((L, 1, EMBED), jnp.float32),
        "be1": jnp.zeros((L, 1, EMBED), jnp.float32),
        "w1": nrm((L, EMBED, FF_DIM)),
        "b1": jnp.zeros((L, 1, FF_DIM), jnp.float32),
        "w2": nrm((L, FF_DIM, EMBED)),
        "b2": jnp.zeros((L, 1, EMBED), jnp.float32),
        "g2": jnp.ones((L, 1, EMBED), jnp.float32),
        "be2": jnp.zeros((L, 1, EMBED), jnp.float32),
        # classification head
        "hw1": nrm((EMBED, FF_CLASS_DIM)),
        "hb1": jnp.zeros((1, FF_CLASS_DIM), jnp.float32),
        "hw2": nrm((FF_CLASS_DIM, OUTPUT_DIM)),
        "hb2": jnp.zeros((1, OUTPUT_DIM), jnp.float32),
    }


if __name__ == "__main__":
    key = jax.random.PRNGKey(0)
    pkey, k1, k2 = jax.random.split(key, 3)
    params = init_params(pkey)
    x1 = jax.random.randint(k1, (BATCH, SEQ_LEN), 0, VOCAB, dtype=jnp.int32)
    x2 = jax.random.randint(k2, (BATCH, SEQ_LEN), 0, VOCAB, dtype=jnp.int32)

    fwd = jax.jit(forward)
    scores = jax.block_until_ready(fwd(params, x1, x2))

    assert scores.shape == (BATCH, OUTPUT_DIM), scores.shape
    assert bool(jnp.all(jnp.isfinite(scores)))

    # tolerance-based reference check (approx reciprocal changes results ~1e-3)
    ref = jax.block_until_ready(forward_reference(params, x1, x2))
    assert bool(jnp.allclose(scores, ref, rtol=1e-2, atol=1e-2)), (scores, ref)

    print("KERNEL_OK")
</pallas_src>

<mosaic_0001>
module attributes {stable_mosaic.version = 11 : i64} {
  func.func @fused_encoder_kernel(%arg0: memref<18x32xf32, #tpu.memory_space<vmem>>, %arg1: memref<2x32x96xf32, #tpu.memory_space<vmem>>, %arg2: memref<2x1x96xf32, #tpu.memory_space<vmem>>, %arg3: memref<2x32x32xf32, #tpu.memory_space<vmem>>, %arg4: memref<2x1x32xf32, #tpu.memory_space<vmem>>, %arg5: memref<2x1x32xf32, #tpu.memory_space<vmem>>, %arg6: memref<2x1x32xf32, #tpu.memory_space<vmem>>, %arg7: memref<2x32x64xf32, #tpu.memory_space<vmem>>, %arg8: memref<2x1x64xf32, #tpu.memory_space<vmem>>, %arg9: memref<2x64x32xf32, #tpu.memory_space<vmem>>, %arg10: memref<2x1x32xf32, #tpu.memory_space<vmem>>, %arg11: memref<2x1x32xf32, #tpu.memory_space<vmem>>, %arg12: memref<2x1x32xf32, #tpu.memory_space<vmem>>, %arg13: memref<32x32xf32, #tpu.memory_space<vmem>>, %arg14: memref<1x32xf32, #tpu.memory_space<vmem>>, %arg15: memref<32x4xf32, #tpu.memory_space<vmem>>, %arg16: memref<1x4xf32, #tpu.memory_space<vmem>>, %arg17: memref<2x4xf32, #tpu.memory_space<vmem>>, %arg18: memref<18x32xf32, #tpu.memory_space<vmem>>, %arg19: memref<2x32xf32, #tpu.memory_space<vmem>>) attributes {dimension_semantics = [], scalar_prefetch = 0 : i64, scratch_operands = 2 : i64, tpu.core_type = #tpu.core_type<tc>} {
    %c0 = arith.constant 0 : index
    %c0_0 = arith.constant 0 : index
    %0 = vector.load %arg0[%c0, %c0_0] : memref<18x32xf32, #tpu.memory_space<vmem>>, vector<18x32xf32>
    %c0_1 = arith.constant 0 : index
    %c0_2 = arith.constant 0 : index
    %c0_3 = arith.constant 0 : index
    %1 = vector.load %arg1[%c0_1, %c0_2, %c0_3] : memref<2x32x96xf32, #tpu.memory_space<vmem>>, vector<1x32x96xf32>
    %2 = vector.shape_cast %1 : vector<1x32x96xf32> to vector<32x96xf32>
    %cst = arith.constant dense<0.000000e+00> : vector<18x96xf32>
    %3 = tpu.matmul %0, %2, %cst {dimension_numbers = #tpu.dot_dimension_numbers<[1], [0], [0], [1], [0, 0, 1, 1], [], []>} : vector<18x32xf32>, vector<32x96xf32>, vector<18x96xf32> -> vector<18x96xf32>
    %c0_4 = arith.constant 0 : index
    %c0_5 = arith.constant 0 : index
    %c0_6 = arith.constant 0 : index
    %4 = vector.load %arg2[%c0_4, %c0_5, %c0_6] : memref<2x1x96xf32, #tpu.memory_space<vmem>>, vector<1x1x96xf32>
    %5 = vector.shape_cast %4 : vector<1x1x96xf32> to vector<1x96xf32>
    %6 = vector.broadcast %5 : vector<1x96xf32> to vector<18x96xf32>
    %7 = arith.addf %3, %6 : vector<18x96xf32>
    %8 = vector.extract_strided_slice %7 {offsets = [0, 0], sizes = [18, 32], strides = [1, 1]} : vector<18x96xf32> to vector<18x32xf32>
    %cst_7 = arith.constant 0.353553385 : f32
    %9 = vector.broadcast %cst_7 : f32 to vector<18x32xf32>
    %10 = arith.mulf %8, %9 : vector<18x32xf32>
    %11 = vector.extract_strided_slice %7 {offsets = [0, 32], sizes = [18, 32], strides = [1, 1]} : vector<18x96xf32> to vector<18x32xf32>
    %12 = vector.extract_strided_slice %7 {offsets = [0, 64], sizes = [18, 32], strides = [1, 1]} : vector<18x96xf32> to vector<18x32xf32>
    %c0_8 = arith.constant 0 : index
    %c0_9 = arith.constant 0 : index
    %c0_10 = arith.constant 0 : index
    %13 = vector.load %arg3[%c0_8, %c0_9, %c0_10] : memref<2x32x32xf32, #tpu.memory_space<vmem>>, vector<1x32x32xf32>
    %14 = vector.shape_cast %13 : vector<1x32x32xf32> to vector<32x32xf32>
    %cst_11 = arith.constant 0.000000e+00 : f32
    %15 = vector.broadcast %cst_11 : f32 to vector<9x32xf32>
    %16 = vector.extract_strided_slice %10 {offsets = [0, 0], sizes = [9, 8], strides = [1, 1]} : vector<18x32xf32> to vector<9x8xf32>
    %17 = vector.extract_strided_slice %11 {offsets = [0, 0], sizes = [9, 8], strides = [1, 1]} : vector<18x32xf32> to vector<9x8xf32>
    %18 = vector.extract_strided_slice %12 {offsets = [0, 0], sizes = [9, 8], strides = [1, 1]} : vector<18x32xf32> to vector<9x8xf32>
    %cst_12 = arith.constant dense<0.000000e+00> : vector<9x9xf32>
    %19 = tpu.matmul %16, %17, %cst_12 {dimension_numbers = #tpu.dot_dimension_numbers<[1], [1], [0], [0], [0, 0, 1, 0], [], []>} : vector<9x8xf32>, vector<9x8xf32>, vector<9x9xf32> -> vector<9x9xf32>
    %cst_13 = arith.constant dense<0xFF800000> : vector<9xf32>
    %20 = vector.multi_reduction <maximumf>, %19, %cst_13 [1] : vector<9x9xf32> to vector<9xf32>
    %21 = vector.shape_cast %20 : vector<9xf32> to vector<9x1xf32>
    %22 = vector.broadcast %21 : vector<9x1xf32> to vector<9x9xf32>
    %23 = arith.subf %19, %22 : vector<9x9xf32>
    %24 = math.exp %23 : vector<9x9xf32>
    %cst_14 = arith.constant dense<0.000000e+00> : vector<9xf32>
    %25 = vector.multi_reduction <add>, %24, %cst_14 [1] : vector<9x9xf32> to vector<9xf32>
    %26 = vector.shape_cast %25 : vector<9xf32> to vector<9x1xf32>
    %27 = tpu.reciprocal %26 {approx = true} : vector<9x1xf32> -> vector<9x1xf32>
    %28 = vector.broadcast %27 : vector<9x1xf32> to vector<9x9xf32>
    %29 = arith.mulf %24, %28 : vector<9x9xf32>
    %cst_15 = arith.constant dense<0.000000e+00> : vector<9x8xf32>
    %30 = tpu.matmul %29, %18, %cst_15 {dimension_numbers = #tpu.dot_dimension_numbers<[1], [0], [0], [1], [0, 0, 1, 1], [], []>} : vector<9x9xf32>, vector<9x8xf32>, vector<9x8xf32> -> vector<9x8xf32>
    %31 = vector.extract_strided_slice %14 {offsets = [0, 0], sizes = [8, 32], strides = [1, 1]} : vector<32x32xf32> to vector<8x32xf32>
    %cst_16 = arith.constant dense<0.000000e+00> : vector<9x32xf32>
    %32 = tpu.matmul %30, %31, %cst_16 {dimension_numbers = #tpu.dot_dimension_numbers<[1], [0], [0], [1], [0, 0, 1, 1], [], []>} : vector<9x8xf32>, vector<8x32xf32>, vector<9x32xf32> -> vector<9x32xf32>
    %33 = arith.addf %15, %32 : vector<9x32xf32>
    %34 = vector.extract_strided_slice %10 {offsets = [0, 8], sizes = [9, 8], strides = [1, 1]} : vector<18x32xf32> to vector<9x8xf32>
    %35 = vector.extract_strided_slice %11 {offsets = [0, 8], sizes = [9, 8], strides = [1, 1]} : vector<18x32xf32> to vector<9x8xf32>
    %36 = vector.extract_strided_slice %12 {offsets = [0, 8], sizes = [9, 8], strides = [1, 1]} : vector<18x32xf32> to vector<9x8xf32>
    %cst_17 = arith.constant dense<0.000000e+00> : vector<9x9xf32>
    %37 = tpu.matmul %34, %35, %cst_17 {dimension_numbers = #tpu.dot_dimension_numbers<[1], [1], [0], [0], [0, 0, 1, 0], [], []>} : vector<9x8xf32>, vector<9x8xf32>, vector<9x9xf32> -> vector<9x9xf32>
    %cst_18 = arith.constant dense<0xFF800000> : vector<9xf32>
    %38 = vector.multi_reduction <maximumf>, %37, %cst_18 [1] : vector<9x9xf32> to vector<9xf32>
    %39 = vector.shape_cast %38 : vector<9xf32> to vector<9x1xf32>
    %40 = vector.broadcast %39 : vector<9x1xf32> to vector<9x9xf32>
    %41 = arith.subf %37, %40 : vector<9x9xf32>
    %42 = math.exp %41 : vector<9x9xf32>
    %cst_19 = arith.constant dense<0.000000e+00> : vector<9xf32>
    %43 = vector.multi_reduction <add>, %42, %cst_19 [1] : vector<9x9xf32> to vector<9xf32>
    %44 = vector.shape_cast %43 : vector<9xf32> to vector<9x1xf32>
    %45 = tpu.reciprocal %44 {approx = true} : vector<9x1xf32> -> vector<9x1xf32>
    %46 = vector.broadcast %45 : vector<9x1xf32> to vector<9x9xf32>
    %47 = arith.mulf %42, %46 : vector<9x9xf32>
    %cst_20 = arith.constant dense<0.000000e+00> : vector<9x8xf32>
    %48 = tpu.matmul %47, %36, %cst_20 {dimension_numbers = #tpu.dot_dimension_numbers<[1], [0], [0], [1], [0, 0, 1, 1], [], []>} : vector<9x9xf32>, vector<9x8xf32>, vector<9x8xf32> -> vector<9x8xf32>
    %49 = vector.extract_strided_slice %14 {offsets = [8, 0], sizes = [8, 32], strides = [1, 1]} : vector<32x32xf32> to vector<8x32xf32>
    %cst_21 = arith.constant dense<0.000000e+00> : vector<9x32xf32>
    %50 = tpu.matmul %48, %49, %cst_21 {dimension_numbers = #tpu.dot_dimension_numbers<[1], [0], [0], [1], [0, 0, 1, 1], [], []>} : vector<9x8xf32>, vector<8x32xf32>, vector<9x32xf32> -> vector<9x32xf32>
    %51 = arith.addf %33, %50 : vector<9x32xf32>
    %52 = vector.extract_strided_slice %10 {offsets = [0, 16], sizes = [9, 8], strides = [1, 1]} : vector<18x32xf32> to vector<9x8xf32>
    %53 = vector.extract_strided_slice %11 {offsets = [0, 16], sizes = [9, 8], strides = [1, 1]} : vector<18x32xf32> to vector<9x8xf32>
    %54 = vector.extract_strided_slice %12 {offsets = [0, 16], sizes = [9, 8], strides = [1, 1]} : vector<18x32xf32> to vector<9x8xf32>
    %cst_22 = arith.constant dense<0.000000e+00> : vector<9x9xf32>
    %55 = tpu.matmul %52, %53, %cst_22 {dimension_numbers = #tpu.dot_dimension_numbers<[1], [1], [0], [0], [0, 0, 1, 0], [], []>} : vector<9x8xf32>, vector<9x8xf32>, vector<9x9xf32> -> vector<9x9xf32>
    %cst_23 = arith.constant dense<0xFF800000> : vector<9xf32>
    %56 = vector.multi_reduction <maximumf>, %55, %cst_23 [1] : vector<9x9xf32> to vector<9xf32>
    %57 = vector.shape_cast %56 : vector<9xf32> to vector<9x1xf32>
    %58 = vector.broadcast %57 : vector<9x1xf32> to vector<9x9xf32>
    %59 = arith.subf %55, %58 : vector<9x9xf32>
    %60 = math.exp %59 : vector<9x9xf32>
    %cst_24 = arith.constant dense<0.000000e+00> : vector<9xf32>
    %61 = vector.multi_reduction <add>, %60, %cst_24 [1] : vector<9x9xf32> to vector<9xf32>
    %62 = vector.shape_cast %61 : vector<9xf32> to vector<9x1xf32>
    %63 = tpu.reciprocal %62 {approx = true} : vector<9x1xf32> -> vector<9x1xf32>
    %64 = vector.broadcast %63 : vector<9x1xf32> to vector<9x9xf32>
    %65 = arith.mulf %60, %64 : vector<9x9xf32>
    %cst_25 = arith.constant dense<0.000000e+00> : vector<9x8xf32>
    %66 = tpu.matmul %65, %54, %cst_25 {dimension_numbers = #tpu.dot_dimension_numbers<[1], [0], [0], [1], [0, 0, 1, 1], [], []>} : vector<9x9xf32>, vector<9x8xf32>, vector<9x8xf32> -> vector<9x8xf32>
    %67 = vector.extract_strided_slice %14 {offsets = [16, 0], sizes = [8, 32], strides = [1, 1]} : vector<32x32xf32> to vector<8x32xf32>
    %cst_26 = arith.constant dense<0.000000e+00> : vector<9x32xf32>
    %68 = tpu.matmul %66, %67, %cst_26 {dimension_numbers = #tpu.dot_dimension_numbers<[1], [0], [0], [1], [0, 0, 1, 1], [], []>} : vector<9x8xf32>, vector<8x32xf32>, vector<9x32xf32> -> vector<9x32xf32>
    %69 = arith.addf %51, %68 : vector<9x32xf32>
    %70 = vector.extract_strided_slice %10 {offsets = [0, 24], sizes = [9, 8], strides = [1, 1]} : vector<18x32xf32> to vector<9x8xf32>
    %71 = vector.extract_strided_slice %11 {offsets = [0, 24], sizes = [9, 8], strides = [1, 1]} : vector<18x32xf32> to vector<9x8xf32>
    %72 = vector.extract_strided_slice %12 {offsets = [0, 24], sizes = [9, 8], strides = [1, 1]} : vector<18x32xf32> to vector<9x8xf32>
    %cst_27 = arith.constant dense<0.000000e+00> : vector<9x9xf32>
    %73 = tpu.matmul %70, %71, %cst_27 {dimension_numbers = #tpu.dot_dimension_numbers<[1], [1], [0], [0], [0, 0, 1, 0], [], []>} : vector<9x8xf32>, vector<9x8xf32>, vector<9x9xf32> -> vector<9x9xf32>
    %cst_28 = arith.constant dense<0xFF800000> : vector<9xf32>
    %74 = vector.multi_reduction <maximumf>, %73, %cst_28 [1] : vector<9x9xf32> to vector<9xf32>
    %75 = vector.shape_cast %74 : vector<9xf32> to vector<9x1xf32>
    %76 = vector.broadcast %75 : vector<9x1xf32> to vector<9x9xf32>
    %77 = arith.subf %73, %76 : vector<9x9xf32>
    %78 = math.exp %77 : vector<9x9xf32>
    %cst_29 = arith.constant dense<0.000000e+00> : vector<9xf32>
    %79 = vector.multi_reduction <add>, %78, %cst_29 [1] : vector<9x9xf32> to vector<9xf32>
    %80 = vector.shape_cast %79 : vector<9xf32> to vector<9x1xf32>
    %81 = tpu.reciprocal %80 {approx = true} : vector<9x1xf32> -> vector<9x1xf32>
    %82 = vector.broadcast %81 : vector<9x1xf32> to vector<9x9xf32>
    %83 = arith.mulf %78, %82 : vector<9x9xf32>
    %cst_30 = arith.constant dense<0.000000e+00> : vector<9x8xf32>
    %84 = tpu.matmul %83, %72, %cst_30 {dimension_numbers = #tpu.dot_dimension_numbers<[1], [0], [0], [1], [0, 0, 1, 1], [], []>} : vector<9x9xf32>, vector<9x8xf32>, vector<9x8xf32> -> vector<9x8xf32>
    %85 = vector.extract_strided_slice %14 {offsets = [24, 0], sizes = [8, 32], strides = [1, 1]} : vector<32x32xf32> to vector<8x32xf32>
    %cst_31 = arith.constant dense<0.000000e+00> : vector<9x32xf32>
    %86 = tpu.matmul %84, %85, %cst_31 {dimension_numbers = #tpu.dot_dimension_numbers<[1], [0], [0], [1], [0, 0, 1, 1], [], []>} : vector<9x8xf32>, vector<8x32xf32>, vector<9x32xf32> -> vector<9x32xf32>
    %87 = arith.addf %69, %86 : vector<9x32xf32>
    %c0_32 = arith.constant 0 : index
    %c0_33 = arith.constant 0 : index
    %88 = vector.load %arg18[%c0_32, %c0_33] : memref<18x32xf32, #tpu.memory_space<vmem>>, vector<9x32xf32>
    tpu.vector_store %arg18[%c0_32, %c0_33], %87 {strides = array<i32>} : memref<18x32xf32, #tpu.memory_space<vmem>>, vector<9x32xf32>,
    %cst_34 = arith.constant 0.000000e+00 : f32
    %89 = vector.broadcast %cst_34 : f32 to vector<9x32xf32>
    %90 = vector.extract_strided_slice %10 {offsets = [9, 0], sizes = [9, 8], strides = [1, 1]} : vector<18x32xf32> to vector<9x8xf32>
    %91 = vector.extract_strided_slice %11 {offsets = [9, 0], sizes = [9, 8], strides = [1, 1]} : vector<18x32xf32> to vector<9x8xf32>
    %92 = vector.extract_strided_slice %12 {offsets = [9, 0], sizes = [9, 8], strides = [1, 1]} : vector<18x32xf32> to vector<9x8xf32>
    %cst_35 = arith.constant dense<0.000000e+00> : vector<9x9xf32>
    %93 = tpu.matmul %90, %91, %cst_35 {dimension_numbers = #tpu.dot_dimension_numbers<[1], [1], [0], [0], [0, 0, 1, 0], [], []>} : vector<9x8xf32>, vector<9x8xf32>, vector<9x9xf32> -> vector<9x9xf32>
    %cst_36 = arith.constant dense<0xFF800000> : vector<9xf32>
    %94 = vector.multi_reduction <maximumf>, %93, %cst_36 [1] : vector<9x9xf32> to vector<9xf32>
    %95 = vector.shape_cast %94 : vector<9xf32> to vector<9x1xf32>
    %96 = vector.broadcast %95 : vector<9x1xf32> to vector<9x9xf32>
    %97 = arith.subf %93, %96 : vector<9x9xf32>
    %98 = math.exp %97 : vector<9x9xf32>
    %cst_37 = arith.constant dense<0.000000e+00> : vector<9xf32>
    %99 = vector.multi_reduction <add>, %98, %cst_37 [1] : vector<9x9xf32> to vector<9xf32>
    %100 = vector.shape_cast %99 : vector<9xf32> to vector<9x1xf32>
    %101 = tpu.reciprocal %100 {approx = true} : vector<9x1xf32> -> vector<9x1xf32>
    %102 = vector.broadcast %101 : vector<9x1xf32> to vector<9x9xf32>
    %103 = arith.mulf %98, %102 : vector<9x9xf32>
    %cst_38 = arith.constant dense<0.000000e+00> : vector<9x8xf32>
    %104 = tpu.matmul %103, %92, %cst_38 {dimension_numbers = #tpu.dot_dimension_numbers<[1], [0], [0], [1], [0, 0, 1, 1], [], []>} : vector<9x9xf32>, vector<9x8xf32>, vector<9x8xf32> -> vector<9x8xf32>
    %105 = vector.extract_strided_slice %14 {offsets = [0, 0], sizes = [8, 32], strides = [1, 1]} : vector<32x32xf32> to vector<8x32xf32>
    %cst_39 = arith.constant dense<0.000000e+00> : vector<9x32xf32>
    %106 = tpu.matmul %104, %105, %cst_39 {dimension_numbers = #tpu.dot_dimension_numbers<[1], [0], [0], [1], [0, 0, 1, 1], [], []>} : vector<9x8xf32>, vector<8x32xf32>, vector<9x32xf32> -> vector<9x32xf32>
    %107 = arith.addf %89, %106 : vector<9x32xf32>
    %108 = vector.extract_strided_slice %10 {offsets = [9, 8], sizes = [9, 8], strides = [1, 1]} : vector<18x32xf32> to vector<9x8xf32>
    %109 = vector.extract_strided_slice %11 {offsets = [9, 8], sizes = [9, 8], strides = [1, 1]} : vector<18x32xf32> to vector<9x8xf32>
    %110 = vector.extract_strided_slice %12 {offsets = [9, 8], sizes = [9, 8], strides = [1, 1]} : vector<18x32xf32> to vector<9x8xf32>
    %cst_40 = arith.constant dense<0.000000e+00> : vector<9x9xf32>
    %111 = tpu.matmul %108, %109, %cst_40 {dimension_numbers = #tpu.dot_dimension_numbers<[1], [1], [0], [0], [0, 0, 1, 0], [], []>} : vector<9x8xf32>, vector<9x8xf32>, vector<9x9xf32> -> vector<9x9xf32>
    %cst_41 = arith.constant dense<0xFF800000> : vector<9xf32>
    %112 = vector.multi_reduction <maximumf>, %111, %cst_41 [1] : vector<9x9xf32> to vector<9xf32>
    %113 = vector.shape_cast %112 : vector<9xf32> to vector<9x1xf32>
    %114 = vector.broadcast %113 : vector<9x1xf32> to vector<9x9xf32>
    %115 = arith.subf %111, %114 : vector<9x9xf32>
    %116 = math.exp %115 : vector<9x9xf32>
    %cst_42 = arith.constant dense<0.000000e+00> : vector<9xf32>
    %117 = vector.multi_reduction <add>, %116, %cst_42 [1] : vector<9x9xf32> to vector<9xf32>
    %118 = vector.shape_cast %117 : vector<9xf32> to vector<9x1xf32>
    %119 = tpu.reciprocal %118 {approx = true} : vector<9x1xf32> -> vector<9x1xf32>
    %120 = vector.broadcast %119 : vector<9x1xf32> to vector<9x9xf32>
    %121 = arith.mulf %116, %120 : vector<9x9xf32>
    %cst_43 = arith.constant dense<0.000000e+00> : vector<9x8xf32>
    %122 = tpu.matmul %121, %110, %cst_43 {dimension_numbers = #tpu.dot_dimension_numbers<[1], [0], [0], [1], [0, 0, 1, 1], [], []>} : vector<9x9xf32>, vector<9x8xf32>, vector<9x8xf32> -> vector<9x8xf32>
    %123 = vector.extract_strided_slice %14 {offsets = [8, 0], sizes = [8, 32], strides = [1, 1]} : vector<32x32xf32> to vector<8x32xf32>
    %cst_44 = arith.constant dense<0.000000e+00> : vector<9x32xf32>
    %124 = tpu.matmul %122, %123, %cst_44 {dimension_numbers = #tpu.dot_dimension_numbers<[1], [0], [0], [1], [0, 0, 1, 1], [], []>} : vector<9x8xf32>, vector<8x32xf32>, vector<9x32xf32> -> vector<9x32xf32>
    %125 = arith.addf %107, %124 : vector<9x32xf32>
    %126 = vector.extract_strided_slice %10 {offsets = [9, 16], sizes = [9, 8], strides = [1, 1]} : vector<18x32xf32> to vector<9x8xf32>
    %127 = vector.extract_strided_slice %11 {offsets = [9, 16], sizes = [9, 8], strides = [1, 1]} : vector<18x32xf32> to vector<9x8xf32>
    %128 = vector.extract_strided_slice %12 {offsets = [9, 16], sizes = [9, 8], strides = [1, 1]} : vector<18x32xf32> to vector<9x8xf32>
    %cst_45 = arith.constant dense<0.000000e+00> : vector<9x9xf32>
    %129 = tpu.matmul %126, %127, %cst_45 {dimension_numbers = #tpu.dot_dimension_numbers<[1], [1], [0], [0], [0, 0, 1, 0], [], []>} : vector<9x8xf32>, vector<9x8xf32>, vector<9x9xf32> -> vector<9x9xf32>
    %cst_46 = arith.constant dense<0xFF800000> : vector<9xf32>
    %130 = vector.multi_reduction <maximumf>, %129, %cst_46 [1] : vector<9x9xf32> to vector<9xf32>
    %131 = vector.shape_cast %130 : vector<9xf32> to vector<9x1xf32>
    %132 = vector.broadcast %131 : vector<9x1xf32> to vector<9x9xf32>
    %133 = arith.subf %129, %132 : vector<9x9xf32>
    %134 = math.exp %133 : vector<9x9xf32>
    %cst_47 = arith.constant dense<0.000000e+00> : vector<9xf32>
    %135 = vector.multi_reduction <add>, %134, %cst_47 [1] : vector<9x9xf32> to vector<9xf32>
    %136 = vector.shape_cast %135 : vector<9xf32> to vector<9x1xf32>
    %137 = tpu.reciprocal %136 {approx = true} : vector<9x1xf32> -> vector<9x1xf32>
    %138 = vector.broadcast %137 : vector<9x1xf32> to vector<9x9xf32>
    %139 = arith.mulf %134, %138 : vector<9x9xf32>
    %cst_48 = arith.constant dense<0.000000e+00> : vector<9x8xf32>
    %140 = tpu.matmul %139, %128, %cst_48 {dimension_numbers = #tpu.dot_dimension_numbers<[1], [0], [0], [1], [0, 0, 1, 1], [], []>} : vector<9x9xf32>, vector<9x8xf32>, vector<9x8xf32> -> vector<9x8xf32>
    %141 = vector.extract_strided_slice %14 {offsets = [16, 0], sizes = [8, 32], strides = [1, 1]} : vector<32x32xf32> to vector<8x32xf32>
    %cst_49 = arith.constant dense<0.000000e+00> : vector<9x32xf32>
    %142 = tpu.matmul %140, %141, %cst_49 {dimension_numbers = #tpu.dot_dimension_numbers<[1], [0], [0], [1], [0, 0, 1, 1], [], []>} : vector<9x8xf32>, vector<8x32xf32>, vector<9x32xf32> -> vector<9x32xf32>
    %143 = arith.addf %125, %142 : vector<9x32xf32>
    %144 = vector.extract_strided_slice %10 {offsets = [9, 24], sizes = [9, 8], strides = [1, 1]} : vector<18x32xf32> to vector<9x8xf32>
    %145 = vector.extract_strided_slice %11 {offsets = [9, 24], sizes = [9, 8], strides = [1, 1]} : vector<18x32xf32> to vector<9x8xf32>
    %146 = vector.extract_strided_slice %12 {offsets = [9, 24], sizes = [9, 8], strides = [1, 1]} : vector<18x32xf32> to vector<9x8xf32>
    %cst_50 = arith.constant dense<0.000000e+00> : vector<9x9xf32>
    %147 = tpu.matmul %144, %145, %cst_50 {dimension_numbers = #tpu.dot_dimension_numbers<[1], [1], [0], [0], [0, 0, 1, 0], [], []>} : vector<9x8xf32>, vector<9x8xf32>, vector<9x9xf32> -> vector<9x9xf32>
    %cst_51 = arith.constant dense<0xFF800000> : vector<9xf32>
    %148 = vector.multi_reduction <maximumf>, %147, %cst_51 [1] : vector<9x9xf32> to vector<9xf32>
    %149 = vector.shape_cast %148 : vector<9xf32> to vector<9x1xf32>
    %150 = vector.broadcast %149 : vector<9x1xf32> to vector<9x9xf32>
    %151 = arith.subf %147, %150 : vector<9x9xf32>
    %152 = math.exp %151 : vector<9x9xf32>
    %cst_52 = arith.constant dense<0.000000e+00> : vector<9xf32>
    %153 = vector.multi_reduction <add>, %152, %cst_52 [1] : vector<9x9xf32> to vector<9xf32>
    %154 = vector.shape_cast %153 : vector<9xf32> to vector<9x1xf32>
    %155 = tpu.reciprocal %154 {approx = true} : vector<9x1xf32> -> vector<9x1xf32>
    %156 = vector.broadcast %155 : vector<9x1xf32> to vector<9x9xf32>
    %157 = arith.mulf %152, %156 : vector<9x9xf32>
    %cst_53 = arith.constant dense<0.000000e+00> : vector<9x8xf32>
    %158 = tpu.matmul %157, %146, %cst_53 {dimension_numbers = #tpu.dot_dimension_numbers<[1], [0], [0], [1], [0, 0, 1, 1], [], []>} : vector<9x9xf32>, vector<9x8xf32>, vector<9x8xf32> -> vector<9x8xf32>
    %159 = vector.extract_strided_slice %14 {offsets = [24, 0], sizes = [8, 32], strides = [1, 1]} : vector<32x32xf32> to vector<8x32xf32>
    %cst_54 = arith.constant dense<0.000000e+00> : vector<9x32xf32>
    %160 = tpu.matmul %158, %159, %cst_54 {dimension_numbers = #tpu.dot_dimension_numbers<[1], [0], [0], [1], [0, 0, 1, 1], [], []>} : vector<9x8xf32>, vector<8x32xf32>, vector<9x32xf32> -> vector<9x32xf32>
    %161 = arith.addf %143, %160 : vector<9x32xf32>
    %c9 = arith.constant 9 : index
    %c0_55 = arith.constant 0 : index
    %162 = vector.load %arg18[%c9, %c0_55] : memref<18x32xf32, #tpu.memory_space<vmem>>, vector<9x32xf32>
    tpu.vector_store %arg18[%c9, %c0_55], %161 {strides = array<i32>} : memref<18x32xf32, #tpu.memory_space<vmem>>, vector<9x32xf32>,
    %c0_56 = arith.constant 0 : index
    %c0_57 = arith.constant 0 : index
    %163 = vector.load %arg18[%c0_56, %c0_57] : memref<18x32xf32, #tpu.memory_space<vmem>>, vector<18x32xf32>
    %164 = arith.addf %0, %163 : vector<18x32xf32>
    %c0_58 = arith.constant 0 : index
    %c0_59 = arith.constant 0 : index
    %c0_60 = arith.constant 0 : index
    %165 = vector.load %arg4[%c0_58, %c0_59, %c0_60] : memref<2x1x32xf32, #tpu.memory_space<vmem>>, vector<1x1x32xf32>
    %166 = vector.shape_cast %165 : vector<1x1x32xf32> to vector<1x32xf32>
    %167 = vector.broadcast %166 : vector<1x32xf32> to vector<18x32xf32>
    %168 = arith.addf %164, %167 : vector<18x32xf32>
    %cst_61 = arith.constant dense<0.000000e+00> : vector<18xf32>
    %169 = vector.multi_reduction <add>, %168, %cst_61 [1] : vector<18x32xf32> to vector<18xf32>
    %170 = vector.shape_cast %169 : vector<18xf32> to vector<18x1xf32>
    %cst_62 = arith.constant 3.200000e+01 : f32
    %171 = vector.broadcast %cst_62 : f32 to vector<18x1xf32>
    %172 = arith.divf %170, %171 : vector<18x1xf32>
    %173 = vector.broadcast %172 : vector<18x1xf32> to vector<18x32xf32>
    %174 = arith.subf %168, %173 : vector<18x32xf32>
    %175 = arith.mulf %174, %174 : vector<18x32xf32>
    %cst_63 = arith.constant dense<0.000000e+00> : vector<18xf32>
    %176 = vector.multi_reduction <add>, %175, %cst_63 [1] : vector<18x32xf32> to vector<18xf32>
    %177 = vector.shape_cast %176 : vector<18xf32> to vector<18x1xf32>
    %cst_64 = arith.constant 3.200000e+01 : f32
    %178 = vector.broadcast %cst_64 : f32 to vector<18x1xf32>
    %179 = arith.divf %177, %178 : vector<18x1xf32>
    %180 = vector.broadcast %172 : vector<18x1xf32> to vector<18x32xf32>
    %181 = arith.subf %168, %180 : vector<18x32xf32>
    %cst_65 = arith.constant 9.99999974E-6 : f32
    %182 = vector.broadcast %cst_65 : f32 to vector<18x1xf32>
    %183 = arith.addf %179, %182 : vector<18x1xf32>
    %184 = math.rsqrt %183 : vector<18x1xf32>
    %185 = vector.broadcast %184 : vector<18x1xf32> to vector<18x32xf32>
    %186 = arith.mulf %181, %185 : vector<18x32xf32>
    %c0_66 = arith.constant 0 : index
    %c0_67 = arith.constant 0 : index
    %c0_68 = arith.constant 0 : index
    %187 = vector.load %arg5[%c0_66, %c0_67, %c0_68] : memref<2x1x32xf32, #tpu.memory_space<vmem>>, vector<1x1x32xf32>
    %188 = vector.shape_cast %187 : vector<1x1x32xf32> to vector<1x32xf32>
    %189 = vector.broadcast %188 : vector<1x32xf32> to vector<18x32xf32>
    %190 = arith.mulf %186, %189 : vector<18x32xf32>
    %c0_69 = arith.constant 0 : index
    %c0_70 = arith.constant 0 : index
    %c0_71 = arith.constant 0 : index
    %191 = vector.load %arg6[%c0_69, %c0_70, %c0_71] : memref<2x1x32xf32, #tpu.memory_space<vmem>>, vector<1x1x32xf32>
    %192 = vector.shape_cast %191 : vector<1x1x32xf32> to vector<1x32xf32>
    %193 = vector.broadcast %192 : vector<1x32xf32> to vector<18x32xf32>
    %194 = arith.addf %190, %193 : vector<18x32xf32>
    %c0_72 = arith.constant 0 : index
    %c0_73 = arith.constant 0 : index
    %c0_74 = arith.constant 0 : index
    %195 = vector.load %arg7[%c0_72, %c0_73, %c0_74] : memref<2x32x64xf32, #tpu.memory_space<vmem>>, vector<1x32x64xf32>
    %196 = vector.shape_cast %195 : vector<1x32x64xf32> to vector<32x64xf32>
    %cst_75 = arith.constant dense<0.000000e+00> : vector<18x64xf32>
    %197 = tpu.matmul %194, %196, %cst_75 {dimension_numbers = #tpu.dot_dimension_numbers<[1], [0], [0], [1], [0, 0, 1, 1], [], []>} : vector<18x32xf32>, vector<32x64xf32>, vector<18x64xf32> -> vector<18x64xf32>
    %c0_76 = arith.constant 0 : index
    %c0_77 = arith.constant 0 : index
    %c0_78 = arith.constant 0 : index
    %198 = vector.load %arg8[%c0_76, %c0_77, %c0_78] : memref<2x1x64xf32, #tpu.memory_space<vmem>>, vector<1x1x64xf32>
    %199 = vector.shape_cast %198 : vector<1x1x64xf32> to vector<1x64xf32>
    %200 = vector.broadcast %199 : vector<1x64xf32> to vector<18x64xf32>
    %201 = arith.addf %197, %200 : vector<18x64xf32>
    %cst_79 = arith.constant 0.000000e+00 : f32
    %202 = vector.broadcast %cst_79 : f32 to vector<18x64xf32>
    %203 = arith.maximumf %201, %202 : vector<18x64xf32>
    %c0_80 = arith.constant 0 : index
    %c0_81 = arith.constant 0 : index
    %c0_82 = arith.constant 0 : index
    %204 = vector.load %arg9[%c0_80, %c0_81, %c0_82] : memref<2x64x32xf32, #tpu.memory_space<vmem>>, vector<1x64x32xf32>
    %205 = vector.shape_cast %204 : vector<1x64x32xf32> to vector<64x32xf32>
    %cst_83 = arith.constant dense<0.000000e+00> : vector<18x32xf32>
    %206 = tpu.matmul %203, %205, %cst_83 {dimension_numbers = #tpu.dot_dimension_numbers<[1], [0], [0], [1], [0, 0, 1, 1], [], []>} : vector<18x64xf32>, vector<64x32xf32>, vector<18x32xf32> -> vector<18x32xf32>
    %c0_84 = arith.constant 0 : index
    %c0_85 = arith.constant 0 : index
    %c0_86 = arith.constant 0 : index
    %207 = vector.load %arg10[%c0_84, %c0_85, %c0_86] : memref<2x1x32xf32, #tpu.memory_space<vmem>>, vector<1x1x32xf32>
    %208 = vector.shape_cast %207 : vector<1x1x32xf32> to vector<1x32xf32>
    %209 = vector.broadcast %208 : vector<1x32xf32> to vector<18x32xf32>
    %210 = arith.addf %206, %209 : vector<18x32xf32>
    %211 = arith.addf %194, %210 : vector<18x32xf32>
    %cst_87 = arith.constant dense<0.000000e+00> : vector<18xf32>
    %212 = vector.multi_reduction <add>, %211, %cst_87 [1] : vector<18x32xf32> to vector<18xf32>
    %213 = vector.shape_cast %212 : vector<18xf32> to vector<18x1xf32>
    %cst_88 = arith.constant 3.200000e+01 : f32
    %214 = vector.broadcast %cst_88 : f32 to vector<18x1xf32>
    %215 = arith.divf %213, %214 : vector<18x1xf32>
    %216 = vector.broadcast %215 : vector<18x1xf32> to vector<18x32xf32>
    %217 = arith.subf %211, %216 : vector<18x32xf32>
    %218 = arith.mulf %217, %217 : vector<18x32xf32>
    %cst_89 = arith.constant dense<0.000000e+00> : vector<18xf32>
    %219 = vector.multi_reduction <add>, %218, %cst_89 [1] : vector<18x32xf32> to vector<18xf32>
    %220 = vector.shape_cast %219 : vector<18xf32> to vector<18x1xf32>
    %cst_90 = arith.constant 3.200000e+01 : f32
    %221 = vector.broadcast %cst_90 : f32 to vector<18x1xf32>
    %222 = arith.divf %220, %221 : vector<18x1xf32>
    %223 = vector.broadcast %215 : vector<18x1xf32> to vector<18x32xf32>
    %224 = arith.subf %211, %223 : vector<18x32xf32>
    %cst_91 = arith.constant 9.99999974E-6 : f32
    %225 = vector.broadcast %cst_91 : f32 to vector<18x1xf32>
    %226 = arith.addf %222, %225 : vector<18x1xf32>
    %227 = math.rsqrt %226 : vector<18x1xf32>
    %228 = vector.broadcast %227 : vector<18x1xf32> to vector<18x32xf32>
    %229 = arith.mulf %224, %228 : vector<18x32xf32>
    %c0_92 = arith.constant 0 : index
    %c0_93 = arith.constant 0 : index
    %c0_94 = arith.constant 0 : index
    %230 = vector.load %arg11[%c0_92, %c0_93, %c0_94] : memref<2x1x32xf32, #tpu.memory_space<vmem>>, vector<1x1x32xf32>
    %231 = vector.shape_cast %230 : vector<1x1x32xf32> to vector<1x32xf32>
    %232 = vector.broadcast %231 : vector<1x32xf32> to vector<18x32xf32>
    %233 = arith.mulf %229, %232 : vector<18x32xf32>
    %c0_95 = arith.constant 0 : index
    %c0_96 = arith.constant 0 : index
    %c0_97 = arith.constant 0 : index
    %234 = vector.load %arg12[%c0_95, %c0_96, %c0_97] : memref<2x1x32xf32, #tpu.memory_space<vmem>>, vector<1x1x32xf32>
    %235 = vector.shape_cast %234 : vector<1x1x32xf32> to vector<1x32xf32>
    %236 = vector.broadcast %235 : vector<1x32xf32> to vector<18x32xf32>
    %237 = arith.addf %233, %236 : vector<18x32xf32>
    %c1 = arith.constant 1 : index
    %c0_98 = arith.constant 0 : index
    %c0_99 = arith.constant 0 : index
    %238 = vector.load %arg1[%c1, %c0_98, %c0_99] : memref<2x32x96xf32, #tpu.memory_space<vmem>>, vector<1x32x96xf32>
    %239 = vector.shape_cast %238 : vector<1x32x96xf32> to vector<32x96xf32>
    %cst_100 = arith.constant dense<0.000000e+00> : vector<18x96xf32>
    %240 = tpu.matmul %237, %239, %cst_100 {dimension_numbers = #tpu.dot_dimension_numbers<[1], [0], [0], [1], [0, 0, 1, 1], [], []>} : vector<18x32xf32>, vector<32x96xf32>, vector<18x96xf32> -> vector<18x96xf32>
    %c1_101 = arith.constant 1 : index
    %c0_102 = arith.constant 0 : index
    %c0_103 = arith.constant 0 : index
    %241 = vector.load %arg2[%c1_101, %c0_102, %c0_103] : memref<2x1x96xf32, #tpu.memory_space<vmem>>, vector<1x1x96xf32>
    %242 = vector.shape_cast %241 : vector<1x1x96xf32> to vector<1x96xf32>
    %243 = vector.broadcast %242 : vector<1x96xf32> to vector<18x96xf32>
    %244 = arith.addf %240, %243 : vector<18x96xf32>
    %245 = vector.extract_strided_slice %244 {offsets = [0, 0], sizes = [18, 32], strides = [1, 1]} : vector<18x96xf32> to vector<18x32xf32>
    %cst_104 = arith.constant 0.353553385 : f32
    %246 = vector.broadcast %cst_104 : f32 to vector<18x32xf32>
    %247 = arith.mulf %245, %246 : vector<18x32xf32>
    %248 = vector.extract_strided_slice %244 {offsets = [0, 32], sizes = [18, 32], strides = [1, 1]} : vector<18x96xf32> to vector<18x32xf32>
    %249 = vector.extract_strided_slice %244 {offsets = [0, 64], sizes = [18, 32], strides = [1, 1]} : vector<18x96xf32> to vector<18x32xf32>
    %c1_105 = arith.constant 1 : index
    %c0_106 = arith.constant 0 : index
    %c0_107 = arith.constant 0 : index
    %250 = vector.load %arg3[%c1_105, %c0_106, %c0_107] : memref<2x32x32xf32, #tpu.memory_space<vmem>>, vector<1x32x32xf32>
    %251 = vector.shape_cast %250 : vector<1x32x32xf32> to vector<32x32xf32>
    %cst_108 = arith.constant 0.000000e+00 : f32
    %252 = vector.broadcast %cst_108 : f32 to vector<9x32xf32>
    %253 = vector.extract_strided_slice %247 {offsets = [0, 0], sizes = [9, 8], strides = [1, 1]} : vector<18x32xf32> to vector<9x8xf32>
    %254 = vector.extract_strided_slice %248 {offsets = [0, 0], sizes = [9, 8], strides = [1, 1]} : vector<18x32xf32> to vector<9x8xf32>
    %255 = vector.extract_strided_slice %249 {offsets = [0, 0], sizes = [9, 8], strides = [1, 1]} : vector<18x32xf32> to vector<9x8xf32>
    %cst_109 = arith.constant dense<0.000000e+00> : vector<9x9xf32>
    %256 = tpu.matmul %253, %254, %cst_109 {dimension_numbers = #tpu.dot_dimension_numbers<[1], [1], [0], [0], [0, 0, 1, 0], [], []>} : vector<9x8xf32>, vector<9x8xf32>, vector<9x9xf32> -> vector<9x9xf32>
    %cst_110 = arith.constant dense<0xFF800000> : vector<9xf32>
    %257 = vector.multi_reduction <maximumf>, %256, %cst_110 [1] : vector<9x9xf32> to vector<9xf32>
    %258 = vector.shape_cast %257 : vector<9xf32> to vector<9x1xf32>
    %259 = vector.broadcast %258 : vector<9x1xf32> to vector<9x9xf32>
    %260 = arith.subf %256, %259 : vector<9x9xf32>
    %261 = math.exp %260 : vector<9x9xf32>
    %cst_111 = arith.constant dense<0.000000e+00> : vector<9xf32>
    %262 = vector.multi_reduction <add>, %261, %cst_111 [1] : vector<9x9xf32> to vector<9xf32>
    %263 = vector.shape_cast %262 : vector<9xf32> to vector<9x1xf32>
    %264 = tpu.reciprocal %263 {approx = true} : vector<9x1xf32> -> vector<9x1xf32>
    %265 = vector.broadcast %264 : vector<9x1xf32> to vector<9x9xf32>
    %266 = arith.mulf %261, %265 : vector<9x9xf32>
    %cst_112 = arith.constant dense<0.000000e+00> : vector<9x8xf32>
    %267 = tpu.matmul %266, %255, %cst_112 {dimension_numbers = #tpu.dot_dimension_numbers<[1], [0], [0], [1], [0, 0, 1, 1], [], []>} : vector<9x9xf32>, vector<9x8xf32>, vector<9x8xf32> -> vector<9x8xf32>
    %268 = vector.extract_strided_slice %251 {offsets = [0, 0], sizes = [8, 32], strides = [1, 1]} : vector<32x32xf32> to vector<8x32xf32>
    %cst_113 = arith.constant dense<0.000000e+00> : vector<9x32xf32>
    %269 = tpu.matmul %267, %268, %cst_113 {dimension_numbers = #tpu.dot_dimension_numbers<[1], [0], [0], [1], [0, 0, 1, 1], [], []>} : vector<9x8xf32>, vector<8x32xf32>, vector<9x32xf32> -> vector<9x32xf32>
    %270 = arith.addf %252, %269 : vector<9x32xf32>
    %271 = vector.extract_strided_slice %247 {offsets = [0, 8], sizes = [9, 8], strides = [1, 1]} : vector<18x32xf32> to vector<9x8xf32>
    %272 = vector.extract_strided_slice %248 {offsets = [0, 8], sizes = [9, 8], strides = [1, 1]} : vector<18x32xf32> to vector<9x8xf32>
    %273 = vector.extract_strided_slice %249 {offsets = [0, 8], sizes = [9, 8], strides = [1, 1]} : vector<18x32xf32> to vector<9x8xf32>
    %cst_114 = arith.constant dense<0.000000e+00> : vector<9x9xf32>
    %274 = tpu.matmul %271, %272, %cst_114 {dimension_numbers = #tpu.dot_dimension_numbers<[1], [1], [0], [0], [0, 0, 1, 0], [], []>} : vector<9x8xf32>, vector<9x8xf32>, vector<9x9xf32> -> vector<9x9xf32>
    %cst_115 = arith.constant dense<0xFF800000> : vector<9xf32>
    %275 = vector.multi_reduction <maximumf>, %274, %cst_115 [1] : vector<9x9xf32> to vector<9xf32>
    %276 = vector.shape_cast %275 : vector<9xf32> to vector<9x1xf32>
    %277 = vector.broadcast %276 : vector<9x1xf32> to vector<9x9xf32>
    %278 = arith.subf %274, %277 : vector<9x9xf32>
    %279 = math.exp %278 : vector<9x9xf32>
    %cst_116 = arith.constant dense<0.000000e+00> : vector<9xf32>
    %280 = vector.multi_reduction <add>, %279, %cst_116 [1] : vector<9x9xf32> to vector<9xf32>
    %281 = vector.shape_cast %280 : vector<9xf32> to vector<9x1xf32>
    %282 = tpu.reciprocal %281 {approx = true} : vector<9x1xf32> -> vector<9x1xf32>
    %283 = vector.broadcast %282 : vector<9x1xf32> to vector<9x9xf32>
    %284 = arith.mulf %279, %283 : vector<9x9xf32>
    %cst_117 = arith.constant dense<0.000000e+00> : vector<9x8xf32>
    %285 = tpu.matmul %284, %273, %cst_117 {dimension_numbers = #tpu.dot_dimension_numbers<[1], [0], [0], [1], [0, 0, 1, 1], [], []>} : vector<9x9xf32>, vector<9x8xf32>, vector<9x8xf32> -> vector<9x8xf32>
    %286 = vector.extract_strided_slice %251 {offsets = [8, 0], sizes = [8, 32], strides = [1, 1]} : vector<32x32xf32> to vector<8x32xf32>
    %cst_118 = arith.constant dense<0.000000e+00> : vector<9x32xf32>
    %287 = tpu.matmul %285, %286, %cst_118 {dimension_numbers = #tpu.dot_dimension_numbers<[1], [0], [0], [1], [0, 0, 1, 1], [], []>} : vector<9x8xf32>, vector<8x32xf32>, vector<9x32xf32> -> vector<9x32xf32>
    %288 = arith.addf %270, %287 : vector<9x32xf32>
    %289 = vector.extract_strided_slice %247 {offsets = [0, 16], sizes = [9, 8], strides = [1, 1]} : vector<18x32xf32> to vector<9x8xf32>
    %290 = vector.extract_strided_slice %248 {offsets = [0, 16], sizes = [9, 8], strides = [1, 1]} : vector<18x32xf32> to vector<9x8xf32>
    %291 = vector.extract_strided_slice %249 {offsets = [0, 16], sizes = [9, 8], strides = [1, 1]} : vector<18x32xf32> to vector<9x8xf32>
    %cst_119 = arith.constant dense<0.000000e+00> : vector<9x9xf32>
    %292 = tpu.matmul %289, %290, %cst_119 {dimension_numbers = #tpu.dot_dimension_numbers<[1], [1], [0], [0], [0, 0, 1, 0], [], []>} : vector<9x8xf32>, vector<9x8xf32>, vector<9x9xf32> -> vector<9x9xf32>
    %cst_120 = arith.constant dense<0xFF800000> : vector<9xf32>
    %293 = vector.multi_reduction <maximumf>, %292, %cst_120 [1] : vector<9x9xf32> to vector<9xf32>
    %294 = vector.shape_cast %293 : vector<9xf32> to vector<9x1xf32>
    %295 = vector.broadcast %294 : vector<9x1xf32> to vector<9x9xf32>
    %296 = arith.subf %292, %295 : vector<9x9xf32>
    %297 = math.exp %296 : vector<9x9xf32>
    %cst_121 = arith.constant dense<0.000000e+00> : vector<9xf32>
    %298 = vector.multi_reduction <add>, %297, %cst_121 [1] : vector<9x9xf32> to vector<9xf32>
    %299 = vector.shape_cast %298 : vector<9xf32> to vector<9x1xf32>
    %300 = tpu.reciprocal %299 {approx = true} : vector<9x1xf32> -> vector<9x1xf32>
    %301 = vector.broadcast %300 : vector<9x1xf32> to vector<9x9xf32>
    %302 = arith.mulf %297, %301 : vector<9x9xf32>
    %cst_122 = arith.constant dense<0.000000e+00> : vector<9x8xf32>
    %303 = tpu.matmul %302, %291, %cst_122 {dimension_numbers = #tpu.dot_dimension_numbers<[1], [0], [0], [1], [0, 0, 1, 1], [], []>} : vector<9x9xf32>, vector<9x8xf32>, vector<9x8xf32> -> vector<9x8xf32>
    %304 = vector.extract_strided_slice %251 {offsets = [16, 0], sizes = [8, 32], strides = [1, 1]} : vector<32x32xf32> to vector<8x32xf32>
    %cst_123 = arith.constant dense<0.000000e+00> : vector<9x32xf32>
    %305 = tpu.matmul %303, %304, %cst_123 {dimension_numbers = #tpu.dot_dimension_numbers<[1], [0], [0], [1], [0, 0, 1, 1], [], []>} : vector<9x8xf32>, vector<8x32xf32>, vector<9x32xf32> -> vector<9x32xf32>
    %306 = arith.addf %288, %305 : vector<9x32xf32>
    %307 = vector.extract_strided_slice %247 {offsets = [0, 24], sizes = [9, 8], strides = [1, 1]} : vector<18x32xf32> to vector<9x8xf32>
    %308 = vector.extract_strided_slice %248 {offsets = [0, 24], sizes = [9, 8], strides = [1, 1]} : vector<18x32xf32> to vector<9x8xf32>
    %309 = vector.extract_strided_slice %249 {offsets = [0, 24], sizes = [9, 8], strides = [1, 1]} : vector<18x32xf32> to vector<9x8xf32>
    %cst_124 = arith.constant dense<0.000000e+00> : vector<9x9xf32>
    %310 = tpu.matmul %307, %308, %cst_124 {dimension_numbers = #tpu.dot_dimension_numbers<[1], [1], [0], [0], [0, 0, 1, 0], [], []>} : vector<9x8xf32>, vector<9x8xf32>, vector<9x9xf32> -> vector<9x9xf32>
    %cst_125 = arith.constant dense<0xFF800000> : vector<9xf32>
    %311 = vector.multi_reduction <maximumf>, %310, %cst_125 [1] : vector<9x9xf32> to vector<9xf32>
    %312 = vector.shape_cast %311 : vector<9xf32> to vector<9x1xf32>
    %313 = vector.broadcast %312 : vector<9x1xf32> to vector<9x9xf32>
    %314 = arith.subf %310, %313 : vector<9x9xf32>
    %315 = math.exp %314 : vector<9x9xf32>
    %cst_126 = arith.constant dense<0.000000e+00> : vector<9xf32>
    %316 = vector.multi_reduction <add>, %315, %cst_126 [1] : vector<9x9xf32> to vector<9xf32>
    %317 = vector.shape_cast %316 : vector<9xf32> to vector<9x1xf32>
    %318 = tpu.reciprocal %317 {approx = true} : vector<9x1xf32> -> vector<9x1xf32>
    %319 = vector.broadcast %318 : vector<9x1xf32> to vector<9x9xf32>
    %320 = arith.mulf %315, %319 : vector<9x9xf32>
    %cst_127 = arith.constant dense<0.000000e+00> : vector<9x8xf32>
    %321 = tpu.matmul %320, %309, %cst_127 {dimension_numbers = #tpu.dot_dimension_numbers<[1], [0], [0], [1], [0, 0, 1, 1], [], []>} : vector<9x9xf32>, vector<9x8xf32>, vector<9x8xf32> -> vector<9x8xf32>
    %322 = vector.extract_strided_slice %251 {offsets = [24, 0], sizes = [8, 32], strides = [1, 1]} : vector<32x32xf32> to vector<8x32xf32>
    %cst_128 = arith.constant dense<0.000000e+00> : vector<9x32xf32>
    %323 = tpu.matmul %321, %322, %cst_128 {dimension_numbers = #tpu.dot_dimension_numbers<[1], [0], [0], [1], [0, 0, 1, 1], [], []>} : vector<9x8xf32>, vector<8x32xf32>, vector<9x32xf32> -> vector<9x32xf32>
    %324 = arith.addf %306, %323 : vector<9x32xf32>
    %c0_129 = arith.constant 0 : index
    %c0_130 = arith.constant 0 : index
    %325 = vector.load %arg18[%c0_129, %c0_130] : memref<18x32xf32, #tpu.memory_space<vmem>>, vector<9x32xf32>
    tpu.vector_store %arg18[%c0_129, %c0_130], %324 {strides = array<i32>} : memref<18x32xf32, #tpu.memory_space<vmem>>, vector<9x32xf32>,
    %cst_131 = arith.constant 0.000000e+00 : f32
    %326 = vector.broadcast %cst_131 : f32 to vector<9x32xf32>
    %327 = vector.extract_strided_slice %247 {offsets = [9, 0], sizes = [9, 8], strides = [1, 1]} : vector<18x32xf32> to vector<9x8xf32>
    %328 = vector.extract_strided_slice %248 {offsets = [9, 0], sizes = [9, 8], strides = [1, 1]} : vector<18x32xf32> to vector<9x8xf32>
    %329 = vector.extract_strided_slice %249 {offsets = [9, 0], sizes = [9, 8], strides = [1, 1]} : vector<18x32xf32> to vector<9x8xf32>
    %cst_132 = arith.constant dense<0.000000e+00> : vector<9x9xf32>
    %330 = tpu.matmul %327, %328, %cst_132 {dimension_numbers = #tpu.dot_dimension_numbers<[1], [1], [0], [0], [0, 0, 1, 0], [], []>} : vector<9x8xf32>, vector<9x8xf32>, vector<9x9xf32> -> vector<9x9xf32>
    %cst_133 = arith.constant dense<0xFF800000> : vector<9xf32>
    %331 = vector.multi_reduction <maximumf>, %330, %cst_133 [1] : vector<9x9xf32> to vector<9xf32>
    %332 = vector.shape_cast %331 : vector<9xf32> to vector<9x1xf32>
    %333 = vector.broadcast %332 : vector<9x1xf32> to vector<9x9xf32>
    %334 = arith.subf %330, %333 : vector<9x9xf32>
    %335 = math.exp %334 : vector<9x9xf32>
    %cst_134 = arith.constant dense<0.000000e+00> : vector<9xf32>
    %336 = vector.multi_reduction <add>, %335, %cst_134 [1] : vector<9x9xf32> to vector<9xf32>
    %337 = vector.shape_cast %336 : vector<9xf32> to vector<9x1xf32>
    %338 = tpu.reciprocal %337 {approx = true} : vector<9x1xf32> -> vector<9x1xf32>
    %339 = vector.broadcast %338 : vector<9x1xf32> to vector<9x9xf32>
    %340 = arith.mulf %335, %339 : vector<9x9xf32>
    %cst_135 = arith.constant dense<0.000000e+00> : vector<9x8xf32>
    %341 = tpu.matmul %340, %329, %cst_135 {dimension_numbers = #tpu.dot_dimension_numbers<[1], [0], [0], [1], [0, 0, 1, 1], [], []>} : vector<9x9xf32>, vector<9x8xf32>, vector<9x8xf32> -> vector<9x8xf32>
    %342 = vector.extract_strided_slice %251 {offsets = [0, 0], sizes = [8, 32], strides = [1, 1]} : vector<32x32xf32> to vector<8x32xf32>
    %cst_136 = arith.constant dense<0.000000e+00> : vector<9x32xf32>
    %343 = tpu.matmul %341, %342, %cst_136 {dimension_numbers = #tpu.dot_dimension_numbers<[1], [0], [0], [1], [0, 0, 1, 1], [], []>} : vector<9x8xf32>, vector<8x32xf32>, vector<9x32xf32> -> vector<9x32xf32>
    %344 = arith.addf %326, %343 : vector<9x32xf32>
    %345 = vector.extract_strided_slice %247 {offsets = [9, 8], sizes = [9, 8], strides = [1, 1]} : vector<18x32xf32> to vector<9x8xf32>
    %346 = vector.extract_strided_slice %248 {offsets = [9, 8], sizes = [9, 8], strides = [1, 1]} : vector<18x32xf32> to vector<9x8xf32>
    %347 = vector.extract_strided_slice %249 {offsets = [9, 8], sizes = [9, 8], strides = [1, 1]} : vector<18x32xf32> to vector<9x8xf32>
    %cst_137 = arith.constant dense<0.000000e+00> : vector<9x9xf32>
    %348 = tpu.matmul %345, %346, %cst_137 {dimension_numbers = #tpu.dot_dimension_numbers<[1], [1], [0], [0], [0, 0, 1, 0], [], []>} : vector<9x8xf32>, vector<9x8xf32>, vector<9x9xf32> -> vector<9x9xf32>
    %cst_138 = arith.constant dense<0xFF800000> : vector<9xf32>
    %349 = vector.multi_reduction <maximumf>, %348, %cst_138 [1] : vector<9x9xf32> to vector<9xf32>
    %350 = vector.shape_cast %349 : vector<9xf32> to vector<9x1xf32>
    %351 = vector.broadcast %350 : vector<9x1xf32> to vector<9x9xf32>
    %352 = arith.subf %348, %351 : vector<9x9xf32>
    %353 = math.exp %352 : vector<9x9xf32>
    %cst_139 = arith.constant dense<0.000000e+00> : vector<9xf32>
    %354 = vector.multi_reduction <add>, %353, %cst_139 [1] : vector<9x9xf32> to vector<9xf32>
    %355 = vector.shape_cast %354 : vector<9xf32> to vector<9x1xf32>
    %356 = tpu.reciprocal %355 {approx = true} : vector<9x1xf32> -> vector<9x1xf32>
    %357 = vector.broadcast %356 : vector<9x1xf32> to vector<9x9xf32>
    %358 = arith.mulf %353, %357 : vector<9x9xf32>
    %cst_140 = arith.constant dense<0.000000e+00> : vector<9x8xf32>
    %359 = tpu.matmul %358, %347, %cst_140 {dimension_numbers = #tpu.dot_dimension_numbers<[1], [0], [0], [1], [0, 0, 1, 1], [], []>} : vector<9x9xf32>, vector<9x8xf32>, vector<9x8xf32> -> vector<9x8xf32>
    %360 = vector.extract_strided_slice %251 {offsets = [8, 0], sizes = [8, 32], strides = [1, 1]} : vector<32x32xf32> to vector<8x32xf32>
    %cst_141 = arith.constant dense<0.000000e+00> : vector<9x32xf32>
    %361 = tpu.matmul %359, %360, %cst_141 {dimension_numbers = #tpu.dot_dimension_numbers<[1], [0], [0], [1], [0, 0, 1, 1], [], []>} : vector<9x8xf32>, vector<8x32xf32>, vector<9x32xf32> -> vector<9x32xf32>
    %362 = arith.addf %344, %361 : vector<9x32xf32>
    %363 = vector.extract_strided_slice %247 {offsets = [9, 16], sizes = [9, 8], strides = [1, 1]} : vector<18x32xf32> to vector<9x8xf32>
    %364 = vector.extract_strided_slice %248 {offsets = [9, 16], sizes = [9, 8], strides = [1, 1]} : vector<18x32xf32> to vector<9x8xf32>
    %365 = vector.extract_strided_slice %249 {offsets = [9, 16], sizes = [9, 8], strides = [1, 1]} : vector<18x32xf32> to vector<9x8xf32>
    %cst_142 = arith.constant dense<0.000000e+00> : vector<9x9xf32>
    %366 = tpu.matmul %363, %364, %cst_142 {dimension_numbers = #tpu.dot_dimension_numbers<[1], [1], [0], [0], [0, 0, 1, 0], [], []>} : vector<9x8xf32>, vector<9x8xf32>, vector<9x9xf32> -> vector<9x9xf32>
    %cst_143 = arith.constant dense<0xFF800000> : vector<9xf32>
    %367 = vector.multi_reduction <maximumf>, %366, %cst_143 [1] : vector<9x9xf32> to vector<9xf32>
    %368 = vector.shape_cast %367 : vector<9xf32> to vector<9x1xf32>
    %369 = vector.broadcast %368 : vector<9x1xf32> to vector<9x9xf32>
    %370 = arith.subf %366, %369 : vector<9x9xf32>
    %371 = math.exp %370 : vector<9x9xf32>
    %cst_144 = arith.constant dense<0.000000e+00> : vector<9xf32>
    %372 = vector.multi_reduction <add>, %371, %cst_144 [1] : vector<9x9xf32> to vector<9xf32>
    %373 = vector.shape_cast %372 : vector<9xf32> to vector<9x1xf32>
    %374 = tpu.reciprocal %373 {approx = true} : vector<9x1xf32> -> vector<9x1xf32>
    %375 = vector.broadcast %374 : vector<9x1xf32> to vector<9x9xf32>
    %376 = arith.mulf %371, %375 : vector<9x9xf32>
    %cst_145 = arith.constant dense<0.000000e+00> : vector<9x8xf32>
    %377 = tpu.matmul %376, %365, %cst_145 {dimension_numbers = #tpu.dot_dimension_numbers<[1], [0], [0], [1], [0, 0, 1, 1], [], []>} : vector<9x9xf32>, vector<9x8xf32>, vector<9x8xf32> -> vector<9x8xf32>
    %378 = vector.extract_strided_slice %251 {offsets = [16, 0], sizes = [8, 32], strides = [1, 1]} : vector<32x32xf32> to vector<8x32xf32>
    %cst_146 = arith.constant dense<0.000000e+00> : vector<9x32xf32>
    %379 = tpu.matmul %377, %378, %cst_146 {dimension_numbers = #tpu.dot_dimension_numbers<[1], [0], [0], [1], [0, 0, 1, 1], [], []>} : vector<9x8xf32>, vector<8x32xf32>, vector<9x32xf32> -> vector<9x32xf32>
    %380 = arith.addf %362, %379 : vector<9x32xf32>
    %381 = vector.extract_strided_slice %247 {offsets = [9, 24], sizes = [9, 8], strides = [1, 1]} : vector<18x32xf32> to vector<9x8xf32>
    %382 = vector.extract_strided_slice %248 {offsets = [9, 24], sizes = [9, 8], strides = [1, 1]} : vector<18x32xf32> to vector<9x8xf32>
    %383 = vector.extract_strided_slice %249 {offsets = [9, 24], sizes = [9, 8], strides = [1, 1]} : vector<18x32xf32> to vector<9x8xf32>
    %cst_147 = arith.constant dense<0.000000e+00> : vector<9x9xf32>
    %384 = tpu.matmul %381, %382, %cst_147 {dimension_numbers = #tpu.dot_dimension_numbers<[1], [1], [0], [0], [0, 0, 1, 0], [], []>} : vector<9x8xf32>, vector<9x8xf32>, vector<9x9xf32> -> vector<9x9xf32>
    %cst_148 = arith.constant dense<0xFF800000> : vector<9xf32>
    %385 = vector.multi_reduction <maximumf>, %384, %cst_148 [1] : vector<9x9xf32> to vector<9xf32>
    %386 = vector.shape_cast %385 : vector<9xf32> to vector<9x1xf32>
    %387 = vector.broadcast %386 : vector<9x1xf32> to vector<9x9xf32>
    %388 = arith.subf %384, %387 : vector<9x9xf32>
    %389 = math.exp %388 : vector<9x9xf32>
    %cst_149 = arith.constant dense<0.000000e+00> : vector<9xf32>
    %390 = vector.multi_reduction <add>, %389, %cst_149 [1] : vector<9x9xf32> to vector<9xf32>
    %391 = vector.shape_cast %390 : vector<9xf32> to vector<9x1xf32>
    %392 = tpu.reciprocal %391 {approx = true} : vector<9x1xf32> -> vector<9x1xf32>
    %393 = vector.broadcast %392 : vector<9x1xf32> to vector<9x9xf32>
    %394 = arith.mulf %389, %393 : vector<9x9xf32>
    %cst_150 = arith.constant dense<0.000000e+00> : vector<9x8xf32>
    %395 = tpu.matmul %394, %383, %cst_150 {dimension_numbers = #tpu.dot_dimension_numbers<[1], [0], [0], [1], [0, 0, 1, 1], [], []>} : vector<9x9xf32>, vector<9x8xf32>, vector<9x8xf32> -> vector<9x8xf32>
    %396 = vector.extract_strided_slice %251 {offsets = [24, 0], sizes = [8, 32], strides = [1, 1]} : vector<32x32xf32> to vector<8x32xf32>
    %cst_151 = arith.constant dense<0.000000e+00> : vector<9x32xf32>
    %397 = tpu.matmul %395, %396, %cst_151 {dimension_numbers = #tpu.dot_dimension_numbers<[1], [0], [0], [1], [0, 0, 1, 1], [], []>} : vector<9x8xf32>, vector<8x32xf32>, vector<9x32xf32> -> vector<9x32xf32>
    %398 = arith.addf %380, %397 : vector<9x32xf32>
    %c9_152 = arith.constant 9 : index
    %c0_153 = arith.constant 0 : index
    %399 = vector.load %arg18[%c9_152, %c0_153] : memref<18x32xf32, #tpu.memory_space<vmem>>, vector<9x32xf32>
    tpu.vector_store %arg18[%c9_152, %c0_153], %398 {strides = array<i32>} : memref<18x32xf32, #tpu.memory_space<vmem>>, vector<9x32xf32>,
    %c0_154 = arith.constant 0 : index
    %c0_155 = arith.constant 0 : index
    %400 = vector.load %arg18[%c0_154, %c0_155] : memref<18x32xf32, #tpu.memory_space<vmem>>, vector<18x32xf32>
    %401 = arith.addf %237, %400 : vector<18x32xf32>
    %c1_156 = arith.constant 1 : index
    %c0_157 = arith.constant 0 : index
    %c0_158 = arith.constant 0 : index
    %402 = vector.load %arg4[%c1_156, %c0_157, %c0_158] : memref<2x1x32xf32, #tpu.memory_space<vmem>>, vector<1x1x32xf32>
    %403 = vector.shape_cast %402 : vector<1x1x32xf32> to vector<1x32xf32>
    %404 = vector.broadcast %403 : vector<1x32xf32> to vector<18x32xf32>
    %405 = arith.addf %401, %404 : vector<18x32xf32>
    %cst_159 = arith.constant dense<0.000000e+00> : vector<18xf32>
    %406 = vector.multi_reduction <add>, %405, %cst_159 [1] : vector<18x32xf32> to vector<18xf32>
    %407 = vector.shape_cast %406 : vector<18xf32> to vector<18x1xf32>
    %cst_160 = arith.constant 3.200000e+01 : f32
    %408 = vector.broadcast %cst_160 : f32 to vector<18x1xf32>
    %409 = arith.divf %407, %408 : vector<18x1xf32>
    %410 = vector.broadcast %409 : vector<18x1xf32> to vector<18x32xf32>
    %411 = arith.subf %405, %410 : vector<18x32xf32>
    %412 = arith.mulf %411, %411 : vector<18x32xf32>
    %cst_161 = arith.constant dense<0.000000e+00> : vector<18xf32>
    %413 = vector.multi_reduction <add>, %412, %cst_161 [1] : vector<18x32xf32> to vector<18xf32>
    %414 = vector.shape_cast %413 : vector<18xf32> to vector<18x1xf32>
    %cst_162 = arith.constant 3.200000e+01 : f32
    %415 = vector.broadcast %cst_162 : f32 to vector<18x1xf32>
    %416 = arith.divf %414, %415 : vector<18x1xf32>
    %417 = vector.broadcast %409 : vector<18x1xf32> to vector<18x32xf32>
    %418 = arith.subf %405, %417 : vector<18x32xf32>
    %cst_163 = arith.constant 9.99999974E-6 : f32
    %419 = vector.broadcast %cst_163 : f32 to vector<18x1xf32>
    %420 = arith.addf %416, %419 : vector<18x1xf32>
    %421 = math.rsqrt %420 : vector<18x1xf32>
    %422 = vector.broadcast %421 : vector<18x1xf32> to vector<18x32xf32>
    %423 = arith.mulf %418, %422 : vector<18x32xf32>
    %c1_164 = arith.constant 1 : index
    %c0_165 = arith.constant 0 : index
    %c0_166 = arith.constant 0 : index
    %424 = vector.load %arg5[%c1_164, %c0_165, %c0_166] : memref<2x1x32xf32, #tpu.memory_space<vmem>>, vector<1x1x32xf32>
    %425 = vector.shape_cast %424 : vector<1x1x32xf32> to vector<1x32xf32>
    %426 = vector.broadcast %425 : vector<1x32xf32> to vector<18x32xf32>
    %427 = arith.mulf %423, %426 : vector<18x32xf32>
    %c1_167 = arith.constant 1 : index
    %c0_168 = arith.constant 0 : index
    %c0_169 = arith.constant 0 : index
    %428 = vector.load %arg6[%c1_167, %c0_168, %c0_169] : memref<2x1x32xf32, #tpu.memory_space<vmem>>, vector<1x1x32xf32>
    %429 = vector.shape_cast %428 : vector<1x1x32xf32> to vector<1x32xf32>
    %430 = vector.broadcast %429 : vector<1x32xf32> to vector<18x32xf32>
    %431 = arith.addf %427, %430 : vector<18x32xf32>
    %c1_170 = arith.constant 1 : index
    %c0_171 = arith.constant 0 : index
    %c0_172 = arith.constant 0 : index
    %432 = vector.load %arg7[%c1_170, %c0_171, %c0_172] : memref<2x32x64xf32, #tpu.memory_space<vmem>>, vector<1x32x64xf32>
    %433 = vector.shape_cast %432 : vector<1x32x64xf32> to vector<32x64xf32>
    %cst_173 = arith.constant dense<0.000000e+00> : vector<18x64xf32>
    %434 = tpu.matmul %431, %433, %cst_173 {dimension_numbers = #tpu.dot_dimension_numbers<[1], [0], [0], [1], [0, 0, 1, 1], [], []>} : vector<18x32xf32>, vector<32x64xf32>, vector<18x64xf32> -> vector<18x64xf32>
    %c1_174 = arith.constant 1 : index
    %c0_175 = arith.constant 0 : index
    %c0_176 = arith.constant 0 : index
    %435 = vector.load %arg8[%c1_174, %c0_175, %c0_176] : memref<2x1x64xf32, #tpu.memory_space<vmem>>, vector<1x1x64xf32>
    %436 = vector.shape_cast %435 : vector<1x1x64xf32> to vector<1x64xf32>
    %437 = vector.broadcast %436 : vector<1x64xf32> to vector<18x64xf32>
    %438 = arith.addf %434, %437 : vector<18x64xf32>
    %cst_177 = arith.constant 0.000000e+00 : f32
    %439 = vector.broadcast %cst_177 : f32 to vector<18x64xf32>
    %440 = arith.maximumf %438, %439 : vector<18x64xf32>
    %c1_178 = arith.constant 1 : index
    %c0_179 = arith.constant 0 : index
    %c0_180 = arith.constant 0 : index
    %441 = vector.load %arg9[%c1_178, %c0_179, %c0_180] : memref<2x64x32xf32, #tpu.memory_space<vmem>>, vector<1x64x32xf32>
    %442 = vector.shape_cast %441 : vector<1x64x32xf32> to vector<64x32xf32>
    %cst_181 = arith.constant dense<0.000000e+00> : vector<18x32xf32>
    %443 = tpu.matmul %440, %442, %cst_181 {dimension_numbers = #tpu.dot_dimension_numbers<[1], [0], [0], [1], [0, 0, 1, 1], [], []>} : vector<18x64xf32>, vector<64x32xf32>, vector<18x32xf32> -> vector<18x32xf32>
    %c1_182 = arith.constant 1 : index
    %c0_183 = arith.constant 0 : index
    %c0_184 = arith.constant 0 : index
    %444 = vector.load %arg10[%c1_182, %c0_183, %c0_184] : memref<2x1x32xf32, #tpu.memory_space<vmem>>, vector<1x1x32xf32>
    %445 = vector.shape_cast %444 : vector<1x1x32xf32> to vector<1x32xf32>
    %446 = vector.broadcast %445 : vector<1x32xf32> to vector<18x32xf32>
    %447 = arith.addf %443, %446 : vector<18x32xf32>
    %448 = arith.addf %431, %447 : vector<18x32xf32>
    %cst_185 = arith.constant dense<0.000000e+00> : vector<18xf32>
    %449 = vector.multi_reduction <add>, %448, %cst_185 [1] : vector<18x32xf32> to vector<18xf32>
    %450 = vector.shape_cast %449 : vector<18xf32> to vector<18x1xf32>
    %cst_186 = arith.constant 3.200000e+01 : f32
    %451 = vector.broadcast %cst_186 : f32 to vector<18x1xf32>
    %452 = arith.divf %450, %451 : vector<18x1xf32>
    %453 = vector.broadcast %452 : vector<18x1xf32> to vector<18x32xf32>
    %454 = arith.subf %448, %453 : vector<18x32xf32>
    %455 = arith.mulf %454, %454 : vector<18x32xf32>
    %cst_187 = arith.constant dense<0.000000e+00> : vector<18xf32>
    %456 = vector.multi_reduction <add>, %455, %cst_187 [1] : vector<18x32xf32> to vector<18xf32>
    %457 = vector.shape_cast %456 : vector<18xf32> to vector<18x1xf32>
    %cst_188 = arith.constant 3.200000e+01 : f32
    %458 = vector.broadcast %cst_188 : f32 to vector<18x1xf32>
    %459 = arith.divf %457, %458 : vector<18x1xf32>
    %460 = vector.broadcast %452 : vector<18x1xf32> to vector<18x32xf32>
    %461 = arith.subf %448, %460 : vector<18x32xf32>
    %cst_189 = arith.constant 9.99999974E-6 : f32
    %462 = vector.broadcast %cst_189 : f32 to vector<18x1xf32>
    %463 = arith.addf %459, %462 : vector<18x1xf32>
    %464 = math.rsqrt %463 : vector<18x1xf32>
    %465 = vector.broadcast %464 : vector<18x1xf32> to vector<18x32xf32>
    %466 = arith.mulf %461, %465 : vector<18x32xf32>
    %c1_190 = arith.constant 1 : index
    %c0_191 = arith.constant 0 : index
    %c0_192 = arith.constant 0 : index
    %467 = vector.load %arg11[%c1_190, %c0_191, %c0_192] : memref<2x1x32xf32, #tpu.memory_space<vmem>>, vector<1x1x32xf32>
    %468 = vector.shape_cast %467 : vector<1x1x32xf32> to vector<1x32xf32>
    %469 = vector.broadcast %468 : vector<1x32xf32> to vector<18x32xf32>
    %470 = arith.mulf %466, %469 : vector<18x32xf32>
    %c1_193 = arith.constant 1 : index
    %c0_194 = arith.constant 0 : index
    %c0_195 = arith.constant 0 : index
    %471 = vector.load %arg12[%c1_193, %c0_194, %c0_195] : memref<2x1x32xf32, #tpu.memory_space<vmem>>, vector<1x1x32xf32>
    %472 = vector.shape_cast %471 : vector<1x1x32xf32> to vector<1x32xf32>
    %473 = vector.broadcast %472 : vector<1x32xf32> to vector<18x32xf32>
    %474 = arith.addf %470, %473 : vector<18x32xf32>
    %475 = vector.extract_strided_slice %474 {offsets = [0, 0], sizes = [9, 32], strides = [1, 1]} : vector<18x32xf32> to vector<9x32xf32>
    %cst_196 = arith.constant dense<0.000000e+00> : vector<32xf32>
    %476 = vector.multi_reduction <add>, %475, %cst_196 [0] : vector<9x32xf32> to vector<32xf32>
    %477 = vector.shape_cast %476 : vector<32xf32> to vector<1x32xf32>
    %cst_197 = arith.constant 9.000000e+00 : f32
    %478 = vector.broadcast %cst_197 : f32 to vector<1x32xf32>
    %479 = arith.divf %477, %478 : vector<1x32xf32>
    %c0_198 = arith.constant 0 : index
    %c0_199 = arith.constant 0 : index
    %480 = vector.load %arg19[%c0_198, %c0_199] : memref<2x32xf32, #tpu.memory_space<vmem>>, vector<1x32xf32>
    tpu.vector_store %arg19[%c0_198, %c0_199], %479 {strides = array<i32>} : memref<2x32xf32, #tpu.memory_space<vmem>>, vector<1x32xf32>,
    %481 = vector.extract_strided_slice %474 {offsets = [9, 0], sizes = [9, 32], strides = [1, 1]} : vector<18x32xf32> to vector<9x32xf32>
    %cst_200 = arith.constant dense<0.000000e+00> : vector<32xf32>
    %482 = vector.multi_reduction <add>, %481, %cst_200 [0] : vector<9x32xf32> to vector<32xf32>
    %483 = vector.shape_cast %482 : vector<32xf32> to vector<1x32xf32>
    %cst_201 = arith.constant 9.000000e+00 : f32
    %484 = vector.broadcast %cst_201 : f32 to vector<1x32xf32>
    %485 = arith.divf %483, %484 : vector<1x32xf32>
    %c1_202 = arith.constant 1 : index
    %c0_203 = arith.constant 0 : index
    %486 = vector.load %arg19[%c1_202, %c0_203] : memref<2x32xf32, #tpu.memory_space<vmem>>, vector<1x32xf32>
    tpu.vector_store %arg19[%c1_202, %c0_203], %485 {strides = array<i32>} : memref<2x32xf32, #tpu.memory_space<vmem>>, vector<1x32xf32>,
    %c0_204 = arith.constant 0 : index
    %c0_205 = arith.constant 0 : index
    %487 = vector.load %arg19[%c0_204, %c0_205] : memref<2x32xf32, #tpu.memory_space<vmem>>, vector<2x32xf32>
    %c0_206 = arith.constant 0 : index
    %c0_207 = arith.constant 0 : index
    %488 = vector.load %arg13[%c0_206, %c0_207] : memref<32x32xf32, #tpu.memory_space<vmem>>, vector<32x32xf32>
    %cst_208 = arith.constant dense<0.000000e+00> : vector<2x32xf32>
    %489 = tpu.matmul %487, %488, %cst_208 {dimension_numbers = #tpu.dot_dimension_numbers<[1], [0], [0], [1], [0, 0, 1, 1], [], []>} : vector<2x32xf32>, vector<32x32xf32>, vector<2x32xf32> -> vector<2x32xf32>
    %c0_209 = arith.constant 0 : index
    %c0_210 = arith.constant 0 : index
    %490 = vector.load %arg14[%c0_209, %c0_210] : memref<1x32xf32, #tpu.memory_space<vmem>>, vector<1x32xf32>
    %491 = vector.broadcast %490 : vector<1x32xf32> to vector<2x32xf32>
    %492 = arith.addf %489, %491 : vector<2x32xf32>
    %cst_211 = arith.constant 0.000000e+00 : f32
    %493 = vector.broadcast %cst_211 : f32 to vector<2x32xf32>
    %494 = arith.maximumf %492, %493 : vector<2x32xf32>
    %c0_212 = arith.constant 0 : index
    %c0_213 = arith.constant 0 : index
    %495 = vector.load %arg15[%c0_212, %c0_213] : memref<32x4xf32, #tpu.memory_space<vmem>>, vector<32x4xf32>
    %cst_214 = arith.constant dense<0.000000e+00> : vector<2x4xf32>
    %496 = tpu.matmul %494, %495, %cst_214 {dimension_numbers = #tpu.dot_dimension_numbers<[1], [0], [0], [1], [0, 0, 1, 1], [], []>} : vector<2x32xf32>, vector<32x4xf32>, vector<2x4xf32> -> vector<2x4xf32>
    %c0_215 = arith.constant 0 : index
    %c0_216 = arith.constant 0 : index
    %497 = vector.load %arg16[%c0_215, %c0_216] : memref<1x4xf32, #tpu.memory_space<vmem>>, vector<1x4xf32>
    %498 = vector.broadcast %497 : vector<1x4xf32> to vector<2x4xf32>
    %499 = arith.addf %496, %498 : vector<2x4xf32>
    %c0_217 = arith.constant 0 : index
    %c0_218 = arith.constant 0 : index
    %500 = vector.load %arg17[%c0_217, %c0_218] : memref<2x4xf32, #tpu.memory_space<vmem>>, vector<2x4xf32>
    tpu.vector_store %arg17[%c0_217, %c0_218], %499 {strides = array<i32>} : memref<2x4xf32, #tpu.memory_space<vmem>>, vector<2x4xf32>,
    return
  }
}

</mosaic_0001>

<bundles_post_ra>
// kernel: forward.1
= control target key start
LH: loop header
LB: loop body
LE: loop exit
PB: predicated region body
PF: predicated region fallthrough
CT: control target
= control target key end

     0   :  { %s8302_s0 = inlined_call_operand.vmem [shape: f32[18,32], index: 0, kind: input, shape index: {}]   ;;  %s8303_s1 = inlined_call_operand.vmem [shape: f32[2,32,96], index: 1, kind: input, shape index: {}]   ;;  %s8304_s2 = inlined_call_operand.vmem [shape: f32[2,1,96], index: 2, kind: input, shape index: {}]   ;;  %s8305_s3 = inlined_call_operand.vmem [shape: f32[2,32,32], index: 3, kind: input, shape index: {}]   ;;  %s8306_s4 = inlined_call_operand.vmem [shape: f32[2,1,32], index: 4, kind: input, shape index: {}]   ;;  %s8307_s5 = inlined_call_operand.vmem [shape: f32[2,1,32], index: 5, kind: input, shape index: {}]   ;;  %s8308_s6 = inlined_call_operand.vmem [shape: f32[2,1,32], index: 6, kind: input, shape index: {}]   ;;  %s8309_s7 = inlined_call_operand.vmem [shape: f32[2,32,64], index: 7, kind: input, shape index: {}]   ;;  %s8310_s8 = inlined_call_operand.vmem [shape: f32[2,1,64], index: 8, kind: input, shape index: {}]   ;;  %s8311_s9 = inlined_call_operand.vmem [shape: f32[2,64,32], index: 9, kind: input, shape index: {}]   ;;  %s8312_s10 = inlined_call_operand.vmem [shape: f32[2,1,32], index: 10, kind: input, shape index: {}]   ;;  %s8313_s11 = inlined_call_operand.vmem [shape: f32[2,1,32], index: 11, kind: input, shape index: {}]   ;;  %s8314_s12 = inlined_call_operand.vmem [shape: f32[2,1,32], index: 12, kind: input, shape index: {}]   ;;  %s8315_s13 = inlined_call_operand.vmem [shape: f32[32,32], index: 13, kind: input, shape index: {}]   ;;  %s8316_s14 = inlined_call_operand.vmem [shape: f32[1,32], index: 14, kind: input, shape index: {}]   ;;  %s8317_s15 = inlined_call_operand.vmem [shape: f32[32,4], index: 15, kind: input, shape index: {}]   ;;  %s8318_s16 = inlined_call_operand.vmem [shape: f32[1,4], index: 16, kind: input, shape index: {}]   ;;  %s8319_s17 = inlined_call_operand.hbm [shape: f32[2,4], index: 17, kind: output, shape index: {}]  }
   0x1   :  { %8334 = sst [smem:[#allocation7_spill]] %s8302_s0 }
   0x2   :  { %8335 = sst [smem:[#allocation8_spill]] %s8303_s1 }
   0x3   :  { %s8336_s26 = sld [smem:[#allocation8_spill]]  ;;  %v7264_v3 = vmov 0.0|0.0   ;;  %vm7265_vm0 = vmmov 0   ;;  %v7266_v6 = vmov 0.0  }
   0x4   :  { %6634 = vmatprep.subr.bf16.mxu0 %v7264_v3  ;;  %6198 = vmatprep.mubr.msk.f32.mxu0 %vm7265_vm0, %v7266_v6 }
   0x9   :  { %v60_v0 = vld [vmem:[%s8336_s26] sm:$0xff]  ;;  %v61_v1 = vld [vmem:[%s8336_s26 + $0x8] sm:$0xff]  ;;  %v62_v2 = vld [vmem:[%s8336_s26 + $0x10] sm:$0xff] }
   0xa   :  { %v6635_v4 = vpack.c.bf16 %v61_v1, %v60_v0  ;;  %v63_v5 = vld [vmem:[%s8336_s26 + $0x18] sm:$0xff] }
   0xb   :  { %22 = vsyncpa [#allocation5], 0  ;;  %v6638_v7 = vpack.c.bf16 %v63_v5, %v62_v2  ;;  %s8337_s20 = sld [smem:[#allocation7_spill]]  ;;  %vm71_vm1 = vcmask 261120   ;;  %v5744_v11 = vld [vmem:[%s8304_s2] ss:$0 sm:$0xff] }
   0xc   :  { %6636 = vmatpush3.bf16.msra.mxu0 %v6635_v4  ;;  %vm174_vm2 = vcmask 64512   ;;  %s7267_s28 = smov 120   ;;  %s7268_s29 = smov 96   ;;  %vm1308_vm3 = vcmask 1046528   ;;  %vm264_vm5 = vcmask 65536   ;;  %vm260_vm6 = vcmask 72704  }
   0xd   :  { %6637 = vmatprep.subr.bf16.mxu0 %v7264_v3  ;;  %s8322_s0 = smov 88   ;;  %s7270_s30 = smov 112   ;;  %vm7439_vm4 = vmpackc.low %vm174_vm2, %vm174_vm2  ;;  %vm295_vm7 = vcmask 1040384   ;;  %vm7277_vm8 = vmmov 1   ;;  %vm1305_vm10 = vcmask 253952   ;;  %vm2641_vm11 = vcmask 523264  }
   0xe   :  { %s7271_s18 = smov 80   ;;  %s8328_s19 = smov 56   ;;  %vm7506_vm9 = vmpackc.low %vm295_vm7, %vm7277_vm8  ;;  %vm2468_vm12 = vcmask 254976   ;;  %vm5728_vm13 = vcmask 25600  }
   0xf   :  { %s8332_s1 = smov 72   ;;  %s7274_s21 = smov 64  }
  0x10   :  { %6639 = vmatpush3.bf16.msra.mxu0 %v6638_v7  ;;  %s8330_s22 = smov 104   ;;  %s8326_s23 = smov 48  }
  0x11   :  { %v7389_v8 = vld [vmem:[%s8337_s20] sm:$0xff]  ;;  %v58_v9 = vld [vmem:[%s8337_s20 + $0x8] sm:$0xff]  ;;  %v59_v10 = vld [vmem:[%s8337_s20 + $0x10] sm:$0x3]  ;;  %s8324_s25 = smov 40   ;;  %s8343_s27 = smov 72  }
  0x13   :  { %6199 = vmatmul.mubr.msk.f32.vlgmr.msra.gmra.mrb[0].mxu0 %vm71_vm1, %v7389_v8 }
  0x14   :  { %6201 = vmatprep.mubr.msk.f32.mxu0 %vm7265_vm0, %v7266_v6 }
  0x17   :  { %6202 = vmatmul.mubr.msk.f32.gmra.mrb[2].mxu0 %vm71_vm1, %v58_v9 }
  0x18   :  { %6204 = vmatprep.mubr.msk.f32.mxu0 %vm7265_vm0, %v7266_v6 }
  0x1b   :  { %6205 = vmatmul.mubr.msk.f32.gmra.mrb[4].mxu0 %vm71_vm1, %v59_v10 }
  0xe6   :  { %v147_v12 = vpop.f32.mrb[0].mxu0 }
  0xe7   :  { %v148_v13 = vadd.f32 %v5744_v11, %v147_v12  ;;  %v6200_v14 = vpop.f32.mrb[1].mxu0 }
  0xe9   :  { %v7408_v15 = vmul.f32 0.35355338, %v148_v13 }
  0xea   :  { %v152_v16 = vpop.f32.mrb[2].mxu0 }
  0xeb   :  { %v153_v17 = vadd.f32 %v5744_v11, %v152_v16  ;;  %373 = vrot.lane.b32.xlu1 %v7408_v15, %s7267_s28  ;;  %v6203_v18 = vpop.f32.mrb[3].mxu0  ;;  %6211 = vmatprep.mubr.msk.f32.mxu1 %vm174_vm2, %v7408_v15 }
  0xed   :  { %v7414_v19 = vpack.i.bf16 %v153_v17, %v148_v13  ;;  %v7416_v20 = vmul.f32 0.35355338, %v153_v17  ;;  %v1313_v25 = vrot.slane %v153_v17, 1 }
  0xee   :  { %v157_v21 = vpop.f32.mrb[4].mxu0 }
  0xef   :  { %v7418_v22 = vadd.f32 %v5744_v11, %v157_v21  ;;  %6927 = vrot.lane.b32.xlu0 %v7414_v19, %s7268_s29  ;;  %375 = vrot.lane.b32.xlu1 %v7416_v20, %s7267_s28  ;;  %v6206_v23 = vpop.f32.mrb[5].mxu0 }
  0xf1   :  { %v1314_v24 = vrot.slane %v7418_v22, 1  ;;  %v163_v17 = vmul.f32 0.35355338, %v7418_v22 }
  0xf3   :  { %6932 = vrot.lane.b32.xlu0 %v7414_v19, %s8322_s0  ;;  %736 = vrot.lane.b32.xlu1 %v7408_v15, %s7270_s30  ;;  %v1315_v26 = vsel %vm1308_vm3, %v1313_v25, %v1314_v24  ;;  %v7495_v18 = vrot.slane %v163_v17, 1 }
  0xf4   :  { %v7430_v27 = vpack.i.bf16 %v1314_v24, %v1315_v26 }
  0xf7   :  { %6937 = vrot.lane.b32.xlu0 %v7414_v19, %s7271_s18 }
  0xfb   :  { %738 = vrot.lane.b32.xlu0 %v7416_v20, %s7270_s30 }
 0x15d   :  { %v374_v28 = vpop.permute.xlu1 %373 }
 0x15e   :  { %6225 = vmatprep.mubr.msk.f32.mxu0 %vm174_vm2, %v374_v28 }
 0x161   :  { %v6928_v29 = vpop.permute.xlu0 %6927  ;;  %v376_v41 = vpop.permute.xlu1 %375 }
 0x162   :  { %v6930_v30 = vunpack.i.h.bf16 %v6928_v29  ;;  %v6929_v31 = vunpack.i.l.bf16 %v6928_v29 }
 0x164   :  { %v6640_v33 = vpack.c.bf16 %v6930_v30, %v6929_v31 }
 0x165   :  { %v6933_v34 = vpop.permute.xlu0 %6932  ;;  %v737_v43 = vpop.permute.xlu1 %736 }
 0x166   :  { %v6935_v35 = vunpack.i.h.bf16 %v6933_v34  ;;  %v6934_v36 = vunpack.i.l.bf16 %v6933_v34  ;;  %6642 = vmatprep.subr.msk.bf16.mxu1 %vm7439_vm4, %v6640_v33 }
 0x167   :  { %6645 = vmatpush3.bf16.xpose.msk.msra.mxu1 %vm7439_vm4, %v6640_v33 }
 0x168   :  { %v6652_v37 = vpack.c.bf16 %v6935_v35, %v6934_v36 }
 0x169   :  { %v6938_v38 = vpop.permute.xlu0 %6937 }
 0x16a   :  { %v6940_v39 = vunpack.i.h.bf16 %v6938_v38  ;;  %v6939_v40 = vunpack.i.l.bf16 %v6938_v38  ;;  %6654 = vmatprep.subr.msk.bf16.mxu0 %vm7439_vm4, %v6652_v37 }
 0x16b   :  { %6657 = vmatpush3.bf16.xpose.msk.msra.mxu0 %vm7439_vm4, %v6652_v37 }
 0x16c   :  { %v6664_v42 = vpack.c.bf16 %v6940_v39, %v6939_v40 }
 0x16d   :  { %v739_v44 = vpop.permute.xlu0 %738 }
 0x16e   :  { %6212 = vmatmul.mubr.msk.f32.vlgmr.msra.gmra.mrb[0].mxu1 %vm174_vm2, %v7416_v20  ;;  %6666 = vmatprep.subr.msk.bf16.mxu0 %vm7439_vm4, %v6664_v42 }
 0x172   :  { %6226 = vmatmul.mubr.msk.f32.vlgmr.msra.gmra.mrb[6].mxu0 %vm174_vm2, %v376_v41 }
 0x173   :  { %6669 = vmatpush3.bf16.xpose.msk.msra.mxu0 %vm7439_vm4, %v6664_v42  ;;  %6249 = vmatprep.mubr.msk.f32.mxu0 %vm174_vm2, %v737_v43 }
 0x17a   :  { %6250 = vmatmul.mubr.msk.f32.vlgmr.msra.gmra.mrb[8].mxu0 %vm174_vm2, %v739_v44 }
 0x241   :  { %v6213_v45 = vpop.f32.mrb[0].mxu1 }
 0x242   :  { %v251_v46 = vpop.f32.mrb[1].mxu1  ;;  %v265_v47 = vsel %vm264_vm5, %v6213_v45, -inf }
 0x243   :  { %266 = vmax.xlane.f32.xlu0 %v265_v47  ;;  %v261_v48 = vsel %vm260_vm6, %v251_v46, -inf }
 0x244   :  { %262 = vmax.xlane.f32.xlu1 %v261_v48 }
 0x245   :  { %v6227_v49 = vpop.f32.mrb[6].mxu0 }
 0x246   :  { %v455_v50 = vpop.f32.mrb[7].mxu0  ;;  %v467_v51 = vsel %vm264_vm5, %v6227_v49, -inf }
 0x247   :  { %v464_v52 = vsel %vm260_vm6, %v455_v50, -inf }
 0x248   :  { %468 = vmax.xlane.f32.xlu1 %v467_v51  ;;  %465 = vmax.xlane.f32.xlu0 %v464_v52 }
 0x24d   :  { %v7464_v53 = vpop.f32.mrb[8].mxu0 }
 0x24e   :  { %v7466_v54 = vpop.f32.mrb[9].mxu0  ;;  %v830_v16 = vsel %vm264_vm5, %v7464_v53, -inf }
 0x24f   :  { %v827_v14 = vsel %vm260_vm6, %v7466_v54, -inf }
 0x2d0   :  { %v267_v55 = vpop.xlane.xlu0 %266 }
 0x2d1   :  { %v269_v56 = vsub.f32 %v6213_v45, %v267_v55  ;;  %v263_v57 = vpop.xlane.xlu1 %262 }
 0x2d2   :  { %v268_v58 = vsub.f32 %v251_v46, %v263_v57 }
 0x2d3   :  { %v272_v59 = vmul.f32 1.442695, %v269_v56 }
 0x2d4   :  { %v270_v60 = vmul.f32 1.442695, %v268_v58 }
 0x2d5   :  { %7086 = vpow2.f32 %v272_v59  ;;  %v469_v61 = vpop.xlane.xlu1 %468  ;;  %v466_v62 = vpop.xlane.xlu0 %465 }
 0x2d6   :  { %7088 = vpow2.f32 %v270_v60  ;;  %v471_v63 = vsub.f32 %v6227_v49, %v469_v61  ;;  %v470_v0 = vsub.f32 %v455_v50, %v466_v62 }
 0x2d8   :  { %v474_v1 = vmul.f32 1.442695, %v471_v63  ;;  %v472_v2 = vmul.f32 1.442695, %v470_v0 }
 0x2da   :  { %7090 = vpow2.f32 %v474_v1 }
 0x2db   :  { %7092 = vpow2.f32 %v472_v2 }
 0x2df   :  { %v7468_v4 = vpop.eup %7086 }
 0x2e0   :  { %v7089_v5 = vpop.eup %7088  ;;  %v277_v7 = vsel %vm264_vm5, %v7468_v4, 0.0 }
 0x2e1   :  { %278 = vadd.xlane.f32.xlu1 %v277_v7  ;;  %v274_v9 = vsel %vm260_vm6, %v7089_v5, 0.0 }
 0x2e2   :  { %275 = vadd.xlane.f32.xlu0 %v274_v9 }
 0x2e4   :  { %v7473_v10 = vpop.eup %7090 }
 0x2e5   :  { %v7093_v11 = vpop.eup %7092  ;;  %v479_v12 = vsel %vm264_vm5, %v7473_v10, 0.0 }
 0x2e6   :  { %480 = vadd.xlane.f32.xlu1 %v479_v12  ;;  %v476_v13 = vsel %vm260_vm6, %v7093_v11, 0.0 }
 0x2e7   :  { %477 = vadd.xlane.f32.xlu0 %v476_v13 }
 0x2f7   :  { %6947 = vrot.lane.b32.xlu1 %v7414_v19, %s8328_s19 }
 0x2fb   :  { %6952 = vrot.lane.b32.xlu1 %v7414_v19, %s8332_s1 }
 0x2fd   :  { %6942 = vrot.lane.b32.xlu0 %v7414_v19, %s7274_s21 }
 0x2ff   :  { %1022 = vrot.lane.b32.xlu1 %v7416_v20, %s8330_s22 }
 0x301   :  { %1020 = vrot.lane.b32.xlu0 %v7408_v15, %s8330_s22  ;;  %v1309_v15 = vrot.slane %v7416_v20, 1 }
 0x303   :  { %v7502_v21 = vsel %vm1308_vm3, %v1309_v15, %v7495_v18 }
 0x320   :  { %828 = vmax.xlane.f32.xlu0 %v827_v14 }
 0x323   :  { %831 = vmax.xlane.f32.xlu1 %v830_v16 }
 0x334   :  { %6957 = vrot.lane.b32.xlu1 %v7414_v19, %s8326_s23 }
 0x338   :  { %6967 = vrot.lane.b32.xlu1 %v7430_v27, %s8322_s0  ;;  %s8345_s0 = smov 56  }
 0x33c   :  { %1513 = vrot.lane.b32.xlu1 %v7502_v21, %s7267_s28 }
 0x36e   :  { %v279_v23 = vpop.xlane.xlu1 %278 }
 0x36f   :  { %v276_v22 = vpop.xlane.xlu0 %275 }
 0x370   :  { %7094 = vrcp.f32 %v276_v22 }
 0x371   :  { %7096 = vrcp.f32 %v279_v23 }
 0x373   :  { %v481_v24 = vpop.xlane.xlu1 %480 }
 0x374   :  { %v478_v25 = vpop.xlane.xlu0 %477 }
 0x375   :  { %7098 = vrcp.f32 %v478_v25 }
 0x376   :  { %7100 = vrcp.f32 %v481_v24 }
 0x377   :  { %v6948_v26 = vpop.permute.xlu1 %6947 }
 0x378   :  { %v6943_v28 = vpop.permute.xlu0 %6942  ;;  %v6950_v29 = vunpack.i.h.bf16 %v6948_v26  ;;  %v6949_v20 = vunpack.i.l.bf16 %v6948_v26 }
 0x379   :  { %v6945_v30 = vunpack.i.h.bf16 %v6943_v28  ;;  %v6944_v31 = vunpack.i.l.bf16 %v6943_v28 }
 0x37a   :  { %v7095_v33 = vpop.eup %7094  ;;  %v6658_v42 = vpack.c.bf16 %v6950_v29, %v6949_v20 }
 0x37b   :  { %v6646_v35 = vpack.c.bf16 %v6945_v30, %v6944_v31  ;;  %v6953_v36 = vpop.permute.xlu1 %6952  ;;  %v282_v37 = vmul.f32 %v7095_v33, %v7089_v5  ;;  %v7097_v38 = vpop.eup %7096 }
 0x37c   :  { %v6955_v39 = vunpack.i.h.bf16 %v6953_v36  ;;  %v6954_v40 = vunpack.i.l.bf16 %v6953_v36  ;;  %v1021_v41 = vpop.permute.xlu0 %1020  ;;  %v283_v45 = vmul.f32 %v7097_v38, %v7468_v4 }
 0x37d   :  { %6648 = vmatprep.subr.msk.bf16.mxu1 %vm7506_vm9, %v6646_v35  ;;  %6268 = vmatprep.mubr.msk.f32.mxu0 %vm174_vm2, %v1021_v41 }
 0x37e   :  { %v6676_v43 = vpack.c.bf16 %v6955_v39, %v6954_v40  ;;  %6651 = vmatpush3.bf16.msk.msra.mxu1 %vm7506_vm9, %v6646_v35  ;;  %6218 = vmatprep.mubr.msk.f32.mxu1 %vm260_vm6, %v282_v37  ;;  %v7581_v35 = vld [vmem:[%s8305_s3 + $0x10] sm:$0xff] }
 0x37f   :  { %v7099_v44 = vpop.eup %7098  ;;  %6660 = vmatprep.subr.msk.bf16.mxu1 %vm7506_vm9, %v6658_v42  ;;  %v1023_v49 = vpop.permute.xlu1 %1022 }
 0x380   :  { %v7101_v46 = vpop.eup %7100  ;;  %6678 = vmatprep.subr.msk.bf16.mxu0 %vm7439_vm4, %v6676_v43  ;;  %v484_v47 = vmul.f32 %v7099_v44, %v7093_v11 }
 0x381   :  { %6219 = vmatmul.mubr.msk.f32.vlgmr.msra.gmra.mrb[2].mxu1 %vm260_vm6, %v283_v45  ;;  %6681 = vmatpush3.bf16.xpose.msk.msra.mxu0 %vm7439_vm4, %v6676_v43  ;;  %v485_v48 = vmul.f32 %v7101_v46, %v7473_v10 }
 0x382   :  { %6663 = vmatpush3.bf16.msk.msra.mxu1 %vm7506_vm9, %v6658_v42  ;;  %6232 = vmatprep.mubr.msk.f32.mxu1 %vm260_vm6, %v484_v47 }
 0x385   :  { %6233 = vmatmul.mubr.msk.f32.vlgmr.msra.gmra.mrb[4].mxu1 %vm260_vm6, %v485_v48 }
 0x388   :  { %6269 = vmatmul.mubr.msk.f32.vlgmr.msra.gmra.mrb[10].mxu0 %vm174_vm2, %v1023_v49 }
 0x389   :  { %6287 = vmatprep.mubr.msk.f32.mxu0 %vm174_vm2, %v7502_v21 }
 0x3ad   :  { %v829_v50 = vpop.xlane.xlu0 %828 }
 0x3ae   :  { %v833_v51 = vsub.f32 %v7466_v54, %v829_v50  ;;  %v7541_v54 = vld [vmem:[%s8305_s3 + $0x8] sm:$0xff] }
 0x3af   :  { %6235 = vmatprep.subr.mxu1 %v7541_v54 }
 0x3b0   :  { %v835_v52 = vmul.f32 1.442695, %v833_v51  ;;  %v832_v55 = vpop.xlane.xlu1 %831  ;;  %6236 = vmatpush3.msra.mxu1 %v7541_v54 }
 0x3b1   :  { %v834_v56 = vsub.f32 %v7464_v53, %v832_v55  ;;  %v7548_v53 = vld [vmem:[%s8305_s3] sm:$0xff] }
 0x3b2   :  { %7102 = vpow2.f32 %v835_v52  ;;  %6240 = vmatprep.subr.mxu1 %v7548_v53 }
 0x3b3   :  { %v837_v57 = vmul.f32 1.442695, %v834_v56 }
 0x3b4   :  { %v6958_v62 = vpop.permute.xlu1 %6957 }
 0x3b5   :  { %7104 = vpow2.f32 %v837_v57  ;;  %v6960_v13 = vunpack.i.h.bf16 %v6958_v62  ;;  %v6959_v14 = vunpack.i.l.bf16 %v6958_v62 }
 0x3b7   :  { %v6670_v23 = vpack.c.bf16 %v6960_v13, %v6959_v14 }
 0x3b8   :  { %v6968_v1 = vpop.permute.xlu1 %6967 }
 0x3b9   :  { %v6970_v4 = vunpack.i.h.bf16 %v6968_v1  ;;  %v6969_v5 = vunpack.i.l.bf16 %v6968_v1 }
 0x3bb   :  { %v6700_v16 = vpack.c.bf16 %v6970_v4, %v6969_v5 }
 0x3bc   :  { %v7103_v58 = vpop.eup %7102  ;;  %v1514_v29 = vpop.permute.xlu1 %1513 }
 0x3bd   :  { %v839_v59 = vsel %vm260_vm6, %v7103_v58, 0.0 }
 0x3be   :  { %840 = vadd.xlane.f32.xlu0 %v839_v59 }
 0x3bf   :  { %v7105_v60 = vpop.eup %7104 }
 0x3c0   :  { %v842_v61 = vsel %vm264_vm5, %v7105_v60, 0.0 }
 0x3c2   :  { %843 = vadd.xlane.f32.xlu0 %v842_v61 }
 0x3d8   :  { %6962 = vrot.lane.b32.xlu0 %v7430_v27, %s7268_s29 }
 0x3dc   :  { %1515 = vrot.lane.b32.xlu0 %v7495_v18, %s7267_s28 }
 0x44b   :  { %v841_v63 = vpop.xlane.xlu0 %840 }
 0x44c   :  { %7106 = vrcp.f32 %v841_v63 }
 0x44f   :  { %v844_v0 = vpop.xlane.xlu0 %843 }
 0x450   :  { %7108 = vrcp.f32 %v844_v0 }
 0x453   :  { %v6963_v2 = vpop.permute.xlu0 %6962 }
 0x454   :  { %v6965_v7 = vunpack.i.h.bf16 %v6963_v2  ;;  %v6964_v9 = vunpack.i.l.bf16 %v6963_v2  ;;  %v6220_v10 = vpop.f32.mrb[2].mxu1 }
 0x455   :  { %v364_v11 = vpop.f32.mrb[3].mxu1 }
 0x456   :  { %v6688_v12 = vpack.c.bf16 %v6965_v7, %v6964_v9  ;;  %v7107_v28 = vpop.eup %7106 }
 0x457   :  { %v847_v30 = vmul.f32 %v7107_v28, %v7103_v58  ;;  %v1516_v33 = vpop.permute.xlu0 %1515 }
 0x458   :  { %v6234_v17 = vpop.f32.mrb[4].mxu1  ;;  %6690 = vmatprep.subr.msk.bf16.mxu0 %vm7439_vm4, %v6688_v12 }
 0x459   :  { %v565_v15 = vpop.f32.mrb[5].mxu1  ;;  %6693 = vmatpush3.bf16.xpose.msk.msra.mxu0 %vm7439_vm4, %v6688_v12 }
 0x45a   :  { %6237 = vmatprep.mubr.msk.f32.mxu1 %vm174_vm2, %v565_v15  ;;  %6702 = vmatprep.subr.msk.bf16.mxu0 %vm7439_vm4, %v6700_v16  ;;  %v7109_v20 = vpop.eup %7108 }
 0x45b   :  { %6238 = vmatmul.mubr.msk.f32.vlgmr.msra.gmra.mrb[6].mxu1 %vm174_vm2, %v6234_v17  ;;  %v6270_v22 = vpop.f32.mrb[10].mxu0  ;;  %v848_v31 = vmul.f32 %v7109_v20, %v7105_v60 }
 0x45c   :  { %6241 = vmatpush3.msra.mxu1 %v7548_v53  ;;  %6242 = vmatprep.mubr.msk.f32.mxu1 %vm174_vm2, %v364_v11  ;;  %v1102_v24 = vpop.f32.mrb[11].mxu0  ;;  %v1114_v25 = vsel %vm264_vm5, %v6270_v22, -inf }
 0x45d   :  { %6672 = vmatprep.subr.msk.bf16.mxu1 %vm7506_vm9, %v6670_v23  ;;  %1115 = vmax.xlane.f32.xlu0 %v1114_v25  ;;  %v1111_v26 = vsel %vm260_vm6, %v1102_v24, -inf }
 0x45e   :  { %1112 = vmax.xlane.f32.xlu1 %v1111_v26 }
 0x460   :  { %6288 = vmatmul.mubr.msk.f32.vlgmr.msra.gmra.mrb[12].mxu0 %vm174_vm2, %v7495_v18 }
 0x461   :  { %6705 = vmatpush3.bf16.xpose.msk.msra.mxu0 %vm7439_vm4, %v6700_v16  ;;  %6301 = vmatprep.mubr.msk.f32.mxu0 %vm174_vm2, %v1514_v29 }
 0x463   :  { %6243 = vmatmul.mubr.msk.f32.vlgmr.msra.gmra.mrb[6].mxu1 %vm174_vm2, %v6220_v10 }
 0x464   :  { %6675 = vmatpush3.bf16.msk.msra.mxu1 %vm7506_vm9, %v6670_v23  ;;  %6256 = vmatprep.mubr.msk.f32.mxu1 %vm260_vm6, %v847_v30 }
 0x465   :  { %6259 = vmatprep.subr.mxu1 %v7581_v35 }
 0x467   :  { %6257 = vmatmul.mubr.msk.f32.vlgmr.msra.gmra.mrb[8].mxu1 %vm260_vm6, %v848_v31 }
 0x468   :  { %6302 = vmatmul.mubr.msk.f32.vlgmr.msra.gmra.mrb[14].mxu0 %vm174_vm2, %v1516_v33  ;;  %6260 = vmatpush3.msra.mxu1 %v7581_v35 }
 0x4ea   :  { %v1116_v36 = vpop.xlane.xlu0 %1115 }
 0x4eb   :  { %v1118_v37 = vsub.f32 %v6270_v22, %v1116_v36  ;;  %v1113_v38 = vpop.xlane.xlu1 %1112 }
 0x4ec   :  { %v1117_v39 = vsub.f32 %v1102_v24, %v1113_v38 }
 0x4ed   :  { %v1121_v40 = vmul.f32 1.442695, %v1118_v37 }
 0x4ee   :  { %v1119_v41 = vmul.f32 1.442695, %v1117_v39  ;;  %v7622_v39 = vld [vmem:[%s8305_s3 + $0x18] sm:$0xff] }
 0x4ef   :  { %7110 = vpow2.f32 %v1121_v40 }
 0x4f0   :  { %7112 = vpow2.f32 %v1119_v41 }
 0x4f9   :  { %v7111_v42 = vpop.eup %7110 }
 0x4fa   :  { %v7113_v43 = vpop.eup %7112  ;;  %v1126_v44 = vsel %vm264_vm5, %v7111_v42, 0.0 }
 0x4fb   :  { %1127 = vadd.xlane.f32.xlu1 %v1126_v44  ;;  %v1123_v45 = vsel %vm260_vm6, %v7113_v43, 0.0 }
 0x4fc   :  { %1124 = vadd.xlane.f32.xlu0 %v1123_v45 }
 0x50c   :  { %6977 = vrot.lane.b32.xlu1 %v7430_v27, %s7271_s18 }
 0x510   :  { %1876 = vrot.lane.b32.xlu1 %v7502_v21, %s7270_s30 }
 0x512   :  { %6972 = vrot.lane.b32.xlu0 %v7414_v19, %s8324_s25 }
 0x516   :  { %1878 = vrot.lane.b32.xlu0 %v7495_v18, %s7270_s30 }
 0x533   :  { %v6289_v46 = vpop.f32.mrb[12].mxu0 }
 0x534   :  { %v1394_v47 = vpop.f32.mrb[13].mxu0  ;;  %v1406_v48 = vsel %vm264_vm5, %v6289_v46, -inf }
 0x535   :  { %1407 = vmax.xlane.f32.xlu0 %v1406_v48  ;;  %v1403_v49 = vsel %vm260_vm6, %v1394_v47, -inf }
 0x536   :  { %1404 = vmax.xlane.f32.xlu1 %v1403_v49 }
 0x53a   :  { %v6258_v50 = vpop.f32.mrb[8].mxu1 }
 0x53b   :  { %v928_v51 = vpop.f32.mrb[9].mxu1  ;;  %v6303_v52 = vpop.f32.mrb[14].mxu0 }
 0x53c   :  { %6261 = vmatprep.mubr.msk.f32.mxu1 %vm174_vm2, %v928_v51  ;;  %v1595_v55 = vpop.f32.mrb[15].mxu0  ;;  %v1607_v56 = vsel %vm264_vm5, %v6303_v52, -inf }
 0x53d   :  { %1608 = vmax.xlane.f32.xlu1 %v1607_v56  ;;  %6262 = vmatmul.mubr.msk.f32.vlgmr.msra.gmra.mrb[6].mxu1 %vm174_vm2, %v6258_v50  ;;  %v1604_v19 = vsel %vm260_vm6, %v1595_v55, -inf }
 0x53e   :  { %1605 = vmax.xlane.f32.xlu0 %v1604_v19 }
 0x588   :  { %v1128_v57 = vpop.xlane.xlu1 %1127 }
 0x589   :  { %7114 = vrcp.f32 %v1128_v57  ;;  %v1125_v58 = vpop.xlane.xlu0 %1124 }
 0x58a   :  { %7116 = vrcp.f32 %v1125_v58 }
 0x58c   :  { %v6978_v59 = vpop.permute.xlu1 %6977 }
 0x58d   :  { %v6980_v60 = vunpack.i.h.bf16 %v6978_v59  ;;  %v6979_v61 = vunpack.i.l.bf16 %v6978_v59  ;;  %v6973_v62 = vpop.permute.xlu0 %6972 }
 0x58e   :  { %v6975_v63 = vunpack.i.h.bf16 %v6973_v62  ;;  %v6974_v0 = vunpack.i.l.bf16 %v6973_v62 }
 0x58f   :  { %v6712_v1 = vpack.c.bf16 %v6980_v60, %v6979_v61 }
 0x590   :  { %v6682_v2 = vpack.c.bf16 %v6975_v63, %v6974_v0  ;;  %v1877_v4 = vpop.permute.xlu1 %1876 }
 0x591   :  { %6714 = vmatprep.subr.msk.bf16.mxu0 %vm7439_vm4, %v6712_v1  ;;  %6325 = vmatprep.mubr.msk.f32.mxu0 %vm174_vm2, %v1877_v4  ;;  %v1879_v11 = vpop.permute.xlu0 %1878 }
 0x592   :  { %6684 = vmatprep.subr.msk.bf16.mxu1 %vm7506_vm9, %v6682_v2  ;;  %6717 = vmatpush3.bf16.xpose.msk.msra.mxu0 %vm7439_vm4, %v6712_v1 }
 0x593   :  { %v7115_v5 = vpop.eup %7114  ;;  %6687 = vmatpush3.bf16.msk.msra.mxu1 %vm7506_vm9, %v6682_v2 }
 0x594   :  { %v7117_v7 = vpop.eup %7116  ;;  %v1132_v10 = vmul.f32 %v7115_v5, %v7111_v42  ;;  %6278 = vmatprep.subr.mxu1 %v7622_v39 }
 0x595   :  { %v1131_v9 = vmul.f32 %v7117_v7, %v7113_v43 }
 0x597   :  { %6275 = vmatprep.mubr.msk.f32.mxu1 %vm260_vm6, %v1131_v9 }
 0x598   :  { %6276 = vmatmul.mubr.msk.f32.vlgmr.msra.gmra.mrb[10].mxu1 %vm260_vm6, %v1132_v10 }
 0x599   :  { %6326 = vmatmul.mubr.msk.f32.vlgmr.msra.gmra.mrb[16].mxu0 %vm174_vm2, %v1879_v11  ;;  %6279 = vmatpush3.msra.mxu1 %v7622_v39 }
 0x5c2   :  { %v1408_v12 = vpop.xlane.xlu0 %1407 }
 0x5c3   :  { %v1410_v13 = vsub.f32 %v6289_v46, %v1408_v12  ;;  %v1405_v14 = vpop.xlane.xlu1 %1404 }
 0x5c4   :  { %v1409_v16 = vsub.f32 %v1394_v47, %v1405_v14 }
 0x5c5   :  { %v1413_v17 = vmul.f32 1.442695, %v1410_v13 }
 0x5c6   :  { %v1411_v15 = vmul.f32 1.442695, %v1409_v16 }
 0x5c7   :  { %7118 = vpow2.f32 %v1413_v17 }
 0x5c8   :  { %7120 = vpow2.f32 %v1411_v15 }
 0x5ca   :  { %v1609_v23 = vpop.xlane.xlu1 %1608 }
 0x5cb   :  { %v1611_v22 = vsub.f32 %v6303_v52, %v1609_v23  ;;  %v1606_v24 = vpop.xlane.xlu0 %1605 }
 0x5cc   :  { %v1610_v25 = vsub.f32 %v1595_v55, %v1606_v24 }
 0x5cd   :  { %v1614_v26 = vmul.f32 1.442695, %v1611_v22 }
 0x5ce   :  { %v1612_v28 = vmul.f32 1.442695, %v1610_v25 }
 0x5cf   :  { %7122 = vpow2.f32 %v1614_v26 }
 0x5d0   :  { %7124 = vpow2.f32 %v1612_v28 }
 0x5d1   :  { %v7119_v29 = vpop.eup %7118 }
 0x5d2   :  { %v7121_v20 = vpop.eup %7120  ;;  %v1418_v30 = vsel %vm264_vm5, %v7119_v29, 0.0 }
 0x5d3   :  { %1419 = vadd.xlane.f32.xlu1 %v1418_v30  ;;  %v1415_v31 = vsel %vm260_vm6, %v7121_v20, 0.0 }
 0x5d4   :  { %1416 = vadd.xlane.f32.xlu0 %v1415_v31 }
 0x5d9   :  { %v7123_v33 = vpop.eup %7122 }
 0x5da   :  { %v7125_v36 = vpop.eup %7124  ;;  %v1619_v37 = vsel %vm264_vm5, %v7123_v33, 0.0 }
 0x5db   :  { %1620 = vadd.xlane.f32.xlu1 %v1619_v37  ;;  %v1616_v38 = vsel %vm260_vm6, %v7125_v36, 0.0 }
 0x5dc   :  { %1617 = vadd.xlane.f32.xlu0 %v1616_v38 }
 0x5ec   :  { %6987 = vrot.lane.b32.xlu1 %v7430_v27, %s8328_s19  ;;  %s8346_s19 = smov 48  }
 0x5f0   :  { %6992 = vrot.lane.b32.xlu1 %v7430_v27, %s8332_s1 }
 0x5f2   :  { %6982 = vrot.lane.b32.xlu0 %v7430_v27, %s7274_s21 }
 0x5f4   :  { %2162 = vrot.lane.b32.xlu1 %v7495_v18, %s8330_s22 }
 0x5f6   :  { %2160 = vrot.lane.b32.xlu0 %v7502_v21, %s8330_s22 }
 0x660   :  { %v1420_v41 = vpop.xlane.xlu1 %1419 }
 0x661   :  { %v1417_v40 = vpop.xlane.xlu0 %1416 }
 0x662   :  { %7126 = vrcp.f32 %v1417_v40 }
 0x663   :  { %7128 = vrcp.f32 %v1420_v41 }
 0x668   :  { %v1621_v42 = vpop.xlane.xlu1 %1620 }
 0x669   :  { %v1618_v43 = vpop.xlane.xlu0 %1617 }
 0x66a   :  { %7130 = vrcp.f32 %v1618_v43 }
 0x66b   :  { %7132 = vrcp.f32 %v1621_v42  ;;  %v6277_v44 = vpop.f32.mrb[10].mxu1 }
 0x66c   :  { %v7127_v45 = vpop.eup %7126  ;;  %v6988_v46 = vpop.permute.xlu1 %6987 }
 0x66d   :  { %v6327_v47 = vpop.f32.mrb[16].mxu0  ;;  %v6983_v48 = vpop.permute.xlu0 %6982  ;;  %v1423_v18 = vmul.f32 %v7127_v45, %v7121_v20  ;;  %v6990_v51 = vunpack.i.h.bf16 %v6988_v46  ;;  %v6989_v52 = vunpack.i.l.bf16 %v6988_v46 }
 0x66e   :  { %v1212_v49 = vpop.f32.mrb[11].mxu1  ;;  %v1970_v50 = vsel %vm264_vm5, %v6327_v47, -inf  ;;  %v6985_v21 = vunpack.i.h.bf16 %v6983_v48  ;;  %v6984_v55 = vunpack.i.l.bf16 %v6983_v48  ;;  %v1958_v56 = vpop.f32.mrb[17].mxu0 }
 0x66f   :  { %6280 = vmatprep.mubr.msk.f32.mxu1 %vm174_vm2, %v1212_v49  ;;  %1971 = vmax.xlane.f32.xlu1 %v1970_v50  ;;  %v1967_v19 = vsel %vm260_vm6, %v1958_v56, -inf  ;;  %v7129_v59 = vpop.eup %7128  ;;  %v6706_v63 = vpack.c.bf16 %v6990_v51, %v6989_v52 }
 0x670   :  { %6281 = vmatmul.mubr.msk.f32.vlgmr.msra.gmra.mrb[6].mxu1 %vm174_vm2, %v6277_v44  ;;  %v6694_v57 = vpack.c.bf16 %v6985_v21, %v6984_v55  ;;  %1968 = vmax.xlane.f32.xlu0 %v1967_v19  ;;  %v6993_v58 = vpop.permute.xlu1 %6992  ;;  %v1424_v2 = vmul.f32 %v7129_v59, %v7119_v29 }
 0x671   :  { %6294 = vmatprep.mubr.msk.f32.mxu1 %vm260_vm6, %v1423_v18  ;;  %v6995_v60 = vunpack.i.h.bf16 %v6993_v58  ;;  %v6994_v61 = vunpack.i.l.bf16 %v6993_v58  ;;  %v2161_v62 = vpop.permute.xlu0 %2160 }
 0x672   :  { %6696 = vmatprep.subr.msk.bf16.mxu1 %vm7506_vm9, %v6694_v57  ;;  %6344 = vmatprep.mubr.msk.f32.mxu0 %vm174_vm2, %v2161_v62 }
 0x673   :  { %v6724_v0 = vpack.c.bf16 %v6995_v60, %v6994_v61  ;;  %6699 = vmatpush3.bf16.msk.msra.mxu1 %vm7506_vm9, %v6694_v57 }
 0x674   :  { %v7131_v1 = vpop.eup %7130  ;;  %6708 = vmatprep.subr.msk.bf16.mxu1 %vm7506_vm9, %v6706_v63  ;;  %v2163_v9 = vpop.permute.xlu1 %2162 }
 0x675   :  { %v7133_v4 = vpop.eup %7132  ;;  %6726 = vmatprep.subr.msk.bf16.mxu0 %vm7439_vm4, %v6724_v0  ;;  %v1624_v5 = vmul.f32 %v7131_v1, %v7125_v36 }
 0x676   :  { %6295 = vmatmul.mubr.msk.f32.vlgmr.msra.gmra.mrb[12].mxu1 %vm260_vm6, %v1424_v2  ;;  %6729 = vmatpush3.bf16.xpose.msk.msra.mxu0 %vm7439_vm4, %v6724_v0  ;;  %v1625_v7 = vmul.f32 %v7133_v4, %v7123_v33 }
 0x677   :  { %6711 = vmatpush3.bf16.msk.msra.mxu1 %vm7506_vm9, %v6706_v63  ;;  %6308 = vmatprep.mubr.msk.f32.mxu1 %vm260_vm6, %v1624_v5 }
 0x678   :  { %6311 = vmatprep.subr.mxu1 %v7541_v54  ;;  %6736 = vmatprep.subr.bf16.mxu0 %v7264_v3 }
 0x67a   :  { %6309 = vmatmul.mubr.msk.f32.vlgmr.msra.gmra.mrb[14].mxu1 %vm260_vm6, %v1625_v7 }
 0x67b   :  { %6312 = vmatpush3.msra.mxu1 %v7541_v54 }
 0x67c   :  { %6316 = vmatprep.subr.mxu1 %v7548_v53 }
 0x67d   :  { %6345 = vmatmul.mubr.msk.f32.vlgmr.msra.gmra.mrb[18].mxu0 %vm174_vm2, %v2163_v9 }
 0x67e   :  { %6367 = vmatprep.mubr.msk.f32.mxu0 %vm7265_vm0, %v7266_v6 }
 0x680   :  { %6997 = vrot.lane.b32.xlu1 %v7430_v27, %s8326_s23 }
 0x684   :  { %7002 = vrot.lane.b32.xlu1 %v7430_v27, %s8324_s25  ;;  %s8344_s25 = smov 104  }
 0x6fc   :  { %v1972_v10 = vpop.xlane.xlu1 %1971 }
 0x6fd   :  { %v1974_v11 = vsub.f32 %v6327_v47, %v1972_v10  ;;  %v1969_v12 = vpop.xlane.xlu0 %1968 }
 0x6fe   :  { %v1973_v13 = vsub.f32 %v1958_v56, %v1969_v12 }
 0x6ff   :  { %v1977_v14 = vmul.f32 1.442695, %v1974_v11 }
 0x700   :  { %v1975_v54 = vmul.f32 1.442695, %v1973_v13  ;;  %v6998_v24 = vpop.permute.xlu1 %6997  ;;  %v2523_v13 = vld [vmem:[%s8309_s7] sm:$0xff] }
 0x701   :  { %v7000_v28 = vunpack.i.h.bf16 %v6998_v24  ;;  %v6999_v29 = vunpack.i.l.bf16 %v6998_v24  ;;  %v7724_v24 = vld [vmem:[%s8307_s5] ss:$0 sm:$0xff] }
 0x702   :  { %7134 = vpow2.f32 %v1975_v54 }
 0x703   :  { %7136 = vpow2.f32 %v1977_v14  ;;  %v6718_v31 = vpack.c.bf16 %v7000_v28, %v6999_v29  ;;  %v2524_v14 = vld [vmem:[%s8309_s7 + $0x8] sm:$0xff] }
 0x704   :  { %v7003_v42 = vpop.permute.xlu1 %7002  ;;  %v6737_v54 = vpack.c.bf16 %v2524_v14, %v2523_v13 }
 0x705   :  { %v7005_v44 = vunpack.i.h.bf16 %v7003_v42  ;;  %v7004_v45 = vunpack.i.l.bf16 %v7003_v42 }
 0x706   :  { %6738 = vmatpush3.bf16.msra.mxu0 %v6737_v54 }
 0x707   :  { %v6730_v48 = vpack.c.bf16 %v7005_v44, %v7004_v45  ;;  %6739 = vmatprep.subr.bf16.mxu0 %v7264_v3  ;;  %v2633_v44 = vld [vmem:[%s8311_s9 + $0x38] sm:$0xff] }
 0x70c   :  { %v7135_v16 = vpop.eup %7134 }
 0x70d   :  { %v1979_v17 = vsel %vm260_vm6, %v7135_v16, 0.0  ;;  %v7137_v15 = vpop.eup %7136 }
 0x70e   :  { %1980 = vadd.xlane.f32.xlu0 %v1979_v17  ;;  %v1982_v23 = vsel %vm264_vm5, %v7137_v15, 0.0 }
 0x712   :  { %1983 = vadd.xlane.f32.xlu0 %v1982_v23 }
 0x743   :  { %v6282_v22 = vpop.f32.mrb[6].mxu1 }
 0x744   :  { %1306 = vst.msk [vmem:[#allocation2 + $0x8] sm:$0x1] %vm1305_vm10, %v6282_v22  ;;  %v1293_v27 = vpop.f32.mrb[7].mxu1 }
 0x745   :  { %1304 = vst.msk [vmem:[#allocation2] sm:$0xff] %vm71_vm1, %v1293_v27 }
 0x749   :  { %v6296_v25 = vpop.f32.mrb[12].mxu1 }
 0x74a   :  { %v1504_v26 = vpop.f32.mrb[13].mxu1 }
 0x74c   :  { %v2446_v55 = vld [vmem:[#allocation2] sm:$0xff] }
 0x74d   :  { %v6310_v20 = vpop.f32.mrb[14].mxu1  ;;  %v2449_v57 = vadd.f32 %v2446_v55, %v7389_v8 }
 0x74e   :  { %v1705_v30 = vpop.f32.mrb[15].mxu1 }
 0x74f   :  { %6313 = vmatprep.mubr.msk.f32.mxu1 %vm174_vm2, %v1705_v30  ;;  %v2627_v30 = vld [vmem:[%s8311_s9 + $0x8] sm:$0xff] }
 0x750   :  { %6314 = vmatmul.mubr.msk.f32.vlgmr.msra.gmra.mrb[16].mxu1 %vm174_vm2, %v6310_v20  ;;  %v6346_v33 = vpop.f32.mrb[18].mxu0  ;;  %v2626_v20 = vld [vmem:[%s8311_s9] sm:$0xff] }
 0x751   :  { %6317 = vmatpush3.msra.mxu1 %v7548_v53  ;;  %6318 = vmatprep.mubr.msk.f32.mxu1 %vm174_vm2, %v1504_v26  ;;  %v2242_v36 = vpop.f32.mrb[19].mxu0  ;;  %v2254_v38 = vsel %vm264_vm5, %v6346_v33, -inf  ;;  %v7729_v26 = vld [vmem:[%s8308_s6] ss:$0 sm:$0xff] }
 0x752   :  { %6720 = vmatprep.subr.msk.bf16.mxu1 %vm7506_vm9, %v6718_v31  ;;  %v2251_v37 = vsel %vm260_vm6, %v2242_v36, -inf }
 0x753   :  { %2252 = vmax.xlane.f32.xlu0 %v2251_v37  ;;  %v2628_v37 = vld [vmem:[%s8311_s9 + $0x10] sm:$0xff] }
 0x757   :  { %2255 = vmax.xlane.f32.xlu0 %v2254_v38  ;;  %v2629_v38 = vld [vmem:[%s8311_s9 + $0x18] sm:$0xff] }
 0x758   :  { %6319 = vmatmul.mubr.msk.f32.vlgmr.msra.gmra.mrb[16].mxu1 %vm174_vm2, %v6296_v25 }
 0x759   :  { %6723 = vmatpush3.bf16.msk.msra.mxu1 %vm7506_vm9, %v6718_v31 }
 0x75a   :  { %6335 = vmatprep.subr.mxu1 %v7581_v35 }
 0x79b   :  { %v1981_v53 = vpop.xlane.xlu0 %1980 }
 0x79c   :  { %7138 = vrcp.f32 %v1981_v53  ;;  %v6746_v53 = vpack.c.bf16 %v2629_v38, %v2628_v37 }
 0x79f   :  { %v1984_v40 = vpop.xlane.xlu0 %1983 }
 0x7a0   :  { %7140 = vrcp.f32 %v1984_v40  ;;  %v2630_v40 = vld [vmem:[%s8311_s9 + $0x20] sm:$0xff] }
 0x7a6   :  { %v7139_v41 = vpop.eup %7138 }
 0x7a7   :  { %v1987_v43 = vmul.f32 %v7139_v41, %v7135_v16  ;;  %v2525_v16 = vld [vmem:[%s8309_s7 + $0x10] sm:$0xff]  ;;  %v2631_v41 = vld [vmem:[%s8311_s9 + $0x28] sm:$0xff] }
 0x7a8   :  { %v6749_v42 = vpack.c.bf16 %v2631_v41, %v2630_v40 }
 0x7a9   :  { %6332 = vmatprep.mubr.msk.f32.mxu1 %vm260_vm6, %v1987_v43  ;;  %v2632_v43 = vld [vmem:[%s8311_s9 + $0x30] sm:$0xff] }
 0x7aa   :  { %v7141_v46 = vpop.eup %7140  ;;  %v6752_v45 = vpack.c.bf16 %v2633_v44, %v2632_v43 }
 0x7ab   :  { %v1988_v47 = vmul.f32 %v7141_v46, %v7137_v15  ;;  %v7773_v46 = vld [vmem:[%s8310_s8] ss:$0 sm:$0xff] }
 0x7ad   :  { %6333 = vmatmul.mubr.msk.f32.vlgmr.msra.gmra.mrb[18].mxu1 %vm260_vm6, %v1988_v47 }
 0x7ae   :  { %6336 = vmatpush3.msra.mxu1 %v7581_v35  ;;  %v7692_v35 = vld [vmem:[%s8306_s4] ss:$0 sm:$0xff] }
 0x7af   :  { %6732 = vmatprep.subr.msk.bf16.mxu1 %vm7506_vm9, %v6730_v48  ;;  %v2459_v60 = vadd.f32 %v7692_v35, %v2449_v57 }
 0x7b1   :  { %v2462_v61 = vsel %vm71_vm1, %v2459_v60, 0.0 }
 0x7e0   :  { %v2253_v49 = vpop.xlane.xlu0 %2252 }
 0x7e1   :  { %v2257_v50 = vsub.f32 %v2242_v36, %v2253_v49 }
 0x7e3   :  { %v2259_v18 = vmul.f32 1.442695, %v2257_v50 }
 0x7e4   :  { %v2256_v51 = vpop.xlane.xlu0 %2255 }
 0x7e5   :  { %7142 = vpow2.f32 %v2259_v18  ;;  %v2258_v52 = vsub.f32 %v6346_v33, %v2256_v51  ;;  %v6743_v33 = vpack.c.bf16 %v2627_v30, %v2626_v20 }
 0x7e7   :  { %v2261_v21 = vmul.f32 1.442695, %v2258_v52 }
 0x7e9   :  { %7144 = vpow2.f32 %v2261_v21  ;;  %v7238_v21 = vld [vmem:[%s8337_s20 + $0x8] sm:$0xff] }
 0x7ef   :  { %v7143_v56 = vpop.eup %7142 }
 0x7f0   :  { %v2263_v19 = vsel %vm260_vm6, %v7143_v56, 0.0 }
 0x7f1   :  { %2264 = vadd.xlane.f32.xlu0 %v2263_v19 }
 0x7f3   :  { %v7145_v58 = vpop.eup %7144 }
 0x7f4   :  { %v2266_v59 = vsel %vm264_vm5, %v7145_v58, 0.0 }
 0x7f5   :  { %2267 = vadd.xlane.f32.xlu0 %v2266_v59 }
 0x7f9   :  { %2463 = vadd.xlane.f32.xlu0 %v2462_v61  ;;  %v7239_v61 = vld [vmem:[%s8337_s20 + $0x10] sm:$0x3] }
 0x87e   :  { %v2265_v62 = vpop.xlane.xlu0 %2264 }
 0x87f   :  { %7146 = vrcp.f32 %v2265_v62 }
 0x880   :  { %v6334_v63 = vpop.f32.mrb[18].mxu1 }
 0x881   :  { %v2068_v0 = vpop.f32.mrb[19].mxu1 }
 0x882   :  { %v2268_v8 = vpop.xlane.xlu0 %2267  ;;  %6337 = vmatprep.mubr.msk.f32.mxu1 %vm174_vm2, %v2068_v0 }
 0x883   :  { %7148 = vrcp.f32 %v2268_v8  ;;  %6338 = vmatmul.mubr.msk.f32.vlgmr.msra.gmra.mrb[16].mxu1 %vm174_vm2, %v6334_v63 }
 0x884   :  { %6735 = vmatpush3.bf16.msk.msra.mxu1 %vm7506_vm9, %v6730_v48 }
 0x885   :  { %6354 = vmatprep.subr.mxu1 %v7622_v39 }
 0x886   :  { %v2464_v1 = vpop.xlane.xlu0 %2463 }
 0x887   :  { %v2473_v2 = vmul.f32 0.03125, %v2464_v1 }
 0x889   :  { %v7147_v4 = vpop.eup %7146  ;;  %v2476_v5 = vsub.f32 %v2459_v60, %v2473_v2 }
 0x88a   :  { %v2271_v7 = vmul.f32 %v7147_v4, %v7143_v56 }
 0x88b   :  { %v2479_v9 = vmul.f32 %v2476_v5, %v2476_v5 }
 0x88c   :  { %6351 = vmatprep.mubr.msk.f32.mxu1 %vm260_vm6, %v2271_v7 }
 0x88d   :  { %v7149_v10 = vpop.eup %7148  ;;  %v2482_v11 = vsel %vm71_vm1, %v2479_v9, 0.0 }
 0x88e   :  { %v2272_v12 = vmul.f32 %v7149_v10, %v7145_v58  ;;  %2483 = vadd.xlane.f32.xlu0 %v2482_v11  ;;  %v7795_v10 = vld [vmem:[%s8312_s10] ss:$0 sm:$0xff] }
 0x890   :  { %6352 = vmatmul.mubr.msk.f32.vlgmr.msra.gmra.mrb[20].mxu1 %vm260_vm6, %v2272_v12 }
 0x891   :  { %6355 = vmatpush3.msra.mxu1 %v7622_v39  ;;  %v2526_v39 = vld [vmem:[%s8309_s7 + $0x18] sm:$0xff] }
 0x892   :  { %6742 = vmatprep.subr.bf16.mxu1 %v7264_v3  ;;  %v6740_v17 = vpack.c.bf16 %v2526_v39, %v2525_v16 }
 0x894   :  { %6741 = vmatpush3.bf16.msra.mxu0 %v6740_v17 }
 0x895   :  { %6754 = vmatprep.subr.bf16.mxu0 %v7264_v3 }
 0x91b   :  { %v2484_v15 = vpop.xlane.xlu0 %2483 }
 0x91c   :  { %v2491_v23 = vmul.f32 0.03125, %v2484_v15 }
 0x91e   :  { %v2494_v22 = vadd.f32 1e-05, %v2491_v23 }
 0x920   :  { %7150 = vrsqrt.f32 %v2494_v22 }
 0x92a   :  { %v7151_v27 = vpop.eup %7150 }
 0x92b   :  { %v2500_v25 = vmul.f32 %v7151_v27, %v2476_v5 }
 0x92d   :  { %v2510_v28 = vmul.f32 %v7724_v24, %v2500_v25 }
 0x92f   :  { %v7733_v29 = vadd.f32 %v7729_v26, %v2510_v28 }
 0x931   :  { %6368 = vmatmul.mubr.msk.f32.vlgmr.msra.gmra.mrb[20].mxu0 %vm71_vm1, %v7733_v29 }
 0x932   :  { %6370 = vmatprep.mubr.msk.f32.mxu0 %vm7265_vm0, %v7266_v6 }
 0x963   :  { %v6353_v31 = vpop.f32.mrb[20].mxu1 }
 0x964   :  { %v2352_v36 = vpop.f32.mrb[21].mxu1 }
 0x965   :  { %6356 = vmatprep.mubr.msk.f32.mxu1 %vm174_vm2, %v2352_v36 }
 0x966   :  { %6357 = vmatmul.mubr.msk.f32.vlgmr.msra.gmra.mrb[16].mxu1 %vm174_vm2, %v6353_v31 }
 0x967   :  { %6744 = vmatpush3.bf16.msra.mxu1 %v6743_v33  ;;  %6392 = vmatprep.mubr.msk.f32.mxu1 %vm7265_vm0, %v7266_v6 }
 0x968   :  { %6745 = vmatprep.subr.bf16.mxu1 %v7264_v3 }
 0x96b   :  { %6747 = vmatpush3.bf16.msra.mxu1 %v6746_v53 }
 0x96c   :  { %6748 = vmatprep.subr.bf16.mxu1 %v7264_v3 }
 0x96f   :  { %6750 = vmatpush3.bf16.msra.mxu1 %v6749_v42 }
 0x970   :  { %6751 = vmatprep.subr.bf16.mxu1 %v7264_v3 }
 0x973   :  { %6753 = vmatpush3.bf16.msra.mxu1 %v6752_v45 }
 0xa04   :  { %v2609_v47 = vpop.f32.mrb[20].mxu0 }
 0xa05   :  { %v2610_v48 = vadd.f32 %v7773_v46, %v2609_v47  ;;  %v6369_v49 = vpop.f32.mrb[21].mxu0 }
 0xa07   :  { %v2623_v50 = vmax.f32 %v2610_v48, 0.0 }
 0xa09   :  { %6393 = vmatmul.mubr.msk.f32.vlgmr.msra.gmra.mrb[22].mxu1 %vm2641_vm11, %v2623_v50 }
 0xa0a   :  { %6395 = vmatprep.mubr.msk.f32.mxu1 %vm7265_vm0, %v7266_v6 }
 0xa39   :  { %v6358_v18 = vpop.f32.mrb[16].mxu1 }
 0xa3a   :  { %2445 = vst.msk [vmem:[#allocation2 + $0x11] sm:$0x1] %vm1305_vm10, %v6358_v18  ;;  %v2433_v51 = vpop.f32.mrb[17].mxu1 }
 0xa3b   :  { %2444 = vst.msk [vmem:[#allocation2 + $0x9] sm:$0xff] %vm71_vm1, %v2433_v51  ;;  %v5834_v51 = vld [vmem:[%s8336_s26 + $0x28] sm:$0xff] }
 0xa42   :  { %v2447_v52 = vld [vmem:[#allocation2 + $0x8] sm:$0xff]  ;;  %v2448_v58 = vld [vmem:[#allocation2 + $0x10] sm:$0x3] }
 0xa43   :  { %v2450_v55 = vadd.f32 %v7238_v21, %v2447_v52  ;;  %v2451_v62 = vadd.f32 %v7239_v61, %v2448_v58  ;;  %v5835_v21 = vld [vmem:[%s8336_s26 + $0x30] sm:$0xff] }
 0xa45   :  { %v2460_v56 = vadd.f32 %v7692_v35, %v2450_v55  ;;  %v2461_v1 = vadd.f32 %v7692_v35, %v2451_v62  ;;  %v5836_v55 = vld [vmem:[%s8336_s26 + $0x38] sm:$0xff] }
 0xa47   :  { %v2465_v19 = vsel %vm71_vm1, %v2460_v56, 0.0  ;;  %v2469_v4 = vsel %vm2468_vm12, %v2461_v1, 0.0 }
 0xa48   :  { %2466 = vadd.xlane.f32.xlu1 %v2465_v19 }
 0xad5   :  { %v2467_v57 = vpop.xlane.xlu1 %2466 }
 0xad6   :  { %v2474_v59 = vmul.f32 0.03125, %v2467_v57 }
 0xad8   :  { %v2477_v60 = vsub.f32 %v2460_v56, %v2474_v59  ;;  %v6758_v56 = vpack.c.bf16 %v5836_v55, %v5835_v21 }
 0xada   :  { %v2480_v63 = vmul.f32 %v2477_v60, %v2477_v60 }
 0xadc   :  { %v2717_v0 = vpop.f32.mrb[22].mxu1  ;;  %v2485_v8 = vsel %vm71_vm1, %v2480_v63, 0.0 }
 0xadd   :  { %2486 = vadd.xlane.f32.xlu0 %v2485_v8  ;;  %v6394_v2 = vpop.f32.mrb[23].mxu1  ;;  %v2718_v13 = vadd.f32 %v7795_v10, %v2717_v0 }
 0xadf   :  { %v2731_v16 = vadd.f32 %v2718_v13, %v7733_v29 }
 0xae1   :  { %2470 = vadd.xlane.f32.xlu0 %v2469_v4  ;;  %v2734_v17 = vsel %vm71_vm1, %v2731_v16, 0.0 }
 0xb6a   :  { %v2487_v5 = vpop.xlane.xlu0 %2486 }
 0xb6b   :  { %v2492_v7 = vmul.f32 0.03125, %v2487_v5 }
 0xb6d   :  { %v2495_v9 = vadd.f32 1e-05, %v2492_v7  ;;  %v5831_v7 = vld [vmem:[%s8313_s11] ss:$0 sm:$0xff] }
 0xb6e   :  { %v2471_v11 = vpop.xlane.xlu0 %2470 }
 0xb6f   :  { %7152 = vrsqrt.f32 %v2495_v9  ;;  %v2475_v12 = vmul.f32 0.03125, %v2471_v11  ;;  %v5832_v11 = vld [vmem:[%s8314_s12] ss:$0 sm:$0xff] }
 0xb71   :  { %v2478_v35 = vsub.f32 %v2461_v1, %v2475_v12 }
 0xb73   :  { %v2481_v14 = vmul.f32 %v2478_v35, %v2478_v35 }
 0xb75   :  { %v2488_v54 = vsel %vm2468_vm12, %v2481_v14, 0.0 }
 0xb76   :  { %2489 = vadd.xlane.f32.xlu0 %v2488_v54 }
 0xb79   :  { %v7153_v39 = vpop.eup %7152 }
 0xb7a   :  { %2735 = vadd.xlane.f32.xlu0 %v2734_v17  ;;  %v2501_v15 = vmul.f32 %v7153_v39, %v2477_v60 }
 0xb7c   :  { %v2511_v23 = vmul.f32 %v7724_v24, %v2501_v15 }
 0xb7e   :  { %v2521_v22 = vadd.f32 %v7729_v26, %v2511_v23 }
 0xb80   :  { %6371 = vmatmul.mubr.msk.f32.gmra.mrb[22].mxu0 %vm71_vm1, %v2521_v22 }
 0xb81   :  { %6373 = vmatprep.mubr.msk.f32.mxu0 %vm7265_vm0, %v7266_v6 }
 0xc03   :  { %v2490_v27 = vpop.xlane.xlu0 %2489 }
 0xc04   :  { %v2493_v25 = vmul.f32 0.03125, %v2490_v27 }
 0xc06   :  { %v2496_v28 = vadd.f32 1e-05, %v2493_v25 }
 0xc07   :  { %v2736_v41 = vpop.xlane.xlu0 %2735 }
 0xc08   :  { %7154 = vrsqrt.f32 %v2496_v28  ;;  %v2743_v42 = vmul.f32 0.03125, %v2736_v41 }
 0xc0a   :  { %v2746_v44 = vsub.f32 %v2731_v16, %v2743_v42 }
 0xc0c   :  { %v2749_v50 = vmul.f32 %v2746_v44, %v2746_v44 }
 0xc0e   :  { %v2752_v18 = vsel %vm71_vm1, %v2749_v50, 0.0 }
 0xc12   :  { %v7155_v29 = vpop.eup %7154 }
 0xc13   :  { %v2502_v20 = vmul.f32 %v7155_v29, %v2478_v35 }
 0xc15   :  { %v2512_v30 = vmul.f32 %v7724_v24, %v2502_v20 }
 0xc17   :  { %v2522_v31 = vadd.f32 %v7729_v26, %v2512_v30 }
 0xc19   :  { %6374 = vmatmul.mubr.msk.f32.gmra.mrb[24].mxu0 %vm71_vm1, %v2522_v31 }
 0xc1a   :  { %6409 = vmatprep.mubr.msk.f32.mxu0 %vm7265_vm0, %v7266_v6 }
 0xc53   :  { %v2614_v33 = vpop.f32.mrb[22].mxu0 }
 0xc54   :  { %v2615_v36 = vadd.f32 %v7773_v46, %v2614_v33  ;;  %v6372_v37 = vpop.f32.mrb[23].mxu0  ;;  %v5838_v33 = vld [vmem:[%s8304_s2 + $0x1] ss:$0 sm:$0xff]  ;;  %s8342_s2 = smov 88  }
 0xc56   :  { %v2624_v38 = vmax.f32 %v2615_v36, 0.0 }
 0xc58   :  { %6396 = vmatmul.mubr.msk.f32.gmra.mrb[24].mxu1 %vm2641_vm11, %v2624_v38 }
 0xc59   :  { %6398 = vmatprep.mubr.msk.f32.mxu1 %vm7265_vm0, %v7266_v6 }
 0xcec   :  { %v2619_v53 = vpop.f32.mrb[24].mxu0 }
 0xced   :  { %v2620_v24 = vadd.f32 %v7773_v46, %v2619_v53  ;;  %v6375_v40 = vpop.f32.mrb[25].mxu0  ;;  %v5833_v46 = vld [vmem:[%s8336_s26 + $0x20] sm:$0xff]  ;;  %s7279_s26 = smov [#allocation4]  }
 0xcee   :  { %v6755_v52 = vpack.c.bf16 %v5834_v51, %v5833_v46 }
 0xcef   :  { %v2625_v26 = vmax.f32 %v2620_v24, 0.0 }
 0xcf0   :  { %6756 = vmatpush3.bf16.msra.mxu0 %v6755_v52 }
 0xcf1   :  { %6399 = vmatmul.mubr.msk.f32.gmra.mrb[26].mxu1 %vm2641_vm11, %v2625_v26  ;;  %6757 = vmatprep.subr.bf16.mxu0 %v7264_v3 }
 0xcf4   :  { %6759 = vmatpush3.bf16.msra.mxu0 %v6758_v56 }
 0xd2b   :  { %v2722_v43 = vpop.f32.mrb[24].mxu1 }
 0xd2c   :  { %v2723_v45 = vadd.f32 %v7795_v10, %v2722_v43  ;;  %v6397_v47 = vpop.f32.mrb[25].mxu1 }
 0xd2e   :  { %v2732_v48 = vadd.f32 %v2723_v45, %v2521_v22 }
 0xd30   :  { %v2737_v49 = vsel %vm71_vm1, %v2732_v48, 0.0 }
 0xd31   :  { %2738 = vadd.xlane.f32.xlu0 %v2737_v49 }
 0xd35   :  { %2753 = vadd.xlane.f32.xlu0 %v2752_v18 }
 0xdbe   :  { %v2739_v19 = vpop.xlane.xlu0 %2738 }
 0xdbf   :  { %v2744_v57 = vmul.f32 0.03125, %v2739_v19 }
 0xdc1   :  { %v2747_v58 = vsub.f32 %v2732_v48, %v2744_v57 }
 0xdc2   :  { %v2754_v59 = vpop.xlane.xlu0 %2753 }
 0xdc3   :  { %v2761_v60 = vmul.f32 0.03125, %v2754_v59  ;;  %v2750_v61 = vmul.f32 %v2747_v58, %v2747_v58 }
 0xdc4   :  { %v2727_v62 = vpop.f32.mrb[26].mxu1 }
 0xdc5   :  { %v2764_v63 = vadd.f32 1e-05, %v2761_v60  ;;  %v2728_v0 = vadd.f32 %v7795_v10, %v2727_v62  ;;  %v6400_v8 = vpop.f32.mrb[27].mxu1  ;;  %v2755_v1 = vsel %vm71_vm1, %v2750_v61, 0.0 }
 0xdc6   :  { %2756 = vadd.xlane.f32.xlu0 %v2755_v1 }
 0xdc7   :  { %7156 = vrsqrt.f32 %v2764_v63  ;;  %v2733_v2 = vadd.f32 %v2728_v0, %v2522_v31 }
 0xdc9   :  { %v2740_v4 = vsel %vm2468_vm12, %v2733_v2, 0.0 }
 0xdca   :  { %2741 = vadd.xlane.f32.xlu0 %v2740_v4 }
 0xdd1   :  { %v7157_v5 = vpop.eup %7156 }
 0xdd2   :  { %v2770_v9 = vmul.f32 %v7157_v5, %v2746_v44 }
 0xdd4   :  { %v2780_v10 = vmul.f32 %v5831_v7, %v2770_v9 }
 0xdd6   :  { %v7842_v12 = vadd.f32 %v5832_v11, %v2780_v10 }
 0xdd8   :  { %6410 = vmatmul.mubr.msk.f32.vlgmr.msra.gmra.mrb[26].mxu0 %vm71_vm1, %v7842_v12 }
 0xdd9   :  { %6412 = vmatprep.mubr.msk.f32.mxu0 %vm7265_vm0, %v7266_v6 }
 0xe53   :  { %v2757_v13 = vpop.xlane.xlu0 %2756 }
 0xe54   :  { %v2762_v35 = vmul.f32 0.03125, %v2757_v13 }
 0xe56   :  { %v2765_v14 = vadd.f32 1e-05, %v2762_v35 }
 0xe57   :  { %v2742_v54 = vpop.xlane.xlu0 %2741 }
 0xe58   :  { %7158 = vrsqrt.f32 %v2765_v14  ;;  %v2745_v16 = vmul.f32 0.03125, %v2742_v54 }
 0xe5a   :  { %v2748_v39 = vsub.f32 %v2733_v2, %v2745_v16 }
 0xe5c   :  { %v2751_v17 = vmul.f32 %v2748_v39, %v2748_v39 }
 0xe5e   :  { %v2758_v15 = vsel %vm2468_vm12, %v2751_v17, 0.0 }
 0xe5f   :  { %2759 = vadd.xlane.f32.xlu1 %v2758_v15 }
 0xe62   :  { %v7159_v23 = vpop.eup %7158 }
 0xe63   :  { %v2771_v22 = vmul.f32 %v7159_v23, %v2747_v58 }
 0xe65   :  { %v2781_v27 = vmul.f32 %v5831_v7, %v2771_v22 }
 0xe67   :  { %v7849_v25 = vadd.f32 %v5832_v11, %v2781_v27 }
 0xe69   :  { %6413 = vmatmul.mubr.msk.f32.gmra.mrb[28].mxu0 %vm71_vm1, %v7849_v25 }
 0xe6a   :  { %6415 = vmatprep.mubr.msk.f32.mxu0 %vm7265_vm0, %v7266_v6 }
 0xeab   :  { %v2881_v28 = vpop.f32.mrb[26].mxu0 }
 0xeac   :  { %v6411_v29 = vpop.f32.mrb[27].mxu0  ;;  %v2882_v38 = vadd.f32 %v5838_v33, %v2881_v28 }
 0xeae   :  { %v7860_v40 = vmul.f32 0.35355338, %v2882_v38 }
 0xeec   :  { %v2760_v20 = vpop.xlane.xlu1 %2759 }
 0xeed   :  { %v2763_v30 = vmul.f32 0.03125, %v2760_v20 }
 0xeef   :  { %v2766_v31 = vadd.f32 1e-05, %v2763_v30 }
 0xef1   :  { %7160 = vrsqrt.f32 %v2766_v31 }
 0xefb   :  { %v7161_v36 = vpop.eup %7160 }
 0xefc   :  { %v2772_v37 = vmul.f32 %v7161_v36, %v2748_v39 }
 0xefe   :  { %v2782_v53 = vmul.f32 %v5831_v7, %v2772_v37 }
 0xf00   :  { %v7858_v24 = vadd.f32 %v5832_v11, %v2782_v53 }
 0xf02   :  { %6416 = vmatmul.mubr.msk.f32.gmra.mrb[30].mxu0 %vm71_vm1, %v7858_v24 }
 0xf03   :  { %6422 = vmatprep.mubr.msk.f32.mxu0 %vm174_vm2, %v7860_v40 }
 0xf3c   :  { %v2886_v26 = vpop.f32.mrb[28].mxu0 }
 0xf3d   :  { %v2887_v41 = vadd.f32 %v5838_v33, %v2886_v26  ;;  %v6414_v42 = vpop.f32.mrb[29].mxu0 }
 0xf3f   :  { %v7866_v43 = vpack.i.bf16 %v2887_v41, %v2882_v38  ;;  %v7872_v44 = vmul.f32 0.35355338, %v2887_v41  ;;  %v4042_v0 = vrot.slane %v2887_v41, 1 }
 0xf41   :  { %7007 = vrot.lane.b32.xlu0 %v7866_v43, %s7268_s29  ;;  %7012 = vrot.lane.b32.xlu1 %v7866_v43, %s8342_s2 }
 0xf45   :  { %3106 = vrot.lane.b32.xlu0 %v7872_v44, %s7267_s28  ;;  %3104 = vrot.lane.b32.xlu1 %v7860_v40, %s7267_s28 }
 0xf49   :  { %3467 = vrot.lane.b32.xlu0 %v7860_v40, %s7270_s30  ;;  %7017 = vrot.lane.b32.xlu1 %v7866_v43, %s7271_s18 }
 0xf4d   :  { %3469 = vrot.lane.b32.xlu1 %v7872_v44, %s7270_s30 }
 0xfb3   :  { %v7013_v45 = vpop.permute.xlu1 %7012  ;;  %v7008_v47 = vpop.permute.xlu0 %7007 }
 0xfb4   :  { %v7015_v48 = vunpack.i.h.bf16 %v7013_v45  ;;  %v7014_v49 = vunpack.i.l.bf16 %v7013_v45  ;;  %v7010_v50 = vunpack.i.h.bf16 %v7008_v47  ;;  %v7009_v18 = vunpack.i.l.bf16 %v7008_v47 }
 0xfb6   :  { %v6760_v46 = vpack.c.bf16 %v7010_v50, %v7009_v18  ;;  %v6772_v52 = vpack.c.bf16 %v7015_v48, %v7014_v49 }
 0xfb7   :  { %v3105_v51 = vpop.permute.xlu1 %3104  ;;  %v3107_v57 = vpop.permute.xlu0 %3106 }
 0xfb8   :  { %6762 = vmatprep.subr.msk.bf16.mxu0 %vm7439_vm4, %v6760_v46 }
 0xfb9   :  { %6765 = vmatpush3.bf16.xpose.msk.msra.mxu0 %vm7439_vm4, %v6760_v46 }
 0xfba   :  { %6774 = vmatprep.subr.msk.bf16.mxu0 %vm7439_vm4, %v6772_v52 }
 0xfbb   :  { %v7018_v21 = vpop.permute.xlu1 %7017  ;;  %v3468_v58 = vpop.permute.xlu0 %3467 }
 0xfbc   :  { %v7020_v55 = vunpack.i.h.bf16 %v7018_v21  ;;  %v7019_v56 = vunpack.i.l.bf16 %v7018_v21 }
 0xfbe   :  { %v6784_v19 = vpack.c.bf16 %v7020_v55, %v7019_v56 }
 0xfbf   :  { %v3470_v59 = vpop.permute.xlu1 %3469 }
 0xfc0   :  { %6423 = vmatmul.mubr.msk.f32.vlgmr.msra.gmra.mrb[32].mxu0 %vm174_vm2, %v7872_v44 }
 0xfc1   :  { %6777 = vmatpush3.bf16.xpose.msk.msra.mxu0 %vm7439_vm4, %v6772_v52  ;;  %6436 = vmatprep.mubr.msk.f32.mxu0 %vm174_vm2, %v3105_v51 }
 0xfc2   :  { %6786 = vmatprep.subr.msk.bf16.mxu0 %vm7439_vm4, %v6784_v19 }
 0xfc8   :  { %6437 = vmatmul.mubr.msk.f32.vlgmr.msra.gmra.mrb[34].mxu0 %vm174_vm2, %v3107_v57 }
 0xfc9   :  { %6789 = vmatpush3.bf16.xpose.msk.msra.mxu0 %vm7439_vm4, %v6784_v19  ;;  %6460 = vmatprep.mubr.msk.f32.mxu0 %vm174_vm2, %v3468_v58 }
 0xfd0   :  { %6461 = vmatmul.mubr.msk.f32.vlgmr.msra.gmra.mrb[36].mxu0 %vm174_vm2, %v3470_v59 }
 0xfd5   :  { %v2891_v60 = vpop.f32.mrb[30].mxu0 }
 0xfd6   :  { %v7902_v61 = vadd.f32 %v5838_v33, %v2891_v60  ;;  %v6417_v62 = vpop.f32.mrb[31].mxu0 }
 0xfd8   :  { %v4043_v63 = vrot.slane %v7902_v61, 1 }
 0xfda   :  { %v4044_v8 = vsel %vm1308_vm3, %v4042_v0, %v4043_v63 }
 0xfdb   :  { %v7906_v1 = vpack.i.bf16 %v4043_v63, %v4044_v8 }
0x1093   :  { %v6424_v2 = vpop.f32.mrb[32].mxu0 }
0x1094   :  { %v2985_v4 = vpop.f32.mrb[33].mxu0  ;;  %v2997_v5 = vsel %vm264_vm5, %v6424_v2, -inf }
0x1095   :  { %2998 = vmax.xlane.f32.xlu1 %v2997_v5  ;;  %v2994_v7 = vsel %vm260_vm6, %v2985_v4, -inf }
0x1096   :  { %2995 = vmax.xlane.f32.xlu0 %v2994_v7  ;;  %v2897_v7 = vmul.f32 0.35355338, %v7902_v61 }
0x109b   :  { %v6438_v9 = vpop.f32.mrb[34].mxu0 }
0x109c   :  { %v3186_v11 = vpop.f32.mrb[35].mxu0  ;;  %v3198_v13 = vsel %vm264_vm5, %v6438_v9, -inf }
0x109d   :  { %v3195_v10 = vsel %vm260_vm6, %v3186_v11, -inf }
0x109e   :  { %3196 = vmax.xlane.f32.xlu0 %v3195_v10  ;;  %v4038_v10 = vrot.slane %v7872_v44, 1 }
0x10a2   :  { %3199 = vmax.xlane.f32.xlu0 %v3198_v13 }
0x10a3   :  { %v7912_v35 = vpop.f32.mrb[36].mxu0 }
0x10a4   :  { %v7914_v14 = vpop.f32.mrb[37].mxu0  ;;  %v3561_v45 = vsel %vm264_vm5, %v7912_v35, -inf }
0x10a5   :  { %v3558_v42 = vsel %vm260_vm6, %v7914_v14, -inf }
0x1122   :  { %v2999_v54 = vpop.xlane.xlu1 %2998 }
0x1123   :  { %v3001_v16 = vsub.f32 %v6424_v2, %v2999_v54  ;;  %v2996_v39 = vpop.xlane.xlu0 %2995 }
0x1124   :  { %v3000_v17 = vsub.f32 %v2985_v4, %v2996_v39 }
0x1125   :  { %v3004_v15 = vmul.f32 1.442695, %v3001_v16 }
0x1126   :  { %v3002_v23 = vmul.f32 1.442695, %v3000_v17 }
0x1127   :  { %7162 = vpow2.f32 %v3004_v15 }
0x1128   :  { %7164 = vpow2.f32 %v3002_v23 }
0x112b   :  { %v3197_v22 = vpop.xlane.xlu0 %3196 }
0x112c   :  { %v3201_v27 = vsub.f32 %v3186_v11, %v3197_v22  ;;  %v7952_v11 = vrot.slane %v2897_v7, 1 }
0x112e   :  { %v3203_v28 = vmul.f32 1.442695, %v3201_v27  ;;  %v7958_v61 = vsel %vm1308_vm3, %v4038_v10, %v7952_v11 }
0x112f   :  { %v3200_v29 = vpop.xlane.xlu0 %3199 }
0x1130   :  { %7166 = vpow2.f32 %v3203_v28  ;;  %v3202_v20 = vsub.f32 %v6438_v9, %v3200_v29 }
0x1131   :  { %v7163_v30 = vpop.eup %7162 }
0x1132   :  { %v7165_v31 = vpop.eup %7164  ;;  %v3205_v33 = vmul.f32 1.442695, %v3202_v20  ;;  %v3009_v36 = vsel %vm264_vm5, %v7163_v30, 0.0 }
0x1133   :  { %3010 = vadd.xlane.f32.xlu0 %v3009_v36  ;;  %v3006_v37 = vsel %vm260_vm6, %v7165_v31, 0.0 }
0x1134   :  { %7168 = vpow2.f32 %v3205_v33  ;;  %3007 = vadd.xlane.f32.xlu1 %v3006_v37 }
0x113a   :  { %v7167_v38 = vpop.eup %7166 }
0x113b   :  { %v3207_v53 = vsel %vm260_vm6, %v7167_v38, 0.0 }
0x113c   :  { %3208 = vadd.xlane.f32.xlu1 %v3207_v53 }
0x113e   :  { %v7169_v26 = vpop.eup %7168 }
0x113f   :  { %v3210_v41 = vsel %vm264_vm5, %v7169_v26, 0.0 }
0x1140   :  { %3211 = vadd.xlane.f32.xlu0 %v3210_v41 }
0x114d   :  { %7022 = vrot.lane.b32.xlu1 %v7866_v43, %s7274_s21 }
0x1151   :  { %7032 = vrot.lane.b32.xlu1 %v7866_v43, %s8343_s27 }
0x1155   :  { %3751 = vrot.lane.b32.xlu1 %v7860_v40, %s8344_s25 }
0x1156   :  { %7027 = vrot.lane.b32.xlu0 %v7866_v43, %s8345_s0 }
0x115a   :  { %3753 = vrot.lane.b32.xlu0 %v7872_v44, %s8344_s25 }
0x1179   :  { %3559 = vmax.xlane.f32.xlu1 %v3558_v42  ;;  %3562 = vmax.xlane.f32.xlu0 %v3561_v45 }
0x11c0   :  { %v3011_v48 = vpop.xlane.xlu0 %3010 }
0x11c1   :  { %v3008_v47 = vpop.xlane.xlu1 %3007 }
0x11c2   :  { %7170 = vrcp.f32 %v3008_v47 }
0x11c3   :  { %7172 = vrcp.f32 %v3011_v48 }
0x11c9   :  { %v3209_v49 = vpop.xlane.xlu1 %3208 }
0x11ca   :  { %7174 = vrcp.f32 %v3209_v49 }
0x11cc   :  { %v7171_v40 = vpop.eup %7170 }
0x11cd   :  { %v7023_v50 = vpop.permute.xlu1 %7022  ;;  %v3212_v18 = vpop.xlane.xlu0 %3211  ;;  %v3014_v46 = vmul.f32 %v7171_v40, %v7165_v31 }
0x11ce   :  { %v7025_v51 = vunpack.i.h.bf16 %v7023_v50  ;;  %v7024_v52 = vunpack.i.l.bf16 %v7023_v50  ;;  %7176 = vrcp.f32 %v3212_v18  ;;  %v7173_v55 = vpop.eup %7172 }
0x11cf   :  { %6429 = vmatprep.mubr.msk.f32.mxu1 %vm260_vm6, %v3014_v46  ;;  %v3015_v63 = vmul.f32 %v7173_v55, %v7163_v30 }
0x11d0   :  { %v6766_v21 = vpack.c.bf16 %v7025_v51, %v7024_v52 }
0x11d1   :  { %v7033_v56 = vpop.permute.xlu1 %7032  ;;  %v7028_v19 = vpop.permute.xlu0 %7027 }
0x11d2   :  { %v7035_v57 = vunpack.i.h.bf16 %v7033_v56  ;;  %v7034_v58 = vunpack.i.l.bf16 %v7033_v56  ;;  %v7030_v59 = vunpack.i.h.bf16 %v7028_v19  ;;  %v7029_v60 = vunpack.i.l.bf16 %v7028_v19  ;;  %6768 = vmatprep.subr.msk.bf16.mxu1 %vm7506_vm9, %v6766_v21 }
0x11d3   :  { %6771 = vmatpush3.bf16.msk.msra.mxu1 %vm7506_vm9, %v6766_v21 }
0x11d4   :  { %v7175_v62 = vpop.eup %7174  ;;  %v6796_v0 = vpack.c.bf16 %v7035_v57, %v7034_v58  ;;  %v6778_v8 = vpack.c.bf16 %v7030_v59, %v7029_v60  ;;  %v8019_v59 = vld [vmem:[%s8305_s3 + $0x30] sm:$0xff] }
0x11d5   :  { %v3752_v2 = vpop.permute.xlu1 %3751  ;;  %v3215_v4 = vmul.f32 %v7175_v62, %v7167_v38  ;;  %v3754_v13 = vpop.permute.xlu0 %3753 }
0x11d6   :  { %6430 = vmatmul.mubr.msk.f32.vlgmr.msra.gmra.mrb[28].mxu1 %vm260_vm6, %v3015_v63  ;;  %6780 = vmatprep.subr.msk.bf16.mxu1 %vm7506_vm9, %v6778_v8 }
0x11d7   :  { %6798 = vmatprep.subr.msk.bf16.mxu0 %vm7439_vm4, %v6796_v0  ;;  %6479 = vmatprep.mubr.msk.f32.mxu0 %vm174_vm2, %v3752_v2 }
0x11d8   :  { %v7177_v5 = vpop.eup %7176  ;;  %6783 = vmatpush3.bf16.msk.msra.mxu1 %vm7506_vm9, %v6778_v8  ;;  %6443 = vmatprep.mubr.msk.f32.mxu1 %vm260_vm6, %v3215_v4 }
0x11d9   :  { %v3216_v9 = vmul.f32 %v7177_v5, %v7169_v26  ;;  %6801 = vmatpush3.bf16.xpose.msk.msra.mxu0 %vm7439_vm4, %v6796_v0 }
0x11db   :  { %6444 = vmatmul.mubr.msk.f32.vlgmr.msra.gmra.mrb[30].mxu1 %vm260_vm6, %v3216_v9 }
0x11e0   :  { %6480 = vmatmul.mubr.msk.f32.vlgmr.msra.gmra.mrb[38].mxu0 %vm174_vm2, %v3754_v13 }
0x11e1   :  { %6498 = vmatprep.mubr.msk.f32.mxu0 %vm174_vm2, %v7958_v61 }
0x1206   :  { %v3560_v54 = vpop.xlane.xlu1 %3559  ;;  %v3563_v16 = vpop.xlane.xlu0 %3562 }
0x1207   :  { %v3564_v39 = vsub.f32 %v7914_v14, %v3560_v54  ;;  %v3565_v17 = vsub.f32 %v7912_v35, %v3563_v16  ;;  %v7975_v35 = vld [vmem:[%s8305_s3 + $0x28] sm:$0xff]  ;;  %v7985_v14 = vld [vmem:[%s8305_s3 + $0x20] sm:$0xff] }
0x1208   :  { %6446 = vmatprep.subr.mxu1 %v7975_v35 }
0x1209   :  { %v3566_v15 = vmul.f32 1.442695, %v3564_v39  ;;  %v3568_v23 = vmul.f32 1.442695, %v3565_v17  ;;  %6447 = vmatpush3.msra.mxu1 %v7975_v35 }
0x120a   :  { %6451 = vmatprep.subr.mxu1 %v7985_v14 }
0x120b   :  { %7178 = vpow2.f32 %v3566_v15 }
0x120c   :  { %7180 = vpow2.f32 %v3568_v23 }
0x1215   :  { %v7179_v44 = vpop.eup %7178 }
0x1216   :  { %v7181_v22 = vpop.eup %7180  ;;  %v3570_v27 = vsel %vm260_vm6, %v7179_v44, 0.0 }
0x1217   :  { %3571 = vadd.xlane.f32.xlu0 %v3570_v27  ;;  %v3573_v28 = vsel %vm264_vm5, %v7181_v22, 0.0 }
0x1218   :  { %3574 = vadd.xlane.f32.xlu1 %v3573_v28 }
0x1229   :  { %7042 = vrot.lane.b32.xlu1 %v7906_v1, %s7268_s29 }
0x122d   :  { %7047 = vrot.lane.b32.xlu1 %v7906_v1, %s8342_s2  ;;  %7037 = vrot.lane.b32.xlu0 %v7866_v43, %s8346_s19 }
0x1231   :  { %4244 = vrot.lane.b32.xlu1 %v7952_v11, %s7267_s28  ;;  %4242 = vrot.lane.b32.xlu0 %v7958_v61, %s7267_s28  ;;  %s8347_s28 = smov 40  }
0x12a4   :  { %v3572_v29 = vpop.xlane.xlu0 %3571 }
0x12a5   :  { %v3575_v20 = vpop.xlane.xlu1 %3574  ;;  %7182 = vrcp.f32 %v3572_v29 }
0x12a6   :  { %7184 = vrcp.f32 %v3575_v20 }
0x12a8   :  { %v7038_v37 = vpop.permute.xlu0 %7037 }
0x12a9   :  { %v7043_v30 = vpop.permute.xlu1 %7042  ;;  %v6431_v31 = vpop.f32.mrb[28].mxu1  ;;  %v7040_v26 = vunpack.i.h.bf16 %v7038_v37  ;;  %v7039_v41 = vunpack.i.l.bf16 %v7038_v37 }
0x12aa   :  { %v7045_v33 = vunpack.i.h.bf16 %v7043_v30  ;;  %v7044_v36 = vunpack.i.l.bf16 %v7043_v30  ;;  %v3095_v38 = vpop.f32.mrb[29].mxu1 }
0x12ab   :  { %v6790_v50 = vpack.c.bf16 %v7040_v26, %v7039_v41 }
0x12ac   :  { %v6808_v53 = vpack.c.bf16 %v7045_v33, %v7044_v36  ;;  %v4243_v55 = vpop.permute.xlu0 %4242 }
0x12ad   :  { %v7048_v42 = vpop.permute.xlu1 %7047 }
0x12ae   :  { %v7050_v45 = vunpack.i.h.bf16 %v7048_v42  ;;  %v7049_v47 = vunpack.i.l.bf16 %v7048_v42  ;;  %6810 = vmatprep.subr.msk.bf16.mxu0 %vm7439_vm4, %v6808_v53  ;;  %v6445_v48 = vpop.f32.mrb[30].mxu1 }
0x12af   :  { %6813 = vmatpush3.bf16.xpose.msk.msra.mxu0 %vm7439_vm4, %v6808_v53  ;;  %v3296_v49 = vpop.f32.mrb[31].mxu1  ;;  %v7183_v52 = vpop.eup %7182 }
0x12b0   :  { %v6820_v40 = vpack.c.bf16 %v7050_v45, %v7049_v47  ;;  %6448 = vmatprep.mubr.msk.f32.mxu1 %vm174_vm2, %v3296_v49  ;;  %v7185_v56 = vpop.eup %7184  ;;  %v3578_v19 = vmul.f32 %v7183_v52, %v7179_v44 }
0x12b1   :  { %6449 = vmatmul.mubr.msk.f32.vlgmr.msra.gmra.mrb[32].mxu1 %vm174_vm2, %v6445_v48  ;;  %v3579_v57 = vmul.f32 %v7185_v56, %v7181_v22  ;;  %v4245_v58 = vpop.permute.xlu1 %4244 }
0x12b2   :  { %6452 = vmatpush3.msra.mxu1 %v7985_v14  ;;  %6822 = vmatprep.subr.msk.bf16.mxu0 %vm7439_vm4, %v6820_v40 }
0x12b3   :  { %v6481_v18 = vpop.f32.mrb[38].mxu0  ;;  %6453 = vmatprep.mubr.msk.f32.mxu1 %vm174_vm2, %v3095_v38  ;;  %6792 = vmatprep.subr.msk.bf16.mxu1 %vm7506_vm9, %v6790_v50 }
0x12b4   :  { %v3833_v46 = vpop.f32.mrb[39].mxu0  ;;  %v3845_v51 = vsel %vm264_vm5, %v6481_v18, -inf }
0x12b5   :  { %3846 = vmax.xlane.f32.xlu1 %v3845_v51  ;;  %v3842_v21 = vsel %vm260_vm6, %v3833_v46, -inf }
0x12b6   :  { %3843 = vmax.xlane.f32.xlu0 %v3842_v21  ;;  %6499 = vmatmul.mubr.msk.f32.vlgmr.msra.gmra.mrb[40].mxu0 %vm174_vm2, %v7952_v11 }
0x12b7   :  { %6825 = vmatpush3.bf16.xpose.msk.msra.mxu0 %vm7439_vm4, %v6820_v40  ;;  %6512 = vmatprep.mubr.msk.f32.mxu0 %vm174_vm2, %v4243_v55 }
0x12b9   :  { %6454 = vmatmul.mubr.msk.f32.vlgmr.msra.gmra.mrb[32].mxu1 %vm174_vm2, %v6431_v31 }
0x12ba   :  { %6795 = vmatpush3.bf16.msk.msra.mxu1 %vm7506_vm9, %v6790_v50  ;;  %6467 = vmatprep.mubr.msk.f32.mxu1 %vm260_vm6, %v3578_v19 }
0x12bb   :  { %6470 = vmatprep.subr.mxu1 %v8019_v59 }
0x12bd   :  { %6468 = vmatmul.mubr.msk.f32.vlgmr.msra.gmra.mrb[34].mxu1 %vm260_vm6, %v3579_v57 }
0x12be   :  { %6513 = vmatmul.mubr.msk.f32.vlgmr.msra.gmra.mrb[42].mxu0 %vm174_vm2, %v4245_v58  ;;  %6471 = vmatpush3.msra.mxu1 %v8019_v59 }
0x12c6   :  { %7052 = vrot.lane.b32.xlu1 %v7866_v43, %s8347_s28 }
0x12ca   :  { %4605 = vrot.lane.b32.xlu1 %v7958_v61, %s7270_s30 }
0x12ce   :  { %4607 = vrot.lane.b32.xlu1 %v7952_v11, %s7270_s30 }
0x1342   :  { %v3847_v60 = vpop.xlane.xlu1 %3846 }
0x1343   :  { %v3849_v62 = vsub.f32 %v6481_v18, %v3847_v60  ;;  %v3844_v63 = vpop.xlane.xlu0 %3843 }
0x1344   :  { %v3848_v0 = vsub.f32 %v3833_v46, %v3844_v63 }
0x1345   :  { %v3852_v43 = vmul.f32 1.442695, %v3849_v62 }
0x1346   :  { %v3850_v8 = vmul.f32 1.442695, %v3848_v0  ;;  %v7053_v2 = vpop.permute.xlu1 %7052 }
0x1347   :  { %v7055_v4 = vunpack.i.h.bf16 %v7053_v2  ;;  %v7054_v5 = vunpack.i.l.bf16 %v7053_v2 }
0x1348   :  { %7186 = vpow2.f32 %v3850_v8  ;;  %v8058_v8 = vld [vmem:[%s8305_s3 + $0x38] sm:$0xff] }
0x1349   :  { %v6802_v7 = vpack.c.bf16 %v7055_v4, %v7054_v5  ;;  %7188 = vpow2.f32 %v3852_v43 }
0x134a   :  { %v4606_v9 = vpop.permute.xlu1 %4605 }
0x134b   :  { %6804 = vmatprep.subr.msk.bf16.mxu1 %vm7506_vm9, %v6802_v7  ;;  %6536 = vmatprep.mubr.msk.f32.mxu0 %vm174_vm2, %v4606_v9 }
0x134e   :  { %v4608_v45 = vpop.permute.xlu1 %4607 }
0x1352   :  { %v7187_v10 = vpop.eup %7186 }
0x1353   :  { %v3854_v13 = vsel %vm260_vm6, %v7187_v10, 0.0  ;;  %v7189_v54 = vpop.eup %7188 }
0x1354   :  { %3855 = vadd.xlane.f32.xlu0 %v3854_v13  ;;  %v3857_v16 = vsel %vm264_vm5, %v7189_v54, 0.0 }
0x1358   :  { %3858 = vadd.xlane.f32.xlu0 %v3857_v16 }
0x136e   :  { %7057 = vrot.lane.b32.xlu0 %v7906_v1, %s7271_s18 }
0x1389   :  { %v6500_v39 = vpop.f32.mrb[40].mxu0 }
0x138a   :  { %v4123_v17 = vpop.f32.mrb[41].mxu0  ;;  %v4135_v15 = vsel %vm264_vm5, %v6500_v39, -inf }
0x138b   :  { %4136 = vmax.xlane.f32.xlu1 %v4135_v15  ;;  %v4132_v23 = vsel %vm260_vm6, %v4123_v17, -inf }
0x138d   :  { %4133 = vmax.xlane.f32.xlu0 %v4132_v23 }
0x1390   :  { %v6469_v44 = vpop.f32.mrb[34].mxu1 }
0x1391   :  { %v6514_v22 = vpop.f32.mrb[42].mxu0  ;;  %v3659_v27 = vpop.f32.mrb[35].mxu1 }
0x1392   :  { %v4324_v28 = vpop.f32.mrb[43].mxu0  ;;  %6472 = vmatprep.mubr.msk.f32.mxu1 %vm174_vm2, %v3659_v27  ;;  %v4336_v20 = vsel %vm264_vm5, %v6514_v22, -inf }
0x1393   :  { %v4333_v29 = vsel %vm260_vm6, %v4324_v28, -inf  ;;  %6473 = vmatmul.mubr.msk.f32.vlgmr.msra.gmra.mrb[32].mxu1 %vm174_vm2, %v6469_v44 }
0x1394   :  { %4334 = vmax.xlane.f32.xlu0 %v4333_v29  ;;  %6807 = vmatpush3.bf16.msk.msra.mxu1 %vm7506_vm9, %v6802_v7 }
0x1395   :  { %6489 = vmatprep.subr.mxu1 %v8058_v8 }
0x1398   :  { %4337 = vmax.xlane.f32.xlu0 %v4336_v20 }
0x13e1   :  { %v3856_v30 = vpop.xlane.xlu0 %3855 }
0x13e2   :  { %7190 = vrcp.f32 %v3856_v30 }
0x13e5   :  { %v3859_v31 = vpop.xlane.xlu0 %3858 }
0x13e6   :  { %7192 = vrcp.f32 %v3859_v31 }
0x13e9   :  { %v7058_v33 = vpop.permute.xlu0 %7057 }
0x13ea   :  { %v7060_v36 = vunpack.i.h.bf16 %v7058_v33  ;;  %v7059_v37 = vunpack.i.l.bf16 %v7058_v33 }
0x13ec   :  { %v7191_v38 = vpop.eup %7190  ;;  %v6832_v53 = vpack.c.bf16 %v7060_v36, %v7059_v37 }
0x13ed   :  { %v3862_v26 = vmul.f32 %v7191_v38, %v7187_v10 }
0x13ee   :  { %6834 = vmatprep.subr.msk.bf16.mxu0 %vm7439_vm4, %v6832_v53 }
0x13ef   :  { %6486 = vmatprep.mubr.msk.f32.mxu1 %vm260_vm6, %v3862_v26  ;;  %6837 = vmatpush3.bf16.xpose.msk.msra.mxu0 %vm7439_vm4, %v6832_v53 }
0x13f0   :  { %v7193_v41 = vpop.eup %7192 }
0x13f1   :  { %v3863_v42 = vmul.f32 %v7193_v41, %v7189_v54 }
0x13f3   :  { %6487 = vmatmul.mubr.msk.f32.vlgmr.msra.gmra.mrb[36].mxu1 %vm260_vm6, %v3863_v42 }
0x13f4   :  { %6490 = vmatpush3.msra.mxu1 %v8058_v8 }
0x13f6   :  { %6537 = vmatmul.mubr.msk.f32.vlgmr.msra.gmra.mrb[44].mxu0 %vm174_vm2, %v4608_v45 }
0x1418   :  { %v4137_v47 = vpop.xlane.xlu1 %4136 }
0x1419   :  { %v4139_v48 = vsub.f32 %v6500_v39, %v4137_v47 }
0x141a   :  { %v4134_v49 = vpop.xlane.xlu0 %4133 }
0x141b   :  { %v4142_v40 = vmul.f32 1.442695, %v4139_v48  ;;  %v4138_v50 = vsub.f32 %v4123_v17, %v4134_v49 }
0x141d   :  { %7194 = vpow2.f32 %v4142_v40  ;;  %v4140_v18 = vmul.f32 1.442695, %v4138_v50 }
0x141f   :  { %7196 = vpow2.f32 %v4140_v18 }
0x1421   :  { %v4335_v46 = vpop.xlane.xlu0 %4334 }
0x1422   :  { %v4339_v51 = vsub.f32 %v4324_v28, %v4335_v46 }
0x1424   :  { %v4341_v52 = vmul.f32 1.442695, %v4339_v51 }
0x1425   :  { %v4338_v21 = vpop.xlane.xlu0 %4337 }
0x1426   :  { %7198 = vpow2.f32 %v4341_v52  ;;  %v4340_v55 = vsub.f32 %v6514_v22, %v4338_v21 }
0x1427   :  { %v7195_v56 = vpop.eup %7194 }
0x1428   :  { %v4343_v19 = vmul.f32 1.442695, %v4340_v55  ;;  %v4147_v57 = vsel %vm264_vm5, %v7195_v56, 0.0 }
0x1429   :  { %v7197_v58 = vpop.eup %7196  ;;  %4148 = vadd.xlane.f32.xlu0 %v4147_v57 }
0x142a   :  { %7200 = vpow2.f32 %v4343_v19  ;;  %v4144_v60 = vsel %vm260_vm6, %v7197_v58, 0.0 }
0x142b   :  { %4145 = vadd.xlane.f32.xlu1 %v4144_v60  ;;  %v8107_v60 = vld [vmem:[%s8306_s4 + $0x1] ss:$0 sm:$0xff] }
0x1430   :  { %v7199_v62 = vpop.eup %7198 }
0x1431   :  { %v4345_v63 = vsel %vm260_vm6, %v7199_v62, 0.0 }
0x1432   :  { %4346 = vadd.xlane.f32.xlu1 %v4345_v63 }
0x1434   :  { %v7201_v0 = vpop.eup %7200 }
0x1435   :  { %v4348_v43 = vsel %vm264_vm5, %v7201_v0, 0.0 }
0x1436   :  { %4349 = vadd.xlane.f32.xlu0 %v4348_v43 }
0x1443   :  { %7062 = vrot.lane.b32.xlu1 %v7906_v1, %s7274_s21 }
0x1447   :  { %7072 = vrot.lane.b32.xlu1 %v7906_v1, %s8343_s27 }
0x144b   :  { %4889 = vrot.lane.b32.xlu1 %v7958_v61, %s8344_s25 }
0x144c   :  { %7067 = vrot.lane.b32.xlu0 %v7906_v1, %s8345_s0 }
0x1450   :  { %4891 = vrot.lane.b32.xlu0 %v7952_v11, %s8344_s25 }
0x14b6   :  { %v4149_v4 = vpop.xlane.xlu0 %4148 }
0x14b8   :  { %v4146_v2 = vpop.xlane.xlu1 %4145 }
0x14b9   :  { %7202 = vrcp.f32 %v4146_v2 }
0x14ba   :  { %7204 = vrcp.f32 %v4149_v4 }
0x14bf   :  { %v4347_v5 = vpop.xlane.xlu1 %4346 }
0x14c0   :  { %7206 = vrcp.f32 %v4347_v5 }
0x14c3   :  { %v7063_v7 = vpop.permute.xlu1 %7062  ;;  %v4350_v9 = vpop.xlane.xlu0 %4349 }
0x14c4   :  { %v7065_v10 = vunpack.i.h.bf16 %v7063_v7  ;;  %v7064_v13 = vunpack.i.l.bf16 %v7063_v7  ;;  %7208 = vrcp.f32 %v4350_v9  ;;  %v7203_v54 = vpop.eup %7202 }
0x14c5   :  { %v7205_v15 = vpop.eup %7204  ;;  %v4152_v22 = vmul.f32 %v7203_v54, %v7197_v58 }
0x14c6   :  { %v6814_v16 = vpack.c.bf16 %v7065_v10, %v7064_v13  ;;  %v6488_v61 = vpop.f32.mrb[36].mxu1  ;;  %v4153_v36 = vmul.f32 %v7205_v15, %v7195_v56 }
0x14c7   :  { %v3943_v39 = vpop.f32.mrb[37].mxu1  ;;  %v7073_v17 = vpop.permute.xlu1 %7072 }
0x14c8   :  { %v7075_v23 = vunpack.i.h.bf16 %v7073_v17  ;;  %v7074_v44 = vunpack.i.l.bf16 %v7073_v17  ;;  %v7068_v11 = vpop.permute.xlu0 %7067  ;;  %6491 = vmatprep.mubr.msk.f32.mxu1 %vm174_vm2, %v3943_v39  ;;  %6816 = vmatprep.subr.msk.bf16.mxu1 %vm7506_vm9, %v6814_v16 }
0x14c9   :  { %v7070_v27 = vunpack.i.h.bf16 %v7068_v11  ;;  %v7069_v28 = vunpack.i.l.bf16 %v7068_v11  ;;  %6492 = vmatmul.mubr.msk.f32.vlgmr.msra.gmra.mrb[32].mxu1 %vm174_vm2, %v6488_v61  ;;  %v6538_v29 = vpop.f32.mrb[44].mxu0 }
0x14ca   :  { %v7207_v20 = vpop.eup %7206  ;;  %v6844_v30 = vpack.c.bf16 %v7075_v23, %v7074_v44  ;;  %6819 = vmatpush3.bf16.msk.msra.mxu1 %vm7506_vm9, %v6814_v16  ;;  %6505 = vmatprep.mubr.msk.f32.mxu1 %vm260_vm6, %v4152_v22  ;;  %v4687_v31 = vpop.f32.mrb[45].mxu0  ;;  %v4699_v33 = vsel %vm264_vm5, %v6538_v29, -inf }
0x14cb   :  { %v6826_v37 = vpack.c.bf16 %v7070_v27, %v7069_v28  ;;  %4700 = vmax.xlane.f32.xlu0 %v4699_v33  ;;  %v4890_v38 = vpop.permute.xlu1 %4889  ;;  %v4696_v53 = vsel %vm260_vm6, %v4687_v31, -inf  ;;  %v4353_v26 = vmul.f32 %v7207_v20, %v7199_v62 }
0x14cc   :  { %4697 = vmax.xlane.f32.xlu1 %v4696_v53  ;;  %6846 = vmatprep.subr.msk.bf16.mxu0 %vm7439_vm4, %v6844_v30  ;;  %v4892_v45 = vpop.permute.xlu0 %4891 }
0x14cd   :  { %6506 = vmatmul.mubr.msk.f32.vlgmr.msra.gmra.mrb[38].mxu1 %vm260_vm6, %v4153_v36  ;;  %6828 = vmatprep.subr.msk.bf16.mxu1 %vm7506_vm9, %v6826_v37 }
0x14ce   :  { %v7209_v41 = vpop.eup %7208  ;;  %6555 = vmatprep.mubr.msk.f32.mxu0 %vm174_vm2, %v4890_v38  ;;  %6831 = vmatpush3.bf16.msk.msra.mxu1 %vm7506_vm9, %v6826_v37 }
0x14cf   :  { %v4354_v42 = vmul.f32 %v7209_v41, %v7201_v0  ;;  %6519 = vmatprep.mubr.msk.f32.mxu1 %vm260_vm6, %v4353_v26  ;;  %6849 = vmatpush3.bf16.xpose.msk.msra.mxu0 %vm7439_vm4, %v6844_v30 }
0x14d0   :  { %6522 = vmatprep.subr.mxu1 %v7975_v35  ;;  %6856 = vmatprep.subr.bf16.mxu0 %v7264_v3 }
0x14d1   :  { %6520 = vmatmul.mubr.msk.f32.vlgmr.msra.gmra.mrb[40].mxu1 %vm260_vm6, %v4354_v42 }
0x14d2   :  { %6523 = vmatpush3.msra.mxu1 %v7975_v35 }
0x14d3   :  { %6527 = vmatprep.subr.mxu1 %v7985_v14 }
0x14d6   :  { %6556 = vmatmul.mubr.msk.f32.vlgmr.msra.gmra.mrb[46].mxu0 %vm174_vm2, %v4892_v45 }
0x14d7   :  { %6578 = vmatprep.mubr.msk.f32.mxu0 %vm7265_vm0, %v7266_v6 }
0x1558   :  { %v4701_v47 = vpop.xlane.xlu0 %4700 }
0x1559   :  { %v4703_v48 = vsub.f32 %v6538_v29, %v4701_v47  ;;  %v4698_v32 = vpop.xlane.xlu1 %4697 }
0x155a   :  { %v4702_v49 = vsub.f32 %v4687_v31, %v4698_v32 }
0x155b   :  { %v4706_v40 = vmul.f32 1.442695, %v4703_v48 }
0x155c   :  { %v4704_v50 = vmul.f32 1.442695, %v4702_v49 }
0x155d   :  { %7210 = vpow2.f32 %v4706_v40 }
0x155e   :  { %7212 = vpow2.f32 %v4704_v50 }
0x1567   :  { %v7211_v18 = vpop.eup %7210 }
0x1568   :  { %v7213_v46 = vpop.eup %7212  ;;  %v4711_v35 = vsel %vm264_vm5, %v7211_v18, 0.0 }
0x1569   :  { %4712 = vadd.xlane.f32.xlu1 %v4711_v35  ;;  %v4708_v51 = vsel %vm260_vm6, %v7213_v46, 0.0 }
0x156a   :  { %4709 = vadd.xlane.f32.xlu0 %v4708_v51 }
0x1580   :  { %7077 = vrot.lane.b32.xlu0 %v7906_v1, %s8346_s19 }
0x159c   :  { %v6493_v52 = vpop.f32.mrb[32].mxu1 }
0x159d   :  { %4036 = vst.msk [vmem:[#allocation2 + $0x8] sm:$0x1] %vm1305_vm10, %v6493_v52  ;;  %v4024_v21 = vpop.f32.mrb[33].mxu1 }
0x159e   :  { %4035 = vst.msk [vmem:[#allocation2] sm:$0xff] %vm71_vm1, %v4024_v21 }
0x15a0   :  { %v6507_v55 = vpop.f32.mrb[38].mxu1 }
0x15a1   :  { %v4233_v56 = vpop.f32.mrb[39].mxu1 }
0x15a4   :  { %v6521_v19 = vpop.f32.mrb[40].mxu1 }
0x15a5   :  { %v4434_v57 = vpop.f32.mrb[41].mxu1  ;;  %v5175_v58 = vld [vmem:[#allocation2] sm:$0xff] }
0x15a6   :  { %6524 = vmatprep.mubr.msk.f32.mxu1 %vm174_vm2, %v4434_v57  ;;  %v5178_v62 = vadd.f32 %v5175_v58, %v7842_v12  ;;  %v5926_v57 = vld [vmem:[%s8309_s7 + $0x30] sm:$0xff]  ;;  %v5927_v58 = vld [vmem:[%s8309_s7 + $0x38] sm:$0xff] }
0x15a7   :  { %6525 = vmatmul.mubr.msk.f32.vlgmr.msra.gmra.mrb[42].mxu1 %vm174_vm2, %v6521_v19 }
0x15a8   :  { %6529 = vmatprep.mubr.msk.f32.mxu1 %vm174_vm2, %v4233_v56  ;;  %v8114_v63 = vadd.f32 %v8107_v60, %v5178_v62  ;;  %6528 = vmatpush3.msra.mxu1 %v7985_v14 }
0x15a9   :  { %v6557_v0 = vpop.f32.mrb[46].mxu0 }
0x15aa   :  { %v4971_v43 = vpop.f32.mrb[47].mxu0  ;;  %v5192_v2 = vsel %vm71_vm1, %v8114_v63, 0.0  ;;  %v4983_v12 = vsel %vm264_vm5, %v6557_v0, -inf }
0x15ab   :  { %v4980_v4 = vsel %vm260_vm6, %v4971_v43, -inf  ;;  %5193 = vadd.xlane.f32.xlu0 %v5192_v2 }
0x15ac   :  { %4981 = vmax.xlane.f32.xlu1 %v4980_v4 }
0x15af   :  { %6530 = vmatmul.mubr.msk.f32.vlgmr.msra.gmra.mrb[42].mxu1 %vm174_vm2, %v6507_v55 }
0x15b0   :  { %4984 = vmax.xlane.f32.xlu1 %v4983_v12 }
0x15f6   :  { %v4713_v5 = vpop.xlane.xlu1 %4712 }
0x15f7   :  { %7214 = vrcp.f32 %v4713_v5  ;;  %v4710_v7 = vpop.xlane.xlu0 %4709 }
0x15f8   :  { %7216 = vrcp.f32 %v4710_v7 }
0x15fb   :  { %v7078_v9 = vpop.permute.xlu0 %7077 }
0x15fc   :  { %v7080_v14 = vunpack.i.h.bf16 %v7078_v9  ;;  %v7079_v10 = vunpack.i.l.bf16 %v7078_v9 }
0x15fe   :  { %v6838_v13 = vpack.c.bf16 %v7080_v14, %v7079_v10 }
0x1600   :  { %6840 = vmatprep.subr.msk.bf16.mxu1 %vm7506_vm9, %v6838_v13 }
0x1601   :  { %v7215_v54 = vpop.eup %7214  ;;  %6843 = vmatpush3.bf16.msk.msra.mxu1 %vm7506_vm9, %v6838_v13 }
0x1602   :  { %v7217_v16 = vpop.eup %7216  ;;  %6546 = vmatprep.subr.mxu1 %v8019_v59  ;;  %v4717_v39 = vmul.f32 %v7215_v54, %v7211_v18 }
0x1603   :  { %v4716_v61 = vmul.f32 %v7217_v16, %v7213_v46  ;;  %v5921_v16 = vld [vmem:[%s8307_s5 + $0x1] ss:$0 sm:$0xff] }
0x1605   :  { %6543 = vmatprep.mubr.msk.f32.mxu1 %vm260_vm6, %v4716_v61 }
0x1606   :  { %6544 = vmatmul.mubr.msk.f32.vlgmr.msra.gmra.mrb[44].mxu1 %vm260_vm6, %v4717_v39  ;;  %v5923_v39 = vld [vmem:[%s8308_s6 + $0x1] ss:$0 sm:$0xff] }
0x1607   :  { %6547 = vmatpush3.msra.mxu1 %v8019_v59 }
0x1638   :  { %v5194_v32 = vpop.xlane.xlu0 %5193 }
0x1639   :  { %v4982_v17 = vpop.xlane.xlu1 %4981  ;;  %v5201_v49 = vmul.f32 0.03125, %v5194_v32 }
0x163a   :  { %v4986_v15 = vsub.f32 %v4971_v43, %v4982_v17 }
0x163b   :  { %v5204_v50 = vsub.f32 %v8114_v63, %v5201_v49 }
0x163c   :  { %v4988_v11 = vmul.f32 1.442695, %v4986_v15 }
0x163d   :  { %v4985_v23 = vpop.xlane.xlu1 %4984  ;;  %v5207_v55 = vmul.f32 %v5204_v50, %v5204_v50 }
0x163e   :  { %v4987_v44 = vsub.f32 %v6557_v0, %v4985_v23  ;;  %v5933_v23 = vld [vmem:[%s8311_s9 + $0x40] sm:$0xff] }
0x163f   :  { %v5210_v56 = vsel %vm71_vm1, %v5207_v55, 0.0 }
0x1640   :  { %v4990_v22 = vmul.f32 1.442695, %v4987_v44  ;;  %v5934_v44 = vld [vmem:[%s8311_s9 + $0x48] sm:$0xff] }
0x1642   :  { %7218 = vpow2.f32 %v4990_v22  ;;  %v6863_v22 = vpack.c.bf16 %v5934_v44, %v5933_v23 }
0x1643   :  { %7220 = vpow2.f32 %v4988_v11  ;;  %v5935_v11 = vld [vmem:[%s8311_s9 + $0x50] sm:$0xff] }
0x164c   :  { %v7219_v27 = vpop.eup %7218 }
0x164d   :  { %v4995_v28 = vsel %vm264_vm5, %v7219_v27, 0.0  ;;  %v7221_v29 = vpop.eup %7220 }
0x164e   :  { %4996 = vadd.xlane.f32.xlu1 %v4995_v28  ;;  %v4992_v20 = vsel %vm260_vm6, %v7221_v29, 0.0 }
0x1652   :  { %4993 = vadd.xlane.f32.xlu1 %v4992_v20  ;;  %v5938_v20 = vld [vmem:[%s8311_s9 + $0x68] sm:$0xff] }
0x1663   :  { %7082 = vrot.lane.b32.xlu1 %v7906_v1, %s8347_s28 }
0x16d9   :  { %v6545_v59 = vpop.f32.mrb[44].mxu1 }
0x16da   :  { %v4797_v30 = vpop.f32.mrb[45].mxu1 }
0x16db   :  { %v4997_v31 = vpop.xlane.xlu1 %4996  ;;  %6548 = vmatprep.mubr.msk.f32.mxu1 %vm174_vm2, %v4797_v30  ;;  %v5939_v30 = vld [vmem:[%s8311_s9 + $0x70] sm:$0xff] }
0x16dc   :  { %6549 = vmatmul.mubr.msk.f32.vlgmr.msra.gmra.mrb[42].mxu1 %vm174_vm2, %v6545_v59  ;;  %7222 = vrcp.f32 %v4997_v31  ;;  %v5940_v31 = vld [vmem:[%s8311_s9 + $0x78] sm:$0xff] }
0x16df   :  { %v4994_v33 = vpop.xlane.xlu1 %4993 }
0x16e0   :  { %7224 = vrcp.f32 %v4994_v33  ;;  %v6872_v33 = vpack.c.bf16 %v5940_v31, %v5939_v30  ;;  %v5560_v30 = vld [vmem:[%s8315_s13 + $0x8] sm:$0xff] }
0x16e3   :  { %v7083_v36 = vpop.permute.xlu1 %7082 }
0x16e4   :  { %v7085_v37 = vunpack.i.h.bf16 %v7083_v36  ;;  %v7084_v38 = vunpack.i.l.bf16 %v7083_v36 }
0x16e6   :  { %v6850_v53 = vpack.c.bf16 %v7085_v37, %v7084_v38  ;;  %v7223_v26 = vpop.eup %7222 }
0x16e7   :  { %v5001_v42 = vmul.f32 %v7223_v26, %v7219_v27  ;;  %v5936_v27 = vld [vmem:[%s8311_s9 + $0x58] sm:$0xff] }
0x16e8   :  { %6852 = vmatprep.subr.msk.bf16.mxu1 %vm7506_vm9, %v6850_v53  ;;  %v6866_v28 = vpack.c.bf16 %v5936_v27, %v5935_v11 }
0x16e9   :  { %6855 = vmatpush3.bf16.msk.msra.mxu1 %vm7506_vm9, %v6850_v53 }
0x16ea   :  { %v7225_v1 = vpop.eup %7224  ;;  %6565 = vmatprep.subr.mxu1 %v8058_v8 }
0x16eb   :  { %v5000_v41 = vmul.f32 %v7225_v1, %v7221_v29  ;;  %v5937_v29 = vld [vmem:[%s8311_s9 + $0x60] sm:$0xff] }
0x16ec   :  { %v6869_v59 = vpack.c.bf16 %v5938_v20, %v5937_v29 }
0x16ed   :  { %6562 = vmatprep.mubr.msk.f32.mxu1 %vm260_vm6, %v5000_v41 }
0x16ee   :  { %6563 = vmatmul.mubr.msk.f32.vlgmr.msra.gmra.mrb[46].mxu1 %vm260_vm6, %v5001_v42 }
0x16ef   :  { %6566 = vmatpush3.msra.mxu1 %v8058_v8 }
0x16f0   :  { %6862 = vmatprep.subr.bf16.mxu1 %v7264_v3 }
0x17c1   :  { %v6564_v45 = vpop.f32.mrb[46].mxu1 }
0x17c2   :  { %v5081_v47 = vpop.f32.mrb[47].mxu1 }
0x17c3   :  { %6567 = vmatprep.mubr.msk.f32.mxu1 %vm174_vm2, %v5081_v47 }
0x17c4   :  { %6568 = vmatmul.mubr.msk.f32.vlgmr.msra.gmra.mrb[42].mxu1 %vm174_vm2, %v6564_v45 }
0x17c5   :  { %6603 = vmatprep.mubr.msk.f32.mxu1 %vm7265_vm0, %v7266_v6  ;;  %6864 = vmatpush3.bf16.msra.mxu1 %v6863_v22 }
0x17c6   :  { %6865 = vmatprep.subr.bf16.mxu1 %v7264_v3 }
0x17c9   :  { %6867 = vmatpush3.bf16.msra.mxu1 %v6866_v28 }
0x17ca   :  { %6868 = vmatprep.subr.bf16.mxu1 %v7264_v3 }
0x17cd   :  { %6870 = vmatpush3.bf16.msra.mxu1 %v6869_v59  ;;  %v5559_v59 = vld [vmem:[%s8315_s13] sm:$0xff] }
0x17ce   :  { %6871 = vmatprep.subr.bf16.mxu1 %v7264_v3  ;;  %v6875_v31 = vpack.c.bf16 %v5560_v30, %v5559_v59 }
0x17d1   :  { %6873 = vmatpush3.bf16.msra.mxu1 %v6872_v33  ;;  %v5561_v33 = vld [vmem:[%s8315_s13 + $0x10] sm:$0xff] }
0x1897   :  { %v6569_v34 = vpop.f32.mrb[42].mxu1 }
0x1898   :  { %5174 = vst.msk [vmem:[#allocation2 + $0x11] sm:$0x1] %vm1305_vm10, %v6569_v34  ;;  %v5162_v48 = vpop.f32.mrb[43].mxu1 }
0x1899   :  { %5173 = vst.msk [vmem:[#allocation2 + $0x9] sm:$0xff] %vm71_vm1, %v5162_v48 }
0x18a0   :  { %v5176_v8 = vld [vmem:[#allocation2 + $0x8] sm:$0xff]  ;;  %v5177_v40 = vld [vmem:[#allocation2 + $0x10] sm:$0x3] }
0x18a1   :  { %v5179_v18 = vadd.f32 %v5176_v8, %v7849_v25  ;;  %v5180_v46 = vadd.f32 %v5177_v40, %v7858_v24  ;;  %v5924_v25 = vld [vmem:[%s8309_s7 + $0x20] sm:$0xff]  ;;  %v5925_v24 = vld [vmem:[%s8309_s7 + $0x28] sm:$0xff] }
0x18a2   :  { %v6857_v19 = vpack.c.bf16 %v5925_v24, %v5924_v25  ;;  %v5929_v8 = vld [vmem:[%s8310_s8 + $0x1] ss:$0 sm:$0xff]  ;;  %s5736_s8 = sshll.u32 %s7279_s26, 4  ;;  %s5737_s8 = int_to_ptr.vmem [resolvable:$true] %s5736_s8 }
0x18a3   :  { %v5190_v35 = vadd.f32 %v8107_v60, %v5179_v18  ;;  %v5191_v51 = vadd.f32 %v8107_v60, %v5180_v46  ;;  %v6860_v60 = vpack.c.bf16 %v5927_v58, %v5926_v57  ;;  %v5942_v58 = vld [vmem:[%s8312_s10 + $0x1] ss:$0 sm:$0xff]  ;;  %p7245_p1 = scmp.lt.s32.totalorder %s5737_s8, %s5737_s8 }
0x18a4   :  { %6858 = vmatpush3.bf16.msra.mxu0 %v6857_v19 }
0x18a5   :  { %v5195_v52 = vsel %vm71_vm1, %v5190_v35, 0.0  ;;  %v5198_v21 = vsel %vm2468_vm12, %v5191_v51, 0.0  ;;  %6859 = vmatprep.subr.bf16.mxu0 %v7264_v3 }
0x18a6   :  { %5196 = vadd.xlane.f32.xlu1 %v5195_v52  ;;  %5199 = vadd.xlane.f32.xlu0 %v5198_v21 }
0x18a8   :  { %6861 = vmatpush3.bf16.msra.mxu0 %v6860_v60 }
0x18a9   :  { %6874 = vmatprep.subr.bf16.mxu0 %v7264_v3 }
0x18aa   :  { %5211 = vadd.xlane.f32.xlu0 %v5210_v56 }
0x1933   :  { %v5197_v62 = vpop.xlane.xlu1 %5196  ;;  %v5200_v63 = vpop.xlane.xlu0 %5199 }
0x1934   :  { %v5202_v0 = vmul.f32 0.03125, %v5197_v62  ;;  %v5203_v43 = vmul.f32 0.03125, %v5200_v63 }
0x1936   :  { %v5205_v2 = vsub.f32 %v5190_v35, %v5202_v0  ;;  %v5206_v4 = vsub.f32 %v5191_v51, %v5203_v43 }
0x1937   :  { %v5212_v12 = vpop.xlane.xlu0 %5211 }
0x1938   :  { %v5219_v5 = vmul.f32 0.03125, %v5212_v12  ;;  %v5208_v7 = vmul.f32 %v5205_v2, %v5205_v2  ;;  %v5209_v10 = vmul.f32 %v5206_v4, %v5206_v4 }
0x193a   :  { %v5222_v9 = vadd.f32 1e-05, %v5219_v5  ;;  %v5213_v14 = vsel %vm71_vm1, %v5208_v7, 0.0  ;;  %v5216_v13 = vsel %vm2468_vm12, %v5209_v10, 0.0 }
0x193b   :  { %5214 = vadd.xlane.f32.xlu0 %v5213_v14 }
0x193c   :  { %7226 = vrsqrt.f32 %v5222_v9 }
0x193f   :  { %5217 = vadd.xlane.f32.xlu0 %v5216_v13 }
0x1946   :  { %v7227_v54 = vpop.eup %7226 }
0x1947   :  { %v5228_v61 = vmul.f32 %v7227_v54, %v5204_v50 }
0x1949   :  { %v5239_v17 = vmul.f32 %v5921_v16, %v5228_v61 }
0x194b   :  { %v8181_v15 = vadd.f32 %v5923_v39, %v5239_v17 }
0x194d   :  { %6579 = vmatmul.mubr.msk.f32.vlgmr.msra.gmra.mrb[48].mxu0 %vm71_vm1, %v8181_v15 }
0x194e   :  { %6581 = vmatprep.mubr.msk.f32.mxu0 %vm7265_vm0, %v7266_v6  ;;  %6876 = vmatpush3.bf16.msra.mxu0 %v6875_v31 }
0x194f   :  { %6877 = vmatprep.subr.bf16.mxu0 %v7264_v3 }
0x19c8   :  { %v5215_v36 = vpop.xlane.xlu0 %5214 }
0x19c9   :  { %v5220_v37 = vmul.f32 0.03125, %v5215_v36  ;;  %v5562_v36 = vld [vmem:[%s8315_s13 + $0x18] sm:$0xff] }
0x19cb   :  { %v5223_v38 = vadd.f32 1e-05, %v5220_v37  ;;  %v6878_v37 = vpack.c.bf16 %v5562_v36, %v5561_v33 }
0x19cc   :  { %v5218_v53 = vpop.xlane.xlu0 %5217 }
0x19cd   :  { %7228 = vrsqrt.f32 %v5223_v38  ;;  %v5221_v26 = vmul.f32 0.03125, %v5218_v53  ;;  %6879 = vmatpush3.bf16.msra.mxu0 %v6878_v37 }
0x19ce   :  { %6880 = vmatprep.subr.bf16.mxu0 %v7264_v3 }
0x19cf   :  { %v5224_v1 = vadd.f32 1e-05, %v5221_v26 }
0x19d1   :  { %7230 = vrsqrt.f32 %v5224_v1 }
0x19d7   :  { %v7229_v41 = vpop.eup %7228 }
0x19d8   :  { %v5229_v42 = vmul.f32 %v7229_v41, %v5205_v2 }
0x19da   :  { %v5240_v45 = vmul.f32 %v5921_v16, %v5229_v42 }
0x19db   :  { %v7231_v47 = vpop.eup %7230 }
0x19dc   :  { %v5251_v34 = vadd.f32 %v5923_v39, %v5240_v45  ;;  %v5230_v48 = vmul.f32 %v7231_v47, %v5206_v4 }
0x19de   :  { %6582 = vmatmul.mubr.msk.f32.gmra.mrb[50].mxu0 %vm71_vm1, %v5251_v34  ;;  %v5241_v32 = vmul.f32 %v5921_v16, %v5230_v48 }
0x19df   :  { %6584 = vmatprep.mubr.msk.f32.mxu0 %vm7265_vm0, %v7266_v6 }
0x19e0   :  { %v5252_v49 = vadd.f32 %v5923_v39, %v5241_v32  ;;  %v5947_v32 = vld [vmem:[%s8313_s11 + $0x1] ss:$0 sm:$0xff] }
0x19e2   :  { %6585 = vmatmul.mubr.msk.f32.gmra.mrb[52].mxu0 %vm71_vm1, %v5252_v49 }
0x19e3   :  { %6620 = vmatprep.mubr.msk.f32.mxu0 %vm7265_vm0, %v7266_v6 }
0x1a20   :  { %v5341_v40 = vpop.f32.mrb[48].mxu0 }
0x1a21   :  { %v5342_v50 = vadd.f32 %v5929_v8, %v5341_v40  ;;  %v6580_v18 = vpop.f32.mrb[49].mxu0 }
0x1a23   :  { %v5355_v46 = vmax.f32 %v5342_v50, 0.0  ;;  %v5949_v50 = vld [vmem:[%s8314_s12 + $0x1] ss:$0 sm:$0xff] }
0x1a25   :  { %6604 = vmatmul.mubr.msk.f32.vlgmr.msra.gmra.mrb[48].mxu1 %vm2641_vm11, %v5355_v46 }
0x1a26   :  { %6606 = vmatprep.mubr.msk.f32.mxu1 %vm7265_vm0, %v7266_v6 }
0x1ab1   :  { %v5346_v35 = vpop.f32.mrb[50].mxu0 }
0x1ab2   :  { %v5347_v51 = vadd.f32 %v5929_v8, %v5346_v35  ;;  %v6583_v52 = vpop.f32.mrb[51].mxu0 }
0x1ab4   :  { %v5356_v21 = vmax.f32 %v5347_v51, 0.0 }
0x1ab5   :  { %v5351_v55 = vpop.f32.mrb[52].mxu0 }
0x1ab6   :  { %v5352_v56 = vadd.f32 %v5929_v8, %v5351_v55  ;;  %v6586_v25 = vpop.f32.mrb[53].mxu0  ;;  %6607 = vmatmul.mubr.msk.f32.gmra.mrb[50].mxu1 %vm2641_vm11, %v5356_v21 }
0x1ab7   :  { %6609 = vmatprep.mubr.msk.f32.mxu1 %vm7265_vm0, %v7266_v6 }
0x1ab8   :  { %v5357_v24 = vmax.f32 %v5352_v56, 0.0 }
0x1aba   :  { %6610 = vmatmul.mubr.msk.f32.gmra.mrb[52].mxu1 %vm2641_vm11, %v5357_v24 }
0x1af8   :  { %v5450_v19 = vpop.f32.mrb[48].mxu1 }
0x1af9   :  { %v6605_v57 = vpop.f32.mrb[49].mxu1  ;;  %v5451_v62 = vadd.f32 %v5942_v58, %v5450_v19 }
0x1afb   :  { %v5464_v4 = vadd.f32 %v5451_v62, %v8181_v15 }
0x1afd   :  { %v5467_v14 = vsel %vm71_vm1, %v5464_v4, 0.0 }
0x1b89   :  { %v5455_v60 = vpop.f32.mrb[50].mxu1 }
0x1b8a   :  { %v5456_v63 = vadd.f32 %v5942_v58, %v5455_v60  ;;  %v6608_v0 = vpop.f32.mrb[51].mxu1 }
0x1b8c   :  { %v5465_v43 = vadd.f32 %v5456_v63, %v5251_v34 }
0x1b8d   :  { %v5460_v2 = vpop.f32.mrb[52].mxu1 }
0x1b8e   :  { %v5461_v12 = vadd.f32 %v5942_v58, %v5460_v2  ;;  %v6611_v5 = vpop.f32.mrb[53].mxu1  ;;  %v5470_v7 = vsel %vm71_vm1, %v5465_v43, 0.0 }
0x1b8f   :  { %5471 = vadd.xlane.f32.xlu0 %v5470_v7 }
0x1b90   :  { %v5466_v9 = vadd.f32 %v5461_v12, %v5252_v49 }
0x1b92   :  { %v5473_v10 = vsel %vm2468_vm12, %v5466_v9, 0.0 }
0x1b93   :  { %5468 = vadd.xlane.f32.xlu0 %v5467_v14  ;;  %5474 = vadd.xlane.f32.xlu1 %v5473_v10 }
0x1c1c   :  { %v5472_v13 = vpop.xlane.xlu0 %5471 }
0x1c1d   :  { %v5477_v54 = vmul.f32 0.03125, %v5472_v13 }
0x1c1f   :  { %v5480_v16 = vsub.f32 %v5465_v43, %v5477_v54 }
0x1c20   :  { %v5475_v61 = vpop.xlane.xlu1 %5474  ;;  %v5469_v39 = vpop.xlane.xlu0 %5468 }
0x1c21   :  { %v5478_v17 = vmul.f32 0.03125, %v5475_v61  ;;  %v5476_v23 = vmul.f32 0.03125, %v5469_v39  ;;  %v5483_v15 = vmul.f32 %v5480_v16, %v5480_v16 }
0x1c23   :  { %v5481_v44 = vsub.f32 %v5466_v9, %v5478_v17  ;;  %v5479_v11 = vsub.f32 %v5464_v4, %v5476_v23  ;;  %v5488_v22 = vsel %vm71_vm1, %v5483_v15, 0.0  ;;  %v5644_v17 = vld [vmem:[%s8317_s15] sm:$0xff]  ;;  %v5645_v23 = vld [vmem:[%s8317_s15 + $0x8] sm:$0xff] }
0x1c24   :  { %5489 = vadd.xlane.f32.xlu1 %v5488_v22  ;;  %v6881_v15 = vpack.c.bf16 %v5645_v23, %v5644_v17  ;;  %v5647_v22 = vld [vmem:[%s8317_s15 + $0x18] sm:$0xff] }
0x1c25   :  { %v5484_v27 = vmul.f32 %v5481_v44, %v5481_v44  ;;  %v5482_v28 = vmul.f32 %v5479_v11, %v5479_v11 }
0x1c27   :  { %v5491_v29 = vsel %vm2468_vm12, %v5484_v27, 0.0  ;;  %v5485_v20 = vsel %vm71_vm1, %v5482_v28, 0.0  ;;  %v5950_v28 = vld [vmem:[%s8316_s14] ss:$0 sm:$0xff] }
0x1c28   :  { %5492 = vadd.xlane.f32.xlu0 %v5491_v29  ;;  %5486 = vadd.xlane.f32.xlu1 %v5485_v20 }
0x1cb1   :  { %v5490_v38 = vpop.xlane.xlu1 %5489 }
0x1cb2   :  { %v5495_v53 = vmul.f32 0.03125, %v5490_v38 }
0x1cb4   :  { %v5498_v26 = vadd.f32 1e-05, %v5495_v53 }
0x1cb5   :  { %v5487_v1 = vpop.xlane.xlu1 %5486  ;;  %v5493_v41 = vpop.xlane.xlu0 %5492 }
0x1cb6   :  { %7232 = vrsqrt.f32 %v5498_v26  ;;  %v5494_v42 = vmul.f32 0.03125, %v5487_v1  ;;  %v5496_v45 = vmul.f32 0.03125, %v5493_v41 }
0x1cb8   :  { %v5497_v47 = vadd.f32 1e-05, %v5494_v42  ;;  %v5499_v34 = vadd.f32 1e-05, %v5496_v45 }
0x1cba   :  { %7234 = vrsqrt.f32 %v5497_v47 }
0x1cbb   :  { %7236 = vrsqrt.f32 %v5499_v34 }
0x1cc0   :  { %v7233_v48 = vpop.eup %7232 }
0x1cc1   :  { %v5504_v49 = vmul.f32 %v7233_v48, %v5480_v16 }
0x1cc3   :  { %v5515_v8 = vmul.f32 %v5947_v32, %v5504_v49 }
0x1cc4   :  { %v7235_v40 = vpop.eup %7234 }
0x1cc5   :  { %v7237_v18 = vpop.eup %7236  ;;  %v5503_v46 = vmul.f32 %v7235_v40, %v5479_v11  ;;  %v5526_v51 = vadd.f32 %v5949_v50, %v5515_v8  ;;  %v5646_v11 = vld [vmem:[%s8317_s15 + $0x10] sm:$0xff]  ;;  %s7240_s15 = scalar_lea.vmem %s5737_s8, 32 }
0x1cc6   :  { %v5505_v35 = vmul.f32 %v7237_v18, %v5481_v44  ;;  %v6884_v27 = vpack.c.bf16 %v5647_v22, %v5646_v11  ;;  %p7241_p0 = scmp.ne.s32.totalorder %s5737_s8, %s7240_s15  ;;  %p7246_p2 = scmp.lt.s32.totalorder %s7240_s15, %s7240_s15 }
0x1cc7   :  { %v5514_v52 = vmul.f32 %v5947_v32, %v5503_v46  ;;  %v5529_v25 = vsel %vm1305_vm10, %v5526_v51, 0.0  ;;  %v5542_v19 = vrot.slane %v5526_v51, 1 }
0x1cc8   :  { %v5516_v21 = vmul.f32 %v5947_v32, %v5505_v35  ;;  %p7247_p3 = por %p7246_p2, %p7245_p1 }
0x1cc9   :  { %v5525_v55 = vadd.f32 %v5949_v50, %v5514_v52 }
0x1cca   :  { %v5527_v56 = vadd.f32 %v5949_v50, %v5516_v21  ;;  %p7248_p4 = pnand %p7247_p3, %p7241_p0 }
0x1ccb   :  { %v5528_v24 = vsel %vm71_vm1, %v5525_v55, 0.0 }
0x1ccc   :  { %v5530_v57 = vadd.f32 %v5529_v25, %v5528_v24  ;;  %v5543_v58 = vrot.slane %v5527_v56, 1 }
0x1cce   :  { %v5531_v60 = vrot.slane %v5530_v57, 4  ;;  %v5544_v62 = vsel %vm1308_vm3, %v5542_v19, %v5543_v58  ;;  %v5548_v63 = vsel %vm1305_vm10, %v5543_v58, 0.0 }
0x1ccf   :  { %v5547_v0 = vsel %vm71_vm1, %v5544_v62, 0.0 }
0x1cd0   :  { %v5532_v43 = vadd.f32 %v5531_v60, %v5530_v57  ;;  %v5549_v2 = vadd.f32 %v5548_v63, %v5547_v0 }
0x1cd2   :  { %v5533_v4 = vrot.slane %v5532_v43, 2  ;;  %v5550_v12 = vrot.slane %v5549_v2, 4 }
0x1cd4   :  { %v5534_v5 = vadd.f32 %v5533_v4, %v5532_v43  ;;  %v5551_v7 = vadd.f32 %v5550_v12, %v5549_v2 }
0x1cd6   :  { %v5535_v9 = vrot.slane %v5534_v5, 1  ;;  %v5552_v14 = vrot.slane %v5551_v7, 2 }
0x1cd8   :  { %v5536_v10 = vadd.f32 %v5535_v9, %v5534_v5  ;;  %v5553_v13 = vadd.f32 %v5552_v14, %v5551_v7 }
0x1cda   :  { %v5538_v54 = vmul.f32 0.11111111, %v5536_v10  ;;  %v5554_v16 = vrot.slane %v5553_v13, 1 }
0x1cdc   :  { %5539 = vst.msk [vmem:[#allocation3] sm:$0x1] %vm1305_vm10, %v5538_v54  ;;  %v5555_v61 = vadd.f32 %v5554_v16, %v5553_v13 }
0x1cde   :  { %v5556_v39 = vmul.f32 0.11111111, %v5555_v61 }
0x1ce0   :  { %5557 = vst.msk [vmem:[#allocation3 + $0x1] sm:$0x1] %vm1305_vm10, %v5556_v39 }
0x1ce7   :  { %v5558_v44 = vld [vmem:[#allocation3] sm:$0x3] }
0x1ce8   :  { %6621 = vmatmul.mubr.msk.f32.vlgmr.msra.gmra.mrb[54].mxu0 %vm71_vm1, %v5558_v44 }
0x1ce9   :  { %6882 = vmatpush3.bf16.msra.mxu0 %v6881_v15  ;;  %6631 = vmatprep.mubr.msk.f32.mxu0 %vm7265_vm0, %v7266_v6 }
0x1cea   :  { %6883 = vmatprep.subr.bf16.mxu0 %v7264_v3  ;;  %v5952_v3 = vld [vmem:[%s8318_s16] ss:$0 sm:$0xff] }
0x1ced   :  { %6885 = vmatpush3.bf16.msra.mxu0 %v6884_v27 }
0x1dbb   :  { %v5639_v29 = vpop.f32.mrb[54].mxu0 }
0x1dbc   :  { %v5640_v20 = vadd.f32 %v5950_v28, %v5639_v29  ;;  %v6622_v59 = vpop.f32.mrb[55].mxu0 }
0x1dbe   :  { %v5643_v6 = vmax.f32 %v5640_v20, 0.0 }
0x1dc0   :  { %6632 = vmatmul.mubr.msk.f32.vlgmr.msra.gmra.mrb[56].mxu0 %vm71_vm1, %v5643_v6 }
0x1e93   :  { %v5724_v30 = vpop.f32.mrb[56].mxu0 }
0x1e94   :  { %v5725_v31 = vadd.f32 %v5952_v3, %v5724_v30  ;;  %v6633_v33 = vpop.f32.mrb[57].mxu0 }
0x1e96   :  { %5729 = vst.msk [vmem:[#allocation4] sm:$0x3] %vm5728_vm13, %v5725_v31 }
0x1e97   :  { %7251 = shalt.err (!%p7248_p4)
}
0x1e98   :  { %s7252_s10 = scalar_lea.hbm %s8319_s17, 32 }
0x1e99   :  { %p7253_p5 = scmp.ne.s32.totalorder %s8319_s17, %s7252_s10  ;;  %p7256_p6 = scmp.lt.u32.totalorder %s7252_s10, %s8319_s17 }
0x1e9b   :  { %p7258_p7 = pnand %p7256_p6, %p7253_p5 }
0x1e9d   :  { %7261 = shalt.err (!%p7258_p7)
}
0x1e9e   :  { %5739 = dma.vmem_to_hbm [thread:$0]  %s5737_s8, 32, %s8319_s17, [#allocation5]  }
0x1e9f   :  { %7262 = dma.done.wait [#allocation5], 32  }
0x1ea0   :  { %7263 = vsyncadd [#allocation5], 4294967264 }
0x1ea1   :  { %5743 = vsyncpa [#allocation5], 1 }

</bundles_post_ra>
